<compile_context>
chip_gen: v7x
topology: tpu7x:2x2x1
jax: 0.10.0
libtpu: 0.0.40
codegen_flags: <defaults>
</compile_context>

<pallas_src>
import functools

import jax
import jax.numpy as jnp
from jax import lax
from jax.experimental import pallas as pl
from jax.experimental.pallas import tpu as pltpu

EPS = 1e-5          # nn.BatchNorm2d default eps
K = 3               # kernel_size
PAD = 1             # padding
LANE = 128          # channel padding target (TPU lane width)


def _round_up(x, m):
    return ((x + m - 1) // m) * m


def _vmem_limit_bytes():
    """~75% of physical VMEM: 96 MiB on v5e/v6e (128 MiB), ~48 MiB on v7x."""
    cap = None
    try:
        cap = getattr(pltpu.get_tpu_info(), "vmem_capacity_bytes", None)
    except Exception:
        cap = None
    if not cap:
        cap = 64 * 1024 * 1024
    return min(int(cap) * 3 // 4, 96 * 1024 * 1024)


def _default_compute_dtype():
    """bf16 MXU inputs on v6e/v7x; f32 on v5e (no bf16 VPU/EUP there)."""
    try:
        kind = jax.devices()[0].device_kind.lower()
    except Exception:
        return jnp.bfloat16
    if "v5 lite" in kind or "v5e" in kind or "v5lite" in kind:
        return jnp.float32
    return jnp.bfloat16


def _divisors(n):
    return [d for d in range(1, n + 1) if n % d == 0]


def _pick_conv_tile_rows(n, h, w, cin_p, cout_p, itemsize, vmem_limit):
    """Largest row tile whose real (dtype-aware) VMEM footprint fits ~60% of
    the limit: double-buffered input/output blocks, packed weights, the halo
    scratch and the in-kernel f32 accumulator / packed-LHS temporaries."""
    budget = int(vmem_limit * 0.6)
    fixed = 2 * K * (K * cin_p) * cout_p * itemsize          # weights (dbl buf)
    best = None
    for th in _divisors(h):
        per = 2 * th * w * cin_p * itemsize                  # input block (x2)
        per += 2 * th * w * cout_p * itemsize                # y block (x2)
        per += 2 * w * cin_p * itemsize                      # halo scratch
        per += 3 * (th + 2) * w * cin_p * itemsize           # xv / xl / xr temps
        per += th * w * K * cin_p * itemsize                 # packed LHS temp
        per += th * w * cout_p * 4                           # f32 accumulator
        if fixed + per <= budget:
            best = th
    if best is None:
        best = 1
    # v7x has 2 TensorCores: keep >= 2 parallel blocks so neither sits idle.
    if n * (h // best) < 2:
        smaller = [d for d in _divisors(h) if d < h]
        if smaller:
            best = smaller[-1]
    return best


def _pick_pool_tile_rows(n, h, w, cp, in_itemsize, vmem_limit):
    """Row tile for the (halo-free) fused BN+ReLU+maxpool sweep."""
    budget = int(vmem_limit * 0.6)
    best = None
    for th in [d for d in _divisors(h) if d % 2 == 0]:
        per = 2 * th * w * cp * in_itemsize                  # y2 block (x2)
        per += 2 * th * w * cp * 4                           # feats out (x2)
        per += 2 * (th // 2) * (w // 2) * cp * 4             # pooled out (x2)
        per += th * w * cp * 4                               # f32 working copy
        if per <= budget:
            best = th
    if best is None:
        best = 2
    if n * (h // best) < 2:
        smaller = [d for d in _divisors(h) if d % 2 == 0 and d < h]
        if smaller:
            best = smaller[-1]
    return best


# ---------------------------------------------------------------------------
# Kernels
# ---------------------------------------------------------------------------
def _conv_bn_stats_kernel(scale_ref, shift_ref, w_ref, x_ref, x_hbm,
                          y_ref, stats_ref, halo, sems, *, th, w, h, apply_act):
    """Fused (previous-layer BN + ReLU) -> 3x3 conv -> per-tile BN stats.

    scale_ref/shift_ref: (1, 1, Cin_p) f32 per-channel BN affine of the
                         PREVIOUS layer (ignored when apply_act=False).
    w_ref:               (3, 3*Cin_p, Cout_p) taps grouped along K.
    x_ref:               (th, w, Cin_p) pipelined bulk rows of the input.
    x_hbm:               full (N, H, W, Cin_p) input in HBM (halo rows only).
    y_ref:               (th, w, Cout_p) pre-BN conv output.
    stats_ref:           (8, Cout_p) f32; row 0 = sum, row 1 = sum of squares.
    halo:                (2, w, Cin_p) VMEM scratch for the two halo rows.
    """
    b = pl.program_id(0)
    j = pl.program_id(1)
    nh = pl.num_programs(1)
    row0 = j * th
    cin_p = x_ref.shape[-1]
    cout_p = w_ref.shape[-1]

    # --- manual DMA of the two 1-pixel halo rows (bulk rows are pipelined by
    #     the BlockSpec); stale / out-of-image rows are masked below. ---
    @pl.when(j > 0)
    def _():
        pltpu.make_async_copy(x_hbm.at[b, pl.ds(row0 - 1, 1), :, :],
                              halo.at[pl.ds(0, 1), :, :], sems.at[0]).start()

    @pl.when(j < nh - 1)
    def _():
        pltpu.make_async_copy(x_hbm.at[b, pl.ds(row0 + th, 1), :, :],
                              halo.at[pl.ds(1, 1), :, :], sems.at[1]).start()

    @pl.when(j > 0)
    def _():
        pltpu.make_async_copy(x_hbm.at[b, pl.ds(row0 - 1, 1), :, :],
                              halo.at[pl.ds(0, 1), :, :], sems.at[0]).wait()

    @pl.when(j < nh - 1)
    def _():
        pltpu.make_async_copy(x_hbm.at[b, pl.ds(row0 + th, 1), :, :],
                              halo.at[pl.ds(1, 1), :, :], sems.at[1]).wait()

    # Assemble the (th+2, w, Cin_p) halo'd tile.
    xv = jnp.concatenate([halo[0:1], x_ref[...], halo[1:2]], axis=0)

    # Fused previous-layer BatchNorm + ReLU (skipped for the first layer).
    if apply_act:
        act = xv.astype(jnp.float32) * scale_ref[...] + shift_ref[...]
        xv = jnp.maximum(act, 0.0).astype(x_ref.dtype)

    # Zero rows outside the image: conv zero padding + stale halo content.
    r = lax.broadcasted_iota(jnp.int32, (th + 2, 1, 1), 0) + (row0 - 1)
    xv = jnp.where((r >= 0) & (r < h), xv, jnp.zeros_like(xv))

    # Width shifts computed once and reused for all three kernel rows.
    zcol = jnp.zeros((th + 2, 1, cin_p), xv.dtype)
    xl = jnp.concatenate([zcol, xv[:, :w - 1, :]], axis=1)   # input column c-1
    xr = jnp.concatenate([xv[:, 1:, :], zcol], axis=1)       # input column c+1

    # 3 MXU matmuls with K = 3*Cin_p (taps grouped along the reduction dim).
    acc = jnp.zeros((th * w, cout_p), jnp.float32)
    for ki in range(K):
        lhs = jnp.concatenate(
            [xl[ki:ki + th], xv[ki:ki + th], xr[ki:ki + th]],
            axis=-1).reshape(th * w, K * cin_p)
        acc = acc + jnp.dot(lhs, w_ref[ki], preferred_element_type=jnp.float32)

    y_ref[...] = acc.reshape(th, w, cout_p).astype(y_ref.dtype)

    # Per-tile BN partial sums, padded to 8 sublanes (lane-dense store).
    s0 = jnp.sum(acc, axis=0, keepdims=True)
    s1 = jnp.sum(acc * acc, axis=0, keepdims=True)
    stats_ref[...] = jnp.concatenate(
        [s0, s1, jnp.zeros((6, cout_p), jnp.float32)], axis=0)


def _bn_relu_pool_kernel(y_ref, scale_ref, shift_ref, feat_ref, pool_ref, *, cp):
    """Fused BN + ReLU + 2x2/stride-2 maxpool, emitting feats and pooled.

    The wrapper folded W-pairs into the lane dim: y_ref is (th, W//2, 2*Cp),
    so both the W-direction and H-direction pool reductions stay layout
    friendly and the output stores are lane-dense.
    """
    a = jnp.maximum(
        y_ref[...].astype(jnp.float32) * scale_ref[...] + shift_ref[...], 0.0)
    feat_ref[...] = a.astype(feat_ref.dtype)
    m = jnp.maximum(a[:, :, :cp], a[:, :, cp:])       # pool over W pairs (lanes)
    th, wh = m.shape[0], m.shape[1]
    m = m.reshape(th // 2, 2, wh, cp)                 # split the major (H) dim
    pool_ref[...] = jnp.max(m, axis=1).astype(pool_ref.dtype)


# ---------------------------------------------------------------------------
# Layer wrappers
# ---------------------------------------------------------------------------
def _conv_layer(x, w_packed, scale, shift, *, apply_act, tile_rows, vmem_limit):
    """One fused [prev-BN+ReLU] -> Conv2d(3x3, pad 1) -> partial-stats pass."""
    n, h, w, cin_p = x.shape
    cout_p = w_packed.shape[-1]
    th = tile_rows
    assert h % th == 0
    nh = h // th
    compute_dtype = x.dtype

    cparams = pltpu.CompilerParams(
        dimension_semantics=("parallel", "parallel"),
        vmem_limit_bytes=vmem_limit)

    return pl.pallas_call(
        functools.partial(_conv_bn_stats_kernel, th=th, w=w, h=h,
                          apply_act=apply_act),
        out_shape=(
            jax.ShapeDtypeStruct((n, h, w, cout_p), compute_dtype),
            jax.ShapeDtypeStruct((n, nh, 8, cout_p), jnp.float32),
        ),
        grid=(n, nh),
        in_specs=[
            pl.BlockSpec((1, 1, cin_p), lambda i, j: (0, 0, 0)),
            pl.BlockSpec((1, 1, cin_p), lambda i, j: (0, 0, 0)),
            pl.BlockSpec((K, K * cin_p, cout_p), lambda i, j: (0, 0, 0)),
            pl.BlockSpec((None, th, w, cin_p), lambda i, j: (i, j, 0, 0)),
            pl.BlockSpec(memory_space=pl.ANY),        # same array, halo DMA only
        ],
        out_specs=(
            pl.BlockSpec((None, th, w, cout_p), lambda i, j: (i, j, 0, 0)),
            pl.BlockSpec((None, None, 8, cout_p), lambda i, j: (i, j, 0, 0)),
        ),
        scratch_shapes=[
            pltpu.VMEM((2, w, cin_p), compute_dtype),
            pltpu.SemaphoreType.DMA((2,)),
        ],
        compiler_params=cparams,
    )(scale, shift, w_packed, x, x)


def _bn_scale_shift(stats, gamma_p, beta_p, tile_pixels, total_pixels):
    """Tiny C-sized epilogue: per-tile sums -> per-channel BN scale/shift.

    Combines per-tile sums with a shifted (parallel-variance) formula to avoid
    the worst of the E[x^2]-E[x]^2 cancellation.  The conv bias is dropped:
    training-mode BN subtracts the batch mean, which cancels it exactly.
    """
    c = stats.shape[-1]
    s = stats[..., 0, :].reshape(-1, c)
    ss = stats[..., 1, :].reshape(-1, c)
    mean_i = s / tile_pixels
    m2_i = ss - s * mean_i
    mean = jnp.sum(s, axis=0) / total_pixels
    var = (jnp.sum(m2_i, axis=0)
           + tile_pixels * jnp.sum((mean_i - mean) ** 2, axis=0)) / total_pixels
    var = jnp.maximum(var, 0.0)
    inv_std = lax.rsqrt(var + EPS)
    scale = gamma_p * inv_std
    shift = beta_p - mean * scale
    return scale.reshape(1, 1, c), shift.reshape(1, 1, c)


def _bn_relu_maxpool(y, scale, shift, *, tile_rows, vmem_limit):
    """Fused BN + ReLU + MaxPool2d(2,2): one pass over y, two outputs."""
    n, h, w, cp = y.shape
    th = tile_rows
    assert h % th == 0 and th % 2 == 0 and w % 2 == 0
    y_folded = y.reshape(n, h, w // 2, 2 * cp)        # fold W pairs into lanes
    scale2 = jnp.concatenate([scale, scale], axis=-1)
    shift2 = jnp.concatenate([shift, shift], axis=-1)

    cparams = pltpu.CompilerParams(
        dimension_semantics=("parallel", "parallel"),
        vmem_limit_bytes=vmem_limit)

    feats, pooled = pl.pallas_call(
        functools.partial(_bn_relu_pool_kernel, cp=cp),
        out_shape=(
            jax.ShapeDtypeStruct((n, h, w // 2, 2 * cp), jnp.float32),
            jax.ShapeDtypeStruct((n, h // 2, w // 2, cp), jnp.float32),
        ),
        grid=(n, h // th),
        in_specs=[
            pl.BlockSpec((None, th, w // 2, 2 * cp), lambda i, j: (i, j, 0, 0)),
            pl.BlockSpec((1, 1, 2 * cp), lambda i, j: (0, 0, 0)),
            pl.BlockSpec((1, 1, 2 * cp), lambda i, j: (0, 0, 0)),
        ],
        out_specs=(
            pl.BlockSpec((None, th, w // 2, 2 * cp), lambda i, j: (i, j, 0, 0)),
            pl.BlockSpec((None, th // 2, w // 2, cp), lambda i, j: (i, j, 0, 0)),
        ),
        compiler_params=cparams,
    )(y_folded, scale2, shift2)
    return feats.reshape(n, h, w, cp), pooled


def _pack_weights(w_oihw, cin_p, cout_p):
    """(O, I, 3, 3) -> (3, 3*Cin_p, Cout_p): taps grouped along the K dim."""
    cout, cin, kh, kw = w_oihw.shape
    w = jnp.transpose(w_oihw, (2, 3, 1, 0))            # (ki, kj, ci, co)
    w = jnp.pad(w, ((0, 0), (0, 0), (0, cin_p - cin), (0, cout_p - cout)))
    return w.reshape(kh, kw * cin_p, cout_p)


def encoder_forward(x_nchw, params, *, compute_dtype=None):
    """Encoder forward: (Conv3x3 + BN(train) + ReLU) x2, then MaxPool2d(2,2).

    Returns (x, pooled_x) as NCHW f32, matching the PyTorch module.
    """
    if compute_dtype is None:
        compute_dtype = _default_compute_dtype()
    compute_dtype = jnp.dtype(compute_dtype)
    itemsize = compute_dtype.itemsize

    x = jnp.transpose(x_nchw, (0, 2, 3, 1)).astype(jnp.float32)   # NCHW -> NHWC
    n, h, w, cin = x.shape
    (w1, _b1, g1, bt1), (w2, _b2, g2, bt2) = params
    cout = w1.shape[0]
    assert h % 2 == 0 and w % 2 == 0

    cin_p = _round_up(cin, LANE)
    cout_p = _round_up(cout, LANE)
    vmem_limit = _vmem_limit_bytes()

    gamma1 = jnp.pad(g1.astype(jnp.float32), (0, cout_p - cout))
    beta1 = jnp.pad(bt1.astype(jnp.float32), (0, cout_p - cout))
    gamma2 = jnp.pad(g2.astype(jnp.float32), (0, cout_p - cout))
    beta2 = jnp.pad(bt2.astype(jnp.float32), (0, cout_p - cout))

    x0 = jnp.pad(x, ((0, 0), (0, 0), (0, 0), (0, cin_p - cin))).astype(compute_dtype)
    w1p = _pack_weights(w1, cin_p, cout_p).astype(compute_dtype)
    w2p = _pack_weights(w2, cout_p, cout_p).astype(compute_dtype)

    ones1 = jnp.ones((1, 1, cin_p), jnp.float32)
    zeros1 = jnp.zeros((1, 1, cin_p), jnp.float32)

    # Layer 1: conv + per-tile stats (no preceding activation to fuse).
    th1 = _pick_conv_tile_rows(n, h, w, cin_p, cout_p, itemsize, vmem_limit)
    y1, stats1 = _conv_layer(x0, w1p, ones1, zeros1, apply_act=False,
                             tile_rows=th1, vmem_limit=vmem_limit)
    scale1, shift1 = _bn_scale_shift(stats1, gamma1, beta1, th1 * w, n * h * w)

    # Layer 2: BN1 + ReLU fused into this conv's input load.
    th2 = _pick_conv_tile_rows(n, h, w, cout_p, cout_p, itemsize, vmem_limit)
    y2, stats2 = _conv_layer(y1, w2p, scale1, shift1, apply_act=True,
                             tile_rows=th2, vmem_limit=vmem_limit)
    scale2, shift2 = _bn_scale_shift(stats2, gamma2, beta2, th2 * w, n * h * w)

    # BN2 + ReLU fused into the maxpool; emits feats and pooled in one pass.
    thp = _pick_pool_tile_rows(n, h, w, cout_p, itemsize, vmem_limit)
    feats, pooled = _bn_relu_maxpool(y2, scale2, shift2, tile_rows=thp,
                                     vmem_limit=vmem_limit)

    feats = jnp.transpose(feats[..., :cout], (0, 3, 1, 2))
    pooled = jnp.transpose(pooled[..., :cout], (0, 3, 1, 2))
    return feats, pooled


# ---------------------------------------------------------------------------
# Pure-JAX reference (PyTorch-equivalent) and parameter init
# ---------------------------------------------------------------------------
def reference_forward(x, params):
    for (wgt, b, g, bt) in params:
        y = lax.conv_general_dilated(
            x, wgt, window_strides=(1, 1), padding=((PAD, PAD), (PAD, PAD)),
            dimension_numbers=("NCHW", "OIHW", "NCHW"),
            precision=lax.Precision.HIGHEST)
        y = y + b[None, :, None, None]
        mean = y.mean(axis=(0, 2, 3), keepdims=True)
        var = ((y - mean) ** 2).mean(axis=(0, 2, 3), keepdims=True)
        y = (y - mean) * lax.rsqrt(var + EPS)
        x = jnp.maximum(y * g[None, :, None, None] + bt[None, :, None, None], 0.0)
    pooled = lax.reduce_window(x, -jnp.inf, lax.max,
                               (1, 1, 2, 2), (1, 1, 2, 2), "VALID")
    return x, pooled


def init_params(key, in_channels, out_channels):
    params = []
    cin = in_channels
    for _ in range(2):
        key, kw, kb = jax.random.split(key, 3)
        fan_in = cin * K * K
        bound = 1.0 / float(fan_in) ** 0.5
        w = jax.random.uniform(kw, (out_channels, cin, K, K),
                               jnp.float32, -bound, bound)
        b = jax.random.uniform(kb, (out_channels,), jnp.float32, -bound, bound)
        gamma = jnp.ones((out_channels,), jnp.float32)
        beta = jnp.zeros((out_channels,), jnp.float32)
        params.append((w, b, gamma, beta))
        cin = out_channels
    return params


if __name__ == "__main__":
    N, CIN, COUT, H, W = 2, 4, 8, 16, 16
    key = jax.random.PRNGKey(0)
    key, kx = jax.random.split(key)
    x = jax.random.normal(kx, (N, CIN, H, W), jnp.float32)
    params = init_params(key, CIN, COUT)

    ref_x, ref_pool = jax.block_until_ready(reference_forward(x, params))

    # Exact path (f32 MXU inputs): must match the PyTorch-equivalent reference.
    fwd_f32 = jax.jit(functools.partial(encoder_forward,
                                        compute_dtype=jnp.float32))
    out_x, out_pool = jax.block_until_ready(fwd_f32(x, params))
    assert out_x.shape == (N, COUT, H, W), out_x.shape
    assert out_pool.shape == (N, COUT, H // 2, W // 2), out_pool.shape
    assert jnp.allclose(out_x, ref_x, atol=5e-4, rtol=5e-4), (
        float(jnp.max(jnp.abs(out_x - ref_x))))
    assert jnp.allclose(out_pool, ref_pool, atol=5e-4, rtol=5e-4), (
        float(jnp.max(jnp.abs(out_pool - ref_pool))))

    # Fast path (bf16 MXU inputs / intermediates, f32 statistics): v6e/v7x
    # recommendation -- only bf16 rounding noise vs the f32 reference.
    fwd_bf16 = jax.jit(functools.partial(encoder_forward,
                                         compute_dtype=jnp.bfloat16))
    bx, bp = jax.block_until_ready(fwd_bf16(x, params))
    assert jnp.allclose(bx, ref_x, atol=2e-1, rtol=2e-1), (
        float(jnp.max(jnp.abs(bx - ref_x))))
    assert jnp.allclose(bp, ref_pool, atol=2e-1, rtol=2e-1), (
        float(jnp.max(jnp.abs(bp - ref_pool))))

    print("KERNEL_OK")
</pallas_src>

<mosaic_0001>
module attributes {stable_mosaic.version = 11 : i64} {
  func.func @_conv_bn_stats_kernel(%arg0: i32, %arg1: i32, %arg2: memref<1x1x128xf32, #tpu.memory_space<vmem>>, %arg3: memref<1x1x128xf32, #tpu.memory_space<vmem>>, %arg4: memref<3x384x128xf32, #tpu.memory_space<vmem>>, %arg5: memref<1x16x16x128xf32, #tpu.memory_space<vmem>>, %arg6: memref<2x16x16x128xf32, #tpu.memory_space<any>>, %arg7: memref<1x16x16x128xf32, #tpu.memory_space<vmem>>, %arg8: memref<1x1x8x128xf32, #tpu.memory_space<vmem>>, %arg9: memref<2x16x128xf32, #tpu.memory_space<vmem>>, %arg10: memref<2x!tpu.dma_semaphore, #tpu.memory_space<semaphore_mem>>) attributes {dimension_semantics = [#tpu.dimension_semantics<parallel>, #tpu.dimension_semantics<parallel>], iteration_bounds = array<i64: 2, 1>, scalar_prefetch = 0 : i64, scratch_operands = 2 : i64, tpu.core_type = #tpu.core_type<tc>, window_params = [{pipeline_mode = #tpu.pipeline_mode<synchronous>, transform_indices = @transform_0, window_bounds = array<i64: 1, 1, 128>}, {pipeline_mode = #tpu.pipeline_mode<synchronous>, transform_indices = @transform_1, window_bounds = array<i64: 1, 1, 128>}, {pipeline_mode = #tpu.pipeline_mode<synchronous>, transform_indices = @transform_2, window_bounds = array<i64: 3, 384, 128>}, {transform_indices = @transform_3, window_bounds = array<i64: 1, 16, 16, 128>}, {}, {transform_indices = @transform_5, window_bounds = array<i64: 1, 16, 16, 128>}, {transform_indices = @transform_6, window_bounds = array<i64: 1, 1, 8, 128>}]} {
    %c16_i32 = arith.constant 16 : i32
    %0 = arith.muli %arg1, %c16_i32 : i32
    %c0_i32 = arith.constant 0 : i32
    %1 = arith.cmpi sgt, %arg1, %c0_i32 : i32
    %2 = arith.extui %1 : i1 to i32
    %c0_i32_0 = arith.constant 0 : i32
    %3 = arith.cmpi ne, %2, %c0_i32_0 : i32
    scf.if %3 {
      %c1_i32_41 = arith.constant 1 : i32
      %78 = arith.subi %0, %c1_i32_41 : i32
      %c0_i32_42 = arith.constant 0 : i32
      %c0_i32_43 = arith.constant 0 : i32
      %c0_i32_44 = arith.constant 0 : i32
      %79 = tpu.memref_slice %arg6[%arg0, %78, %c0_i32_43, %c0_i32_44] : memref<2x16x16x128xf32, #tpu.memory_space<any>> -> memref<1x1x16x128xf32, #tpu.memory_space<any>>
      %80 = tpu.memref_squeeze %79 : memref<1x1x16x128xf32, #tpu.memory_space<any>> -> memref<1x16x128xf32, #tpu.memory_space<any>>
      %c0_i32_45 = arith.constant 0 : i32
      %c0_i32_46 = arith.constant 0 : i32
      %c0_i32_47 = arith.constant 0 : i32
      %81 = tpu.memref_slice %arg9[%c0_i32_45, %c0_i32_46, %c0_i32_47] : memref<2x16x128xf32, #tpu.memory_space<vmem>> -> memref<1x16x128xf32, #tpu.memory_space<vmem>>
      %82 = tpu.memref_slice %arg10[%c0_i32_42] : memref<2x!tpu.dma_semaphore, #tpu.memory_space<semaphore_mem>> -> memref<1x!tpu.dma_semaphore, #tpu.memory_space<semaphore_mem>>
      %83 = tpu.memref_squeeze %82 : memref<1x!tpu.dma_semaphore, #tpu.memory_space<semaphore_mem>> -> memref<!tpu.dma_semaphore, #tpu.memory_space<semaphore_mem>>
      tpu.enqueue_dma source(%80 : memref<1x16x128xf32, #tpu.memory_space<any>>) target(%81 : memref<1x16x128xf32, #tpu.memory_space<vmem>>) target_semaphore(%83 : memref<!tpu.dma_semaphore, #tpu.memory_space<semaphore_mem>>)
    } else {
    }
    %c0_i32_1 = arith.constant 0 : i32
    %4 = arith.cmpi slt, %arg1, %c0_i32_1 : i32
    %5 = arith.extui %4 : i1 to i32
    %c0_i32_2 = arith.constant 0 : i32
    %6 = arith.cmpi ne, %5, %c0_i32_2 : i32
    scf.if %6 {
      %c16_i32_41 = arith.constant 16 : i32
      %78 = arith.addi %0, %c16_i32_41 : i32
      %c1_i32_42 = arith.constant 1 : i32
      %c0_i32_43 = arith.constant 0 : i32
      %c0_i32_44 = arith.constant 0 : i32
      %79 = tpu.memref_slice %arg6[%arg0, %78, %c0_i32_43, %c0_i32_44] : memref<2x16x16x128xf32, #tpu.memory_space<any>> -> memref<1x1x16x128xf32, #tpu.memory_space<any>>
      %80 = tpu.memref_squeeze %79 : memref<1x1x16x128xf32, #tpu.memory_space<any>> -> memref<1x16x128xf32, #tpu.memory_space<any>>
      %c1_i32_45 = arith.constant 1 : i32
      %c0_i32_46 = arith.constant 0 : i32
      %c0_i32_47 = arith.constant 0 : i32
      %81 = tpu.memref_slice %arg9[%c1_i32_45, %c0_i32_46, %c0_i32_47] : memref<2x16x128xf32, #tpu.memory_space<vmem>> -> memref<1x16x128xf32, #tpu.memory_space<vmem>>
      %82 = tpu.memref_slice %arg10[%c1_i32_42] : memref<2x!tpu.dma_semaphore, #tpu.memory_space<semaphore_mem>> -> memref<1x!tpu.dma_semaphore, #tpu.memory_space<semaphore_mem>>
      %83 = tpu.memref_squeeze %82 : memref<1x!tpu.dma_semaphore, #tpu.memory_space<semaphore_mem>> -> memref<!tpu.dma_semaphore, #tpu.memory_space<semaphore_mem>>
      tpu.enqueue_dma source(%80 : memref<1x16x128xf32, #tpu.memory_space<any>>) target(%81 : memref<1x16x128xf32, #tpu.memory_space<vmem>>) target_semaphore(%83 : memref<!tpu.dma_semaphore, #tpu.memory_space<semaphore_mem>>)
    } else {
    }
    %c0_i32_3 = arith.constant 0 : i32
    %7 = arith.cmpi sgt, %arg1, %c0_i32_3 : i32
    %8 = arith.extui %7 : i1 to i32
    %c0_i32_4 = arith.constant 0 : i32
    %9 = arith.cmpi ne, %8, %c0_i32_4 : i32
    scf.if %9 {
      %c1_i32_41 = arith.constant 1 : i32
      %78 = arith.subi %0, %c1_i32_41 : i32
      %c0_i32_42 = arith.constant 0 : i32
      %c0_i32_43 = arith.constant 0 : i32
      %c0_i32_44 = arith.constant 0 : i32
      %79 = tpu.memref_slice %arg6[%arg0, %78, %c0_i32_43, %c0_i32_44] : memref<2x16x16x128xf32, #tpu.memory_space<any>> -> memref<1x1x16x128xf32, #tpu.memory_space<any>>
      %80 = tpu.memref_squeeze %79 : memref<1x1x16x128xf32, #tpu.memory_space<any>> -> memref<1x16x128xf32, #tpu.memory_space<any>>
      %c0_i32_45 = arith.constant 0 : i32
      %c0_i32_46 = arith.constant 0 : i32
      %c0_i32_47 = arith.constant 0 : i32
      %81 = tpu.memref_slice %arg9[%c0_i32_45, %c0_i32_46, %c0_i32_47] : memref<2x16x128xf32, #tpu.memory_space<vmem>> -> memref<1x16x128xf32, #tpu.memory_space<vmem>>
      %82 = tpu.memref_slice %arg10[%c0_i32_42] : memref<2x!tpu.dma_semaphore, #tpu.memory_space<semaphore_mem>> -> memref<1x!tpu.dma_semaphore, #tpu.memory_space<semaphore_mem>>
      %83 = tpu.memref_squeeze %82 : memref<1x!tpu.dma_semaphore, #tpu.memory_space<semaphore_mem>> -> memref<!tpu.dma_semaphore, #tpu.memory_space<semaphore_mem>>
      tpu.wait_dma2 semaphore(%83 : memref<!tpu.dma_semaphore, #tpu.memory_space<semaphore_mem>>) src(%80 : memref<1x16x128xf32, #tpu.memory_space<any>>) dst(%81 : memref<1x16x128xf32, #tpu.memory_space<vmem>>)
    } else {
    }
    %c0_i32_5 = arith.constant 0 : i32
    %10 = arith.cmpi slt, %arg1, %c0_i32_5 : i32
    %11 = arith.extui %10 : i1 to i32
    %c0_i32_6 = arith.constant 0 : i32
    %12 = arith.cmpi ne, %11, %c0_i32_6 : i32
    scf.if %12 {
      %c16_i32_41 = arith.constant 16 : i32
      %78 = arith.addi %0, %c16_i32_41 : i32
      %c1_i32_42 = arith.constant 1 : i32
      %c0_i32_43 = arith.constant 0 : i32
      %c0_i32_44 = arith.constant 0 : i32
      %79 = tpu.memref_slice %arg6[%arg0, %78, %c0_i32_43, %c0_i32_44] : memref<2x16x16x128xf32, #tpu.memory_space<any>> -> memref<1x1x16x128xf32, #tpu.memory_space<any>>
      %80 = tpu.memref_squeeze %79 : memref<1x1x16x128xf32, #tpu.memory_space<any>> -> memref<1x16x128xf32, #tpu.memory_space<any>>
      %c1_i32_45 = arith.constant 1 : i32
      %c0_i32_46 = arith.constant 0 : i32
      %c0_i32_47 = arith.constant 0 : i32
      %81 = tpu.memref_slice %arg9[%c1_i32_45, %c0_i32_46, %c0_i32_47] : memref<2x16x128xf32, #tpu.memory_space<vmem>> -> memref<1x16x128xf32, #tpu.memory_space<vmem>>
      %82 = tpu.memref_slice %arg10[%c1_i32_42] : memref<2x!tpu.dma_semaphore, #tpu.memory_space<semaphore_mem>> -> memref<1x!tpu.dma_semaphore, #tpu.memory_space<semaphore_mem>>
      %83 = tpu.memref_squeeze %82 : memref<1x!tpu.dma_semaphore, #tpu.memory_space<semaphore_mem>> -> memref<!tpu.dma_semaphore, #tpu.memory_space<semaphore_mem>>
      tpu.wait_dma2 semaphore(%83 : memref<!tpu.dma_semaphore, #tpu.memory_space<semaphore_mem>>) src(%80 : memref<1x16x128xf32, #tpu.memory_space<any>>) dst(%81 : memref<1x16x128xf32, #tpu.memory_space<vmem>>)
    } else {
    }
    %c0 = arith.constant 0 : index
    %c0_7 = arith.constant 0 : index
    %c0_8 = arith.constant 0 : index
    %13 = vector.load %arg9[%c0, %c0_7, %c0_8] : memref<2x16x128xf32, #tpu.memory_space<vmem>>, vector<1x16x128xf32>
    %c0_9 = arith.constant 0 : index
    %c0_10 = arith.constant 0 : index
    %c0_11 = arith.constant 0 : index
    %c0_12 = arith.constant 0 : index
    %14 = vector.load %arg5[%c0_9, %c0_10, %c0_11, %c0_12] : memref<1x16x16x128xf32, #tpu.memory_space<vmem>>, vector<1x16x16x128xf32>
    %15 = vector.shape_cast %14 : vector<1x16x16x128xf32> to vector<16x16x128xf32>
    %c1 = arith.constant 1 : index
    %c0_13 = arith.constant 0 : index
    %c0_14 = arith.constant 0 : index
    %16 = vector.load %arg9[%c1, %c0_13, %c0_14] : memref<2x16x128xf32, #tpu.memory_space<vmem>>, vector<1x16x128xf32>
    %17 = tpu.concatenate %13, %15, %16 in 0 : vector<1x16x128xf32>, vector<16x16x128xf32>, vector<1x16x128xf32> -> vector<18x16x128xf32>
    %18 = tpu.iota {dimensions = array<i32: 0>} : vector<18x1x1xi32>
    %c1_i32 = arith.constant 1 : i32
    %19 = arith.subi %0, %c1_i32 : i32
    %20 = vector.broadcast %19 : i32 to vector<18x1x1xi32>
    %21 = arith.addi %18, %20 : vector<18x1x1xi32>
    %c0_i32_15 = arith.constant 0 : i32
    %22 = vector.broadcast %c0_i32_15 : i32 to vector<18x1x1xi32>
    %23 = arith.cmpi sge, %21, %22 : vector<18x1x1xi32>
    %c16_i32_16 = arith.constant 16 : i32
    %24 = vector.broadcast %c16_i32_16 : i32 to vector<18x1x1xi32>
    %25 = arith.cmpi slt, %21, %24 : vector<18x1x1xi32>
    %26 = arith.andi %23, %25 : vector<18x1x1xi1>
    %cst = arith.constant 0.000000e+00 : f32
    %27 = vector.broadcast %cst : f32 to vector<18x16x128xf32>
    %28 = vector.shape_cast %26 : vector<18x1x1xi1> to vector<18x1x1xi1>
    %29 = vector.broadcast %28 : vector<18x1x1xi1> to vector<18x16x128xi1>
    %30 = arith.select %29, %17, %27 : vector<18x16x128xi1>, vector<18x16x128xf32>
    %cst_17 = arith.constant 0.000000e+00 : f32
    %31 = vector.broadcast %cst_17 : f32 to vector<18x1x128xf32>
    %32 = vector.extract_strided_slice %30 {offsets = [0, 0, 0], sizes = [18, 15, 128], strides = [1, 1, 1]} : vector<18x16x128xf32> to vector<18x15x128xf32>
    %33 = tpu.concatenate %31, %32 in 1 : vector<18x1x128xf32>, vector<18x15x128xf32> -> vector<18x16x128xf32>
    %34 = vector.extract_strided_slice %30 {offsets = [0, 1, 0], sizes = [18, 15, 128], strides = [1, 1, 1]} : vector<18x16x128xf32> to vector<18x15x128xf32>
    %35 = tpu.concatenate %34, %31 in 1 : vector<18x15x128xf32>, vector<18x1x128xf32> -> vector<18x16x128xf32>
    %cst_18 = arith.constant 0.000000e+00 : f32
    %36 = vector.broadcast %cst_18 : f32 to vector<256x128xf32>
    %37 = vector.extract_strided_slice %33 {offsets = [0, 0, 0], sizes = [16, 16, 128], strides = [1, 1, 1]} : vector<18x16x128xf32> to vector<16x16x128xf32>
    %38 = vector.extract_strided_slice %30 {offsets = [0, 0, 0], sizes = [16, 16, 128], strides = [1, 1, 1]} : vector<18x16x128xf32> to vector<16x16x128xf32>
    %39 = vector.extract_strided_slice %35 {offsets = [0, 0, 0], sizes = [16, 16, 128], strides = [1, 1, 1]} : vector<18x16x128xf32> to vector<16x16x128xf32>
    %40 = tpu.concatenate %37, %38, %39 in 2 : vector<16x16x128xf32>, vector<16x16x128xf32>, vector<16x16x128xf32> -> vector<16x16x384xf32>
    %41 = vector.shape_cast %40 : vector<16x16x384xf32> to vector<256x384xf32>
    %c0_19 = arith.constant 0 : index
    %c0_20 = arith.constant 0 : index
    %c0_21 = arith.constant 0 : index
    %42 = vector.load %arg4[%c0_19, %c0_20, %c0_21] : memref<3x384x128xf32, #tpu.memory_space<vmem>>, vector<1x384x128xf32>
    %43 = vector.shape_cast %42 : vector<1x384x128xf32> to vector<384x128xf32>
    %cst_22 = arith.constant dense<0.000000e+00> : vector<256x128xf32>
    %44 = tpu.matmul %41, %43, %cst_22 {dimension_numbers = #tpu.dot_dimension_numbers<[1], [0], [0], [1], [0, 0, 1, 1], [], []>} : vector<256x384xf32>, vector<384x128xf32>, vector<256x128xf32> -> vector<256x128xf32>
    %45 = arith.addf %36, %44 : vector<256x128xf32>
    %46 = vector.extract_strided_slice %33 {offsets = [1, 0, 0], sizes = [16, 16, 128], strides = [1, 1, 1]} : vector<18x16x128xf32> to vector<16x16x128xf32>
    %47 = vector.extract_strided_slice %30 {offsets = [1, 0, 0], sizes = [16, 16, 128], strides = [1, 1, 1]} : vector<18x16x128xf32> to vector<16x16x128xf32>
    %48 = vector.extract_strided_slice %35 {offsets = [1, 0, 0], sizes = [16, 16, 128], strides = [1, 1, 1]} : vector<18x16x128xf32> to vector<16x16x128xf32>
    %49 = tpu.concatenate %46, %47, %48 in 2 : vector<16x16x128xf32>, vector<16x16x128xf32>, vector<16x16x128xf32> -> vector<16x16x384xf32>
    %50 = vector.shape_cast %49 : vector<16x16x384xf32> to vector<256x384xf32>
    %c1_23 = arith.constant 1 : index
    %c0_24 = arith.constant 0 : index
    %c0_25 = arith.constant 0 : index
    %51 = vector.load %arg4[%c1_23, %c0_24, %c0_25] : memref<3x384x128xf32, #tpu.memory_space<vmem>>, vector<1x384x128xf32>
    %52 = vector.shape_cast %51 : vector<1x384x128xf32> to vector<384x128xf32>
    %cst_26 = arith.constant dense<0.000000e+00> : vector<256x128xf32>
    %53 = tpu.matmul %50, %52, %cst_26 {dimension_numbers = #tpu.dot_dimension_numbers<[1], [0], [0], [1], [0, 0, 1, 1], [], []>} : vector<256x384xf32>, vector<384x128xf32>, vector<256x128xf32> -> vector<256x128xf32>
    %54 = arith.addf %45, %53 : vector<256x128xf32>
    %55 = vector.extract_strided_slice %33 {offsets = [2, 0, 0], sizes = [16, 16, 128], strides = [1, 1, 1]} : vector<18x16x128xf32> to vector<16x16x128xf32>
    %56 = vector.extract_strided_slice %30 {offsets = [2, 0, 0], sizes = [16, 16, 128], strides = [1, 1, 1]} : vector<18x16x128xf32> to vector<16x16x128xf32>
    %57 = vector.extract_strided_slice %35 {offsets = [2, 0, 0], sizes = [16, 16, 128], strides = [1, 1, 1]} : vector<18x16x128xf32> to vector<16x16x128xf32>
    %58 = tpu.concatenate %55, %56, %57 in 2 : vector<16x16x128xf32>, vector<16x16x128xf32>, vector<16x16x128xf32> -> vector<16x16x384xf32>
    %59 = vector.shape_cast %58 : vector<16x16x384xf32> to vector<256x384xf32>
    %c2 = arith.constant 2 : index
    %c0_27 = arith.constant 0 : index
    %c0_28 = arith.constant 0 : index
    %60 = vector.load %arg4[%c2, %c0_27, %c0_28] : memref<3x384x128xf32, #tpu.memory_space<vmem>>, vector<1x384x128xf32>
    %61 = vector.shape_cast %60 : vector<1x384x128xf32> to vector<384x128xf32>
    %cst_29 = arith.constant dense<0.000000e+00> : vector<256x128xf32>
    %62 = tpu.matmul %59, %61, %cst_29 {dimension_numbers = #tpu.dot_dimension_numbers<[1], [0], [0], [1], [0, 0, 1, 1], [], []>} : vector<256x384xf32>, vector<384x128xf32>, vector<256x128xf32> -> vector<256x128xf32>
    %63 = arith.addf %54, %62 : vector<256x128xf32>
    %64 = vector.shape_cast %63 : vector<256x128xf32> to vector<16x16x128xf32>
    %c0_30 = arith.constant 0 : index
    %c0_31 = arith.constant 0 : index
    %c0_32 = arith.constant 0 : index
    %c0_33 = arith.constant 0 : index
    %65 = vector.load %arg7[%c0_30, %c0_31, %c0_32, %c0_33] : memref<1x16x16x128xf32, #tpu.memory_space<vmem>>, vector<1x16x16x128xf32>
    %66 = vector.shape_cast %65 : vector<1x16x16x128xf32> to vector<16x16x128xf32>
    %67 = vector.shape_cast %64 : vector<16x16x128xf32> to vector<1x16x16x128xf32>
    tpu.vector_store %arg7[%c0_30, %c0_31, %c0_32, %c0_33], %67 {strides = array<i32>} : memref<1x16x16x128xf32, #tpu.memory_space<vmem>>, vector<1x16x16x128xf32>,
    %cst_34 = arith.constant dense<0.000000e+00> : vector<128xf32>
    %68 = vector.multi_reduction <add>, %63, %cst_34 [0] : vector<256x128xf32> to vector<128xf32>
    %69 = vector.shape_cast %68 : vector<128xf32> to vector<1x128xf32>
    %70 = arith.mulf %63, %63 : vector<256x128xf32>
    %cst_35 = arith.constant dense<0.000000e+00> : vector<128xf32>
    %71 = vector.multi_reduction <add>, %70, %cst_35 [0] : vector<256x128xf32> to vector<128xf32>
    %72 = vector.shape_cast %71 : vector<128xf32> to vector<1x128xf32>
    %cst_36 = arith.constant 0.000000e+00 : f32
    %73 = vector.broadcast %cst_36 : f32 to vector<6x128xf32>
    %74 = tpu.concatenate %69, %72, %73 in 0 : vector<1x128xf32>, vector<1x128xf32>, vector<6x128xf32> -> vector<8x128xf32>
    %c0_37 = arith.constant 0 : index
    %c0_38 = arith.constant 0 : index
    %c0_39 = arith.constant 0 : index
    %c0_40 = arith.constant 0 : index
    %75 = vector.load %arg8[%c0_37, %c0_38, %c0_39, %c0_40] : memref<1x1x8x128xf32, #tpu.memory_space<vmem>>, vector<1x1x8x128xf32>
    %76 = vector.shape_cast %75 : vector<1x1x8x128xf32> to vector<8x128xf32>
    %77 = vector.shape_cast %74 : vector<8x128xf32> to vector<1x1x8x128xf32>
    tpu.vector_store %arg8[%c0_37, %c0_38, %c0_39, %c0_40], %77 {strides = array<i32>} : memref<1x1x8x128xf32, #tpu.memory_space<vmem>>, vector<1x1x8x128xf32>,
    return
  }
  func.func @transform_0(%arg0: i32, %arg1: i32) -> (i32, i32, i32) {
    %c0_i32 = arith.constant 0 : i32
    %c0_i32_0 = arith.constant 0 : i32
    %c0_i32_1 = arith.constant 0 : i32
    %c0_i32_2 = arith.constant 0 : i32
    return %c0_i32, %c0_i32_0, %c0_i32_1 : i32, i32, i32
  }
  func.func @transform_1(%arg0: i32, %arg1: i32) -> (i32, i32, i32) {
    %c0_i32 = arith.constant 0 : i32
    %c0_i32_0 = arith.constant 0 : i32
    %c0_i32_1 = arith.constant 0 : i32
    %c0_i32_2 = arith.constant 0 : i32
    return %c0_i32, %c0_i32_0, %c0_i32_1 : i32, i32, i32
  }
  func.func @transform_2(%arg0: i32, %arg1: i32) -> (i32, i32, i32) {
    %c0_i32 = arith.constant 0 : i32
    %c0_i32_0 = arith.constant 0 : i32
    %c0_i32_1 = arith.constant 0 : i32
    %c0_i32_2 = arith.constant 0 : i32
    return %c0_i32, %c0_i32_0, %c0_i32_1 : i32, i32, i32
  }
  func.func @transform_3(%arg0: i32, %arg1: i32) -> (i32, i32, i32, i32) {
    %c0_i32 = arith.constant 0 : i32
    %c0_i32_0 = arith.constant 0 : i32
    %c0_i32_1 = arith.constant 0 : i32
    return %arg0, %arg1, %c0_i32, %c0_i32_0 : i32, i32, i32, i32
  }
  func.func @transform_5(%arg0: i32, %arg1: i32) -> (i32, i32, i32, i32) {
    %c0_i32 = arith.constant 0 : i32
    %c0_i32_0 = arith.constant 0 : i32
    %c0_i32_1 = arith.constant 0 : i32
    return %arg0, %arg1, %c0_i32, %c0_i32_0 : i32, i32, i32, i32
  }
  func.func @transform_6(%arg0: i32, %arg1: i32) -> (i32, i32, i32, i32) {
    %c0_i32 = arith.constant 0 : i32
    %c0_i32_0 = arith.constant 0 : i32
    %c0_i32_1 = arith.constant 0 : i32
    return %arg0, %arg1, %c0_i32, %c0_i32_0 : i32, i32, i32, i32
  }
}

module attributes {stable_mosaic.version = 11 : i64} {
  func.func @_conv_bn_stats_kernel(%arg0: i32, %arg1: i32, %arg2: memref<1x1x128xf32, #tpu.memory_space<vmem>>, %arg3: memref<1x1x128xf32, #tpu.memory_space<vmem>>, %arg4: memref<3x384x128xf32, #tpu.memory_space<vmem>>, %arg5: memref<1x16x16x128xf32, #tpu.memory_space<vmem>>, %arg6: memref<2x16x16x128xf32, #tpu.memory_space<any>>, %arg7: memref<1x16x16x128xf32, #tpu.memory_space<vmem>>, %arg8: memref<1x1x8x128xf32, #tpu.memory_space<vmem>>, %arg9: memref<2x16x128xf32, #tpu.memory_space<vmem>>, %arg10: memref<2x!tpu.dma_semaphore, #tpu.memory_space<semaphore_mem>>) attributes {dimension_semantics = [#tpu.dimension_semantics<parallel>, #tpu.dimension_semantics<parallel>], iteration_bounds = array<i64: 2, 1>, scalar_prefetch = 0 : i64, scratch_operands = 2 : i64, tpu.core_type = #tpu.core_type<tc>, window_params = [{pipeline_mode = #tpu.pipeline_mode<synchronous>, transform_indices = @transform_0, window_bounds = array<i64: 1, 1, 128>}, {pipeline_mode = #tpu.pipeline_mode<synchronous>, transform_indices = @transform_1, window_bounds = array<i64: 1, 1, 128>}, {pipeline_mode = #tpu.pipeline_mode<synchronous>, transform_indices = @transform_2, window_bounds = array<i64: 3, 384, 128>}, {transform_indices = @transform_3, window_bounds = array<i64: 1, 16, 16, 128>}, {}, {transform_indices = @transform_5, window_bounds = array<i64: 1, 16, 16, 128>}, {transform_indices = @transform_6, window_bounds = array<i64: 1, 1, 8, 128>}]} {
    %c16_i32 = arith.constant 16 : i32
    %0 = arith.muli %arg1, %c16_i32 : i32
    %c0_i32 = arith.constant 0 : i32
    %1 = arith.cmpi sgt, %arg1, %c0_i32 : i32
    %2 = arith.extui %1 : i1 to i32
    %c0_i32_0 = arith.constant 0 : i32
    %3 = arith.cmpi ne, %2, %c0_i32_0 : i32
    scf.if %3 {
      %c1_i32_48 = arith.constant 1 : i32
      %86 = arith.subi %0, %c1_i32_48 : i32
      %c0_i32_49 = arith.constant 0 : i32
      %c0_i32_50 = arith.constant 0 : i32
      %c0_i32_51 = arith.constant 0 : i32
      %87 = tpu.memref_slice %arg6[%arg0, %86, %c0_i32_50, %c0_i32_51] : memref<2x16x16x128xf32, #tpu.memory_space<any>> -> memref<1x1x16x128xf32, #tpu.memory_space<any>>
      %88 = tpu.memref_squeeze %87 : memref<1x1x16x128xf32, #tpu.memory_space<any>> -> memref<1x16x128xf32, #tpu.memory_space<any>>
      %c0_i32_52 = arith.constant 0 : i32
      %c0_i32_53 = arith.constant 0 : i32
      %c0_i32_54 = arith.constant 0 : i32
      %89 = tpu.memref_slice %arg9[%c0_i32_52, %c0_i32_53, %c0_i32_54] : memref<2x16x128xf32, #tpu.memory_space<vmem>> -> memref<1x16x128xf32, #tpu.memory_space<vmem>>
      %90 = tpu.memref_slice %arg10[%c0_i32_49] : memref<2x!tpu.dma_semaphore, #tpu.memory_space<semaphore_mem>> -> memref<1x!tpu.dma_semaphore, #tpu.memory_space<semaphore_mem>>
      %91 = tpu.memref_squeeze %90 : memref<1x!tpu.dma_semaphore, #tpu.memory_space<semaphore_mem>> -> memref<!tpu.dma_semaphore, #tpu.memory_space<semaphore_mem>>
      tpu.enqueue_dma source(%88 : memref<1x16x128xf32, #tpu.memory_space<any>>) target(%89 : memref<1x16x128xf32, #tpu.memory_space<vmem>>) target_semaphore(%91 : memref<!tpu.dma_semaphore, #tpu.memory_space<semaphore_mem>>)
    } else {
    }
    %c0_i32_1 = arith.constant 0 : i32
    %4 = arith.cmpi slt, %arg1, %c0_i32_1 : i32
    %5 = arith.extui %4 : i1 to i32
    %c0_i32_2 = arith.constant 0 : i32
    %6 = arith.cmpi ne, %5, %c0_i32_2 : i32
    scf.if %6 {
      %c16_i32_48 = arith.constant 16 : i32
      %86 = arith.addi %0, %c16_i32_48 : i32
      %c1_i32_49 = arith.constant 1 : i32
      %c0_i32_50 = arith.constant 0 : i32
      %c0_i32_51 = arith.constant 0 : i32
      %87 = tpu.memref_slice %arg6[%arg0, %86, %c0_i32_50, %c0_i32_51] : memref<2x16x16x128xf32, #tpu.memory_space<any>> -> memref<1x1x16x128xf32, #tpu.memory_space<any>>
      %88 = tpu.memref_squeeze %87 : memref<1x1x16x128xf32, #tpu.memory_space<any>> -> memref<1x16x128xf32, #tpu.memory_space<any>>
      %c1_i32_52 = arith.constant 1 : i32
      %c0_i32_53 = arith.constant 0 : i32
      %c0_i32_54 = arith.constant 0 : i32
      %89 = tpu.memref_slice %arg9[%c1_i32_52, %c0_i32_53, %c0_i32_54] : memref<2x16x128xf32, #tpu.memory_space<vmem>> -> memref<1x16x128xf32, #tpu.memory_space<vmem>>
      %90 = tpu.memref_slice %arg10[%c1_i32_49] : memref<2x!tpu.dma_semaphore, #tpu.memory_space<semaphore_mem>> -> memref<1x!tpu.dma_semaphore, #tpu.memory_space<semaphore_mem>>
      %91 = tpu.memref_squeeze %90 : memref<1x!tpu.dma_semaphore, #tpu.memory_space<semaphore_mem>> -> memref<!tpu.dma_semaphore, #tpu.memory_space<semaphore_mem>>
      tpu.enqueue_dma source(%88 : memref<1x16x128xf32, #tpu.memory_space<any>>) target(%89 : memref<1x16x128xf32, #tpu.memory_space<vmem>>) target_semaphore(%91 : memref<!tpu.dma_semaphore, #tpu.memory_space<semaphore_mem>>)
    } else {
    }
    %c0_i32_3 = arith.constant 0 : i32
    %7 = arith.cmpi sgt, %arg1, %c0_i32_3 : i32
    %8 = arith.extui %7 : i1 to i32
    %c0_i32_4 = arith.constant 0 : i32
    %9 = arith.cmpi ne, %8, %c0_i32_4 : i32
    scf.if %9 {
      %c1_i32_48 = arith.constant 1 : i32
      %86 = arith.subi %0, %c1_i32_48 : i32
      %c0_i32_49 = arith.constant 0 : i32
      %c0_i32_50 = arith.constant 0 : i32
      %c0_i32_51 = arith.constant 0 : i32
      %87 = tpu.memref_slice %arg6[%arg0, %86, %c0_i32_50, %c0_i32_51] : memref<2x16x16x128xf32, #tpu.memory_space<any>> -> memref<1x1x16x128xf32, #tpu.memory_space<any>>
      %88 = tpu.memref_squeeze %87 : memref<1x1x16x128xf32, #tpu.memory_space<any>> -> memref<1x16x128xf32, #tpu.memory_space<any>>
      %c0_i32_52 = arith.constant 0 : i32
      %c0_i32_53 = arith.constant 0 : i32
      %c0_i32_54 = arith.constant 0 : i32
      %89 = tpu.memref_slice %arg9[%c0_i32_52, %c0_i32_53, %c0_i32_54] : memref<2x16x128xf32, #tpu.memory_space<vmem>> -> memref<1x16x128xf32, #tpu.memory_space<vmem>>
      %90 = tpu.memref_slice %arg10[%c0_i32_49] : memref<2x!tpu.dma_semaphore, #tpu.memory_space<semaphore_mem>> -> memref<1x!tpu.dma_semaphore, #tpu.memory_space<semaphore_mem>>
      %91 = tpu.memref_squeeze %90 : memref<1x!tpu.dma_semaphore, #tpu.memory_space<semaphore_mem>> -> memref<!tpu.dma_semaphore, #tpu.memory_space<semaphore_mem>>
      tpu.wait_dma2 semaphore(%91 : memref<!tpu.dma_semaphore, #tpu.memory_space<semaphore_mem>>) src(%88 : memref<1x16x128xf32, #tpu.memory_space<any>>) dst(%89 : memref<1x16x128xf32, #tpu.memory_space<vmem>>)
    } else {
    }
    %c0_i32_5 = arith.constant 0 : i32
    %10 = arith.cmpi slt, %arg1, %c0_i32_5 : i32
    %11 = arith.extui %10 : i1 to i32
    %c0_i32_6 = arith.constant 0 : i32
    %12 = arith.cmpi ne, %11, %c0_i32_6 : i32
    scf.if %12 {
      %c16_i32_48 = arith.constant 16 : i32
      %86 = arith.addi %0, %c16_i32_48 : i32
      %c1_i32_49 = arith.constant 1 : i32
      %c0_i32_50 = arith.constant 0 : i32
      %c0_i32_51 = arith.constant 0 : i32
      %87 = tpu.memref_slice %arg6[%arg0, %86, %c0_i32_50, %c0_i32_51] : memref<2x16x16x128xf32, #tpu.memory_space<any>> -> memref<1x1x16x128xf32, #tpu.memory_space<any>>
      %88 = tpu.memref_squeeze %87 : memref<1x1x16x128xf32, #tpu.memory_space<any>> -> memref<1x16x128xf32, #tpu.memory_space<any>>
      %c1_i32_52 = arith.constant 1 : i32
      %c0_i32_53 = arith.constant 0 : i32
      %c0_i32_54 = arith.constant 0 : i32
      %89 = tpu.memref_slice %arg9[%c1_i32_52, %c0_i32_53, %c0_i32_54] : memref<2x16x128xf32, #tpu.memory_space<vmem>> -> memref<1x16x128xf32, #tpu.memory_space<vmem>>
      %90 = tpu.memref_slice %arg10[%c1_i32_49] : memref<2x!tpu.dma_semaphore, #tpu.memory_space<semaphore_mem>> -> memref<1x!tpu.dma_semaphore, #tpu.memory_space<semaphore_mem>>
      %91 = tpu.memref_squeeze %90 : memref<1x!tpu.dma_semaphore, #tpu.memory_space<semaphore_mem>> -> memref<!tpu.dma_semaphore, #tpu.memory_space<semaphore_mem>>
      tpu.wait_dma2 semaphore(%91 : memref<!tpu.dma_semaphore, #tpu.memory_space<semaphore_mem>>) src(%88 : memref<1x16x128xf32, #tpu.memory_space<any>>) dst(%89 : memref<1x16x128xf32, #tpu.memory_space<vmem>>)
    } else {
    }
    %c0 = arith.constant 0 : index
    %c0_7 = arith.constant 0 : index
    %c0_8 = arith.constant 0 : index
    %13 = vector.load %arg9[%c0, %c0_7, %c0_8] : memref<2x16x128xf32, #tpu.memory_space<vmem>>, vector<1x16x128xf32>
    %c0_9 = arith.constant 0 : index
    %c0_10 = arith.constant 0 : index
    %c0_11 = arith.constant 0 : index
    %c0_12 = arith.constant 0 : index
    %14 = vector.load %arg5[%c0_9, %c0_10, %c0_11, %c0_12] : memref<1x16x16x128xf32, #tpu.memory_space<vmem>>, vector<1x16x16x128xf32>
    %15 = vector.shape_cast %14 : vector<1x16x16x128xf32> to vector<16x16x128xf32>
    %c1 = arith.constant 1 : index
    %c0_13 = arith.constant 0 : index
    %c0_14 = arith.constant 0 : index
    %16 = vector.load %arg9[%c1, %c0_13, %c0_14] : memref<2x16x128xf32, #tpu.memory_space<vmem>>, vector<1x16x128xf32>
    %17 = tpu.concatenate %13, %15, %16 in 0 : vector<1x16x128xf32>, vector<16x16x128xf32>, vector<1x16x128xf32> -> vector<18x16x128xf32>
    %c0_15 = arith.constant 0 : index
    %c0_16 = arith.constant 0 : index
    %c0_17 = arith.constant 0 : index
    %18 = vector.load %arg2[%c0_15, %c0_16, %c0_17] : memref<1x1x128xf32, #tpu.memory_space<vmem>>, vector<1x1x128xf32>
    %19 = vector.broadcast %18 : vector<1x1x128xf32> to vector<18x16x128xf32>
    %20 = arith.mulf %17, %19 : vector<18x16x128xf32>
    %c0_18 = arith.constant 0 : index
    %c0_19 = arith.constant 0 : index
    %c0_20 = arith.constant 0 : index
    %21 = vector.load %arg3[%c0_18, %c0_19, %c0_20] : memref<1x1x128xf32, #tpu.memory_space<vmem>>, vector<1x1x128xf32>
    %22 = vector.broadcast %21 : vector<1x1x128xf32> to vector<18x16x128xf32>
    %23 = arith.addf %20, %22 : vector<18x16x128xf32>
    %cst = arith.constant 0.000000e+00 : f32
    %24 = vector.broadcast %cst : f32 to vector<18x16x128xf32>
    %25 = arith.maximumf %23, %24 : vector<18x16x128xf32>
    %26 = tpu.iota {dimensions = array<i32: 0>} : vector<18x1x1xi32>
    %c1_i32 = arith.constant 1 : i32
    %27 = arith.subi %0, %c1_i32 : i32
    %28 = vector.broadcast %27 : i32 to vector<18x1x1xi32>
    %29 = arith.addi %26, %28 : vector<18x1x1xi32>
    %c0_i32_21 = arith.constant 0 : i32
    %30 = vector.broadcast %c0_i32_21 : i32 to vector<18x1x1xi32>
    %31 = arith.cmpi sge, %29, %30 : vector<18x1x1xi32>
    %c16_i32_22 = arith.constant 16 : i32
    %32 = vector.broadcast %c16_i32_22 : i32 to vector<18x1x1xi32>
    %33 = arith.cmpi slt, %29, %32 : vector<18x1x1xi32>
    %34 = arith.andi %31, %33 : vector<18x1x1xi1>
    %cst_23 = arith.constant 0.000000e+00 : f32
    %35 = vector.broadcast %cst_23 : f32 to vector<18x16x128xf32>
    %36 = vector.shape_cast %34 : vector<18x1x1xi1> to vector<18x1x1xi1>
    %37 = vector.broadcast %36 : vector<18x1x1xi1> to vector<18x16x128xi1>
    %38 = arith.select %37, %25, %35 : vector<18x16x128xi1>, vector<18x16x128xf32>
    %cst_24 = arith.constant 0.000000e+00 : f32
    %39 = vector.broadcast %cst_24 : f32 to vector<18x1x128xf32>
    %40 = vector.extract_strided_slice %38 {offsets = [0, 0, 0], sizes = [18, 15, 128], strides = [1, 1, 1]} : vector<18x16x128xf32> to vector<18x15x128xf32>
    %41 = tpu.concatenate %39, %40 in 1 : vector<18x1x128xf32>, vector<18x15x128xf32> -> vector<18x16x128xf32>
    %42 = vector.extract_strided_slice %38 {offsets = [0, 1, 0], sizes = [18, 15, 128], strides = [1, 1, 1]} : vector<18x16x128xf32> to vector<18x15x128xf32>
    %43 = tpu.concatenate %42, %39 in 1 : vector<18x15x128xf32>, vector<18x1x128xf32> -> vector<18x16x128xf32>
    %cst_25 = arith.constant 0.000000e+00 : f32
    %44 = vector.broadcast %cst_25 : f32 to vector<256x128xf32>
    %45 = vector.extract_strided_slice %41 {offsets = [0, 0, 0], sizes = [16, 16, 128], strides = [1, 1, 1]} : vector<18x16x128xf32> to vector<16x16x128xf32>
    %46 = vector.extract_strided_slice %38 {offsets = [0, 0, 0], sizes = [16, 16, 128], strides = [1, 1, 1]} : vector<18x16x128xf32> to vector<16x16x128xf32>
    %47 = vector.extract_strided_slice %43 {offsets = [0, 0, 0], sizes = [16, 16, 128], strides = [1, 1, 1]} : vector<18x16x128xf32> to vector<16x16x128xf32>
    %48 = tpu.concatenate %45, %46, %47 in 2 : vector<16x16x128xf32>, vector<16x16x128xf32>, vector<16x16x128xf32> -> vector<16x16x384xf32>
    %49 = vector.shape_cast %48 : vector<16x16x384xf32> to vector<256x384xf32>
    %c0_26 = arith.constant 0 : index
    %c0_27 = arith.constant 0 : index
    %c0_28 = arith.constant 0 : index
    %50 = vector.load %arg4[%c0_26, %c0_27, %c0_28] : memref<3x384x128xf32, #tpu.memory_space<vmem>>, vector<1x384x128xf32>
    %51 = vector.shape_cast %50 : vector<1x384x128xf32> to vector<384x128xf32>
    %cst_29 = arith.constant dense<0.000000e+00> : vector<256x128xf32>
    %52 = tpu.matmul %49, %51, %cst_29 {dimension_numbers = #tpu.dot_dimension_numbers<[1], [0], [0], [1], [0, 0, 1, 1], [], []>} : vector<256x384xf32>, vector<384x128xf32>, vector<256x128xf32> -> vector<256x128xf32>
    %53 = arith.addf %44, %52 : vector<256x128xf32>
    %54 = vector.extract_strided_slice %41 {offsets = [1, 0, 0], sizes = [16, 16, 128], strides = [1, 1, 1]} : vector<18x16x128xf32> to vector<16x16x128xf32>
    %55 = vector.extract_strided_slice %38 {offsets = [1, 0, 0], sizes = [16, 16, 128], strides = [1, 1, 1]} : vector<18x16x128xf32> to vector<16x16x128xf32>
    %56 = vector.extract_strided_slice %43 {offsets = [1, 0, 0], sizes = [16, 16, 128], strides = [1, 1, 1]} : vector<18x16x128xf32> to vector<16x16x128xf32>
    %57 = tpu.concatenate %54, %55, %56 in 2 : vector<16x16x128xf32>, vector<16x16x128xf32>, vector<16x16x128xf32> -> vector<16x16x384xf32>
    %58 = vector.shape_cast %57 : vector<16x16x384xf32> to vector<256x384xf32>
    %c1_30 = arith.constant 1 : index
    %c0_31 = arith.constant 0 : index
    %c0_32 = arith.constant 0 : index
    %59 = vector.load %arg4[%c1_30, %c0_31, %c0_32] : memref<3x384x128xf32, #tpu.memory_space<vmem>>, vector<1x384x128xf32>
    %60 = vector.shape_cast %59 : vector<1x384x128xf32> to vector<384x128xf32>
    %cst_33 = arith.constant dense<0.000000e+00> : vector<256x128xf32>
    %61 = tpu.matmul %58, %60, %cst_33 {dimension_numbers = #tpu.dot_dimension_numbers<[1], [0], [0], [1], [0, 0, 1, 1], [], []>} : vector<256x384xf32>, vector<384x128xf32>, vector<256x128xf32> -> vector<256x128xf32>
    %62 = arith.addf %53, %61 : vector<256x128xf32>
    %63 = vector.extract_strided_slice %41 {offsets = [2, 0, 0], sizes = [16, 16, 128], strides = [1, 1, 1]} : vector<18x16x128xf32> to vector<16x16x128xf32>
    %64 = vector.extract_strided_slice %38 {offsets = [2, 0, 0], sizes = [16, 16, 128], strides = [1, 1, 1]} : vector<18x16x128xf32> to vector<16x16x128xf32>
    %65 = vector.extract_strided_slice %43 {offsets = [2, 0, 0], sizes = [16, 16, 128], strides = [1, 1, 1]} : vector<18x16x128xf32> to vector<16x16x128xf32>
    %66 = tpu.concatenate %63, %64, %65 in 2 : vector<16x16x128xf32>, vector<16x16x128xf32>, vector<16x16x128xf32> -> vector<16x16x384xf32>
    %67 = vector.shape_cast %66 : vector<16x16x384xf32> to vector<256x384xf32>
    %c2 = arith.constant 2 : index
    %c0_34 = arith.constant 0 : index
    %c0_35 = arith.constant 0 : index
    %68 = vector.load %arg4[%c2, %c0_34, %c0_35] : memref<3x384x128xf32, #tpu.memory_space<vmem>>, vector<1x384x128xf32>
    %69 = vector.shape_cast %68 : vector<1x384x128xf32> to vector<384x128xf32>
    %cst_36 = arith.constant dense<0.000000e+00> : vector<256x128xf32>
    %70 = tpu.matmul %67, %69, %cst_36 {dimension_numbers = #tpu.dot_dimension_numbers<[1], [0], [0], [1], [0, 0, 1, 1], [], []>} : vector<256x384xf32>, vector<384x128xf32>, vector<256x128xf32> -> vector<256x128xf32>
    %71 = arith.addf %62, %70 : vector<256x128xf32>
    %72 = vector.shape_cast %71 : vector<256x128xf32> to vector<16x16x128xf32>
    %c0_37 = arith.constant 0 : index
    %c0_38 = arith.constant 0 : index
    %c0_39 = arith.constant 0 : index
    %c0_40 = arith.constant 0 : index
    %73 = vector.load %arg7[%c0_37, %c0_38, %c0_39, %c0_40] : memref<1x16x16x128xf32, #tpu.memory_space<vmem>>, vector<1x16x16x128xf32>
    %74 = vector.shape_cast %73 : vector<1x16x16x128xf32> to vector<16x16x128xf32>
    %75 = vector.shape_cast %72 : vector<16x16x128xf32> to vector<1x16x16x128xf32>
    tpu.vector_store %arg7[%c0_37, %c0_38, %c0_39, %c0_40], %75 {strides = array<i32>} : memref<1x16x16x128xf32, #tpu.memory_space<vmem>>, vector<1x16x16x128xf32>,
    %cst_41 = arith.constant dense<0.000000e+00> : vector<128xf32>
    %76 = vector.multi_reduction <add>, %71, %cst_41 [0] : vector<256x128xf32> to vector<128xf32>
    %77 = vector.shape_cast %76 : vector<128xf32> to vector<1x128xf32>
    %78 = arith.mulf %71, %71 : vector<256x128xf32>
    %cst_42 = arith.constant dense<0.000000e+00> : vector<128xf32>
    %79 = vector.multi_reduction <add>, %78, %cst_42 [0] : vector<256x128xf32> to vector<128xf32>
    %80 = vector.shape_cast %79 : vector<128xf32> to vector<1x128xf32>
    %cst_43 = arith.constant 0.000000e+00 : f32
    %81 = vector.broadcast %cst_43 : f32 to vector<6x128xf32>
    %82 = tpu.concatenate %77, %80, %81 in 0 : vector<1x128xf32>, vector<1x128xf32>, vector<6x128xf32> -> vector<8x128xf32>
    %c0_44 = arith.constant 0 : index
    %c0_45 = arith.constant 0 : index
    %c0_46 = arith.constant 0 : index
    %c0_47 = arith.constant 0 : index
    %83 = vector.load %arg8[%c0_44, %c0_45, %c0_46, %c0_47] : memref<1x1x8x128xf32, #tpu.memory_space<vmem>>, vector<1x1x8x128xf32>
    %84 = vector.shape_cast %83 : vector<1x1x8x128xf32> to vector<8x128xf32>
    %85 = vector.shape_cast %82 : vector<8x128xf32> to vector<1x1x8x128xf32>
    tpu.vector_store %arg8[%c0_44, %c0_45, %c0_46, %c0_47], %85 {strides = array<i32>} : memref<1x1x8x128xf32, #tpu.memory_space<vmem>>, vector<1x1x8x128xf32>,
    return
  }
  func.func @transform_0(%arg0: i32, %arg1: i32) -> (i32, i32, i32) {
    %c0_i32 = arith.constant 0 : i32
    %c0_i32_0 = arith.constant 0 : i32
    %c0_i32_1 = arith.constant 0 : i32
    %c0_i32_2 = arith.constant 0 : i32
    return %c0_i32, %c0_i32_0, %c0_i32_1 : i32, i32, i32
  }
  func.func @transform_1(%arg0: i32, %arg1: i32) -> (i32, i32, i32) {
    %c0_i32 = arith.constant 0 : i32
    %c0_i32_0 = arith.constant 0 : i32
    %c0_i32_1 = arith.constant 0 : i32
    %c0_i32_2 = arith.constant 0 : i32
    return %c0_i32, %c0_i32_0, %c0_i32_1 : i32, i32, i32
  }
  func.func @transform_2(%arg0: i32, %arg1: i32) -> (i32, i32, i32) {
    %c0_i32 = arith.constant 0 : i32
    %c0_i32_0 = arith.constant 0 : i32
    %c0_i32_1 = arith.constant 0 : i32
    %c0_i32_2 = arith.constant 0 : i32
    return %c0_i32, %c0_i32_0, %c0_i32_1 : i32, i32, i32
  }
  func.func @transform_3(%arg0: i32, %arg1: i32) -> (i32, i32, i32, i32) {
    %c0_i32 = arith.constant 0 : i32
    %c0_i32_0 = arith.constant 0 : i32
    %c0_i32_1 = arith.constant 0 : i32
    return %arg0, %arg1, %c0_i32, %c0_i32_0 : i32, i32, i32, i32
  }
  func.func @transform_5(%arg0: i32, %arg1: i32) -> (i32, i32, i32, i32) {
    %c0_i32 = arith.constant 0 : i32
    %c0_i32_0 = arith.constant 0 : i32
    %c0_i32_1 = arith.constant 0 : i32
    return %arg0, %arg1, %c0_i32, %c0_i32_0 : i32, i32, i32, i32
  }
  func.func @transform_6(%arg0: i32, %arg1: i32) -> (i32, i32, i32, i32) {
    %c0_i32 = arith.constant 0 : i32
    %c0_i32_0 = arith.constant 0 : i32
    %c0_i32_1 = arith.constant 0 : i32
    return %arg0, %arg1, %c0_i32, %c0_i32_0 : i32, i32, i32, i32
  }
}

module attributes {stable_mosaic.version = 11 : i64} {
  func.func @_bn_relu_pool_kernel(%arg0: i32, %arg1: i32, %arg2: memref<1x16x8x256xf32, #tpu.memory_space<vmem>>, %arg3: memref<1x1x256xf32, #tpu.memory_space<vmem>>, %arg4: memref<1x1x256xf32, #tpu.memory_space<vmem>>, %arg5: memref<1x16x8x256xf32, #tpu.memory_space<vmem>>, %arg6: memref<1x8x8x128xf32, #tpu.memory_space<vmem>>) attributes {dimension_semantics = [#tpu.dimension_semantics<parallel>, #tpu.dimension_semantics<parallel>], iteration_bounds = array<i64: 2, 1>, scalar_prefetch = 0 : i64, scratch_operands = 0 : i64, tpu.core_type = #tpu.core_type<tc>, window_params = [{transform_indices = @transform_0, window_bounds = array<i64: 1, 16, 8, 256>}, {pipeline_mode = #tpu.pipeline_mode<synchronous>, transform_indices = @transform_1, window_bounds = array<i64: 1, 1, 256>}, {pipeline_mode = #tpu.pipeline_mode<synchronous>, transform_indices = @transform_2, window_bounds = array<i64: 1, 1, 256>}, {transform_indices = @transform_3, window_bounds = array<i64: 1, 16, 8, 256>}, {transform_indices = @transform_4, window_bounds = array<i64: 1, 8, 8, 128>}]} {
    %c0 = arith.constant 0 : index
    %c0_0 = arith.constant 0 : index
    %c0_1 = arith.constant 0 : index
    %c0_2 = arith.constant 0 : index
    %0 = vector.load %arg2[%c0, %c0_0, %c0_1, %c0_2] : memref<1x16x8x256xf32, #tpu.memory_space<vmem>>, vector<1x16x8x256xf32>
    %1 = vector.shape_cast %0 : vector<1x16x8x256xf32> to vector<16x8x256xf32>
    %c0_3 = arith.constant 0 : index
    %c0_4 = arith.constant 0 : index
    %c0_5 = arith.constant 0 : index
    %2 = vector.load %arg3[%c0_3, %c0_4, %c0_5] : memref<1x1x256xf32, #tpu.memory_space<vmem>>, vector<1x1x256xf32>
    %3 = vector.broadcast %2 : vector<1x1x256xf32> to vector<16x8x256xf32>
    %4 = arith.mulf %1, %3 : vector<16x8x256xf32>
    %c0_6 = arith.constant 0 : index
    %c0_7 = arith.constant 0 : index
    %c0_8 = arith.constant 0 : index
    %5 = vector.load %arg4[%c0_6, %c0_7, %c0_8] : memref<1x1x256xf32, #tpu.memory_space<vmem>>, vector<1x1x256xf32>
    %6 = vector.broadcast %5 : vector<1x1x256xf32> to vector<16x8x256xf32>
    %7 = arith.addf %4, %6 : vector<16x8x256xf32>
    %cst = arith.constant 0.000000e+00 : f32
    %8 = vector.broadcast %cst : f32 to vector<16x8x256xf32>
    %9 = arith.maximumf %7, %8 : vector<16x8x256xf32>
    %c0_9 = arith.constant 0 : index
    %c0_10 = arith.constant 0 : index
    %c0_11 = arith.constant 0 : index
    %c0_12 = arith.constant 0 : index
    %10 = vector.load %arg5[%c0_9, %c0_10, %c0_11, %c0_12] : memref<1x16x8x256xf32, #tpu.memory_space<vmem>>, vector<1x16x8x256xf32>
    %11 = vector.shape_cast %10 : vector<1x16x8x256xf32> to vector<16x8x256xf32>
    %12 = vector.shape_cast %9 : vector<16x8x256xf32> to vector<1x16x8x256xf32>
    tpu.vector_store %arg5[%c0_9, %c0_10, %c0_11, %c0_12], %12 {strides = array<i32>} : memref<1x16x8x256xf32, #tpu.memory_space<vmem>>, vector<1x16x8x256xf32>,
    %13 = vector.extract_strided_slice %9 {offsets = [0, 0, 0], sizes = [16, 8, 128], strides = [1, 1, 1]} : vector<16x8x256xf32> to vector<16x8x128xf32>
    %14 = vector.extract_strided_slice %9 {offsets = [0, 0, 128], sizes = [16, 8, 128], strides = [1, 1, 1]} : vector<16x8x256xf32> to vector<16x8x128xf32>
    %15 = arith.maximumf %13, %14 : vector<16x8x128xf32>
    %16 = vector.shape_cast %15 : vector<16x8x128xf32> to vector<8x2x8x128xf32>
    %cst_13 = arith.constant dense<0xFF800000> : vector<8x8x128xf32>
    %17 = vector.multi_reduction <maximumf>, %16, %cst_13 [1] : vector<8x2x8x128xf32> to vector<8x8x128xf32>
    %c0_14 = arith.constant 0 : index
    %c0_15 = arith.constant 0 : index
    %c0_16 = arith.constant 0 : index
    %c0_17 = arith.constant 0 : index
    %18 = vector.load %arg6[%c0_14, %c0_15, %c0_16, %c0_17] : memref<1x8x8x128xf32, #tpu.memory_space<vmem>>, vector<1x8x8x128xf32>
    %19 = vector.shape_cast %18 : vector<1x8x8x128xf32> to vector<8x8x128xf32>
    %20 = vector.shape_cast %17 : vector<8x8x128xf32> to vector<1x8x8x128xf32>
    tpu.vector_store %arg6[%c0_14, %c0_15, %c0_16, %c0_17], %20 {strides = array<i32>} : memref<1x8x8x128xf32, #tpu.memory_space<vmem>>, vector<1x8x8x128xf32>,
    return
  }
  func.func @transform_0(%arg0: i32, %arg1: i32) -> (i32, i32, i32, i32) {
    %c0_i32 = arith.constant 0 : i32
    %c0_i32_0 = arith.constant 0 : i32
    %c0_i32_1 = arith.constant 0 : i32
    return %arg0, %arg1, %c0_i32, %c0_i32_0 : i32, i32, i32, i32
  }
  func.func @transform_1(%arg0: i32, %arg1: i32) -> (i32, i32, i32) {
    %c0_i32 = arith.constant 0 : i32
    %c0_i32_0 = arith.constant 0 : i32
    %c0_i32_1 = arith.constant 0 : i32
    %c0_i32_2 = arith.constant 0 : i32
    return %c0_i32, %c0_i32_0, %c0_i32_1 : i32, i32, i32
  }
  func.func @transform_2(%arg0: i32, %arg1: i32) -> (i32, i32, i32) {
    %c0_i32 = arith.constant 0 : i32
    %c0_i32_0 = arith.constant 0 : i32
    %c0_i32_1 = arith.constant 0 : i32
    %c0_i32_2 = arith.constant 0 : i32
    return %c0_i32, %c0_i32_0, %c0_i32_1 : i32, i32, i32
  }
  func.func @transform_3(%arg0: i32, %arg1: i32) -> (i32, i32, i32, i32) {
    %c0_i32 = arith.constant 0 : i32
    %c0_i32_0 = arith.constant 0 : i32
    %c0_i32_1 = arith.constant 0 : i32
    return %arg0, %arg1, %c0_i32, %c0_i32_0 : i32, i32, i32, i32
  }
  func.func @transform_4(%arg0: i32, %arg1: i32) -> (i32, i32, i32, i32) {
    %c0_i32 = arith.constant 0 : i32
    %c0_i32_0 = arith.constant 0 : i32
    %c0_i32_1 = arith.constant 0 : i32
    return %arg0, %arg1, %c0_i32, %c0_i32_0 : i32, i32, i32, i32
  }
}

</mosaic_0001>

<bundles_post_ra>
// kernel: encoder_forward.5
= control target key start
LH: loop header
LB: loop body
LE: loop exit
PB: predicated region body
PF: predicated region fallthrough
CT: control target
= control target key end

     0   :  { %s717_s15 = smov 0   ;;  %s719_s16 = smov 0   ;;  %s1043_s0 = inlined_call_operand.vmem [shape: f32[2,16,8,256], index: 0, kind: input, shape index: {}]   ;;  %s1044_s1 = inlined_call_operand.vmem [shape: f32[1,1,256], index: 1, kind: input, shape index: {}]   ;;  %s1045_s2 = inlined_call_operand.vmem [shape: f32[1,1,256], index: 2, kind: input, shape index: {}]   ;;  %s1046_s3 = inlined_call_operand.vmem [shape: f32[2,16,8,256], index: 3, kind: output, shape index: {0}]   ;;  %s1047_s4 = inlined_call_operand.vmem [shape: f32[2,8,8,128], index: 4, kind: output, shape index: {1}]  }
   0x1   :  { %s721_s17 = smov 0  }
   0x2 LB: > { %s27_s18 = sadd.s32 1, %s686_s16  ;;  %p632_p0 = scmp.ge.s32.totalorder %s690_s17, 1  ;;  %s690_s17 = sphi %s721_s17, %s15_s17   ;;  %s686_s16 = sphi %s719_s16, %s1049_s16   ;;  %s682_s15 = sphi %s717_s15, %s1048_s15  }
   0x3   : > { %p29_p1 = scmp.ge.s32.totalorder %s27_s18, 2  ;;  %p189_p2 = scmp.lt.s32.totalorder %s690_s17, 3 }
   0x5   : > { %s1051_s18 = smov (%p29_p1, %s27_s18), 0  ;;  %p190_p3 = pnand %p632_p0, %p189_p2 }
   0x6   : > { %p235_p4 = scmp.lt.s32.totalorder (!%p190_p3), %s682_s15, 1  ;;  %v300_v0 = vlaneseq (!%p190_p3)  ;;  %v298_v2 = vld [vmem:[%s1044_s1] sm:$0x3] (!%p190_p3) }
   0x7   : > { %193 = sbr.rel (%p190_p3) target bundleno = 56 (0x38), region = 32  ;;  %v342_v3 = vld [vmem:[%s1045_s2] sm:$0x3] (!%p190_p3) }
   0x8   : > { %v301_v1 = vshrl.u32 (!%p190_p3), %v300_v0, 7 }
   0xa   : > { %v302_v4 = vsub.s32 (!%p190_p3), 0, %v301_v1  ;;  %v306_v5 = vsub.s32 (!%p190_p3), 1, %v301_v1 }
   0xc   : > { %v752_v7 = vrot.slane (!%p190_p3), %v298_v2, %v302_v4  ;;  %v754_v8 = vrot.slane (!%p190_p3), %v342_v3, %v302_v4  ;;  %v757_v10 = vrot.slane (!%p190_p3), %v298_v2, %v306_v5  ;;  %v759_v11 = vrot.slane (!%p190_p3), %v342_v3, %v306_v5 }
   0xe   : > { %s1053_s15 = smov (!%p235_p4, %s682_s15), 1 }
   0xf   : > { %s641_s23 = sshll.u32 %s1053_s15, 8  ;;  %s643_s30 = sshll.u32 %s1053_s15, 6 }
  0x10   : > { %s749_s26 = scalar_lea.vmem %s1043_s0, %s641_s23  ;;  %s795_s29 = scalar_lea.vmem %s1046_s3, %s641_s23 }
  0x11   : > { %v266_v6 = vld [vmem:[%s749_s26] sm:$0xff]  ;;  %v267_v9 = vld [vmem:[%s749_s26 + $0x8] sm:$0xff]  ;;  %v268_v12 = vld [vmem:[%s749_s26 + $0x10] sm:$0xff]  ;;  %s264_s7 = scalar_lea.vmem %s1047_s4, %s643_s30 }
  0x12   : > { %v269_v13 = vld [vmem:[%s749_s26 + $0x18] sm:$0xff]  ;;  %v270_v14 = vld [vmem:[%s749_s26 + $0x20] sm:$0xff]  ;;  %v271_v15 = vld [vmem:[%s749_s26 + $0x28] sm:$0xff]  ;;  %v310_v16 = vmul.f32 %v752_v7, %v266_v6  ;;  %v311_v17 = vmul.f32 %v757_v10, %v267_v9  ;;  %v312_v18 = vmul.f32 %v752_v7, %v268_v12 }
  0x13   : > { %v313_v19 = vmul.f32 %v757_v10, %v269_v13  ;;  %v272_v20 = vld [vmem:[%s749_s26 + $0x30] sm:$0xff]  ;;  %v273_v21 = vld [vmem:[%s749_s26 + $0x38] sm:$0xff]  ;;  %v314_v22 = vmul.f32 %v752_v7, %v270_v14  ;;  %v315_v23 = vmul.f32 %v757_v10, %v271_v15  ;;  %v274_v30 = vld [vmem:[%s749_s26 + $0x40] sm:$0xff] }
  0x14   : > { %v316_v24 = vmul.f32 %v752_v7, %v272_v20  ;;  %v317_v25 = vmul.f32 %v757_v10, %v273_v21  ;;  %v776_v26 = vadd.f32 %v754_v8, %v310_v16  ;;  %v779_v27 = vadd.f32 %v759_v11, %v311_v17  ;;  %v275_v31 = vld [vmem:[%s749_s26 + $0x48] sm:$0xff]  ;;  %v276_v32 = vld [vmem:[%s749_s26 + $0x50] sm:$0xff]  ;;  %v277_v37 = vld [vmem:[%s749_s26 + $0x58] sm:$0xff] }
  0x15   : > { %v782_v28 = vadd.f32 %v754_v8, %v312_v18  ;;  %v785_v29 = vadd.f32 %v759_v11, %v313_v19  ;;  %v798_v33 = vadd.f32 %v754_v8, %v314_v22  ;;  %v801_v34 = vadd.f32 %v759_v11, %v315_v23  ;;  %v278_v38 = vld [vmem:[%s749_s26 + $0x60] sm:$0xff]  ;;  %v279_v39 = vld [vmem:[%s749_s26 + $0x68] sm:$0xff]  ;;  %v280_v44 = vld [vmem:[%s749_s26 + $0x70] sm:$0xff] }
  0x16   : > { %v804_v35 = vadd.f32 %v754_v8, %v316_v24  ;;  %v807_v36 = vadd.f32 %v759_v11, %v317_v25  ;;  %v386_v40 = vmax.f32 %v776_v26, 0.0  ;;  %v387_v41 = vmax.f32 %v779_v27, 0.0  ;;  %v281_v45 = vld [vmem:[%s749_s26 + $0x78] sm:$0xff]  ;;  %v282_v62 = vld [vmem:[%s749_s26 + $0x80] sm:$0xff]  ;;  %v283_v63 = vld [vmem:[%s749_s26 + $0x88] sm:$0xff] }
  0x17   : > { %v388_v42 = vmax.f32 %v782_v28, 0.0  ;;  %v389_v43 = vmax.f32 %v785_v29, 0.0  ;;  %v390_v46 = vmax.f32 %v798_v33, 0.0  ;;  %v391_v47 = vmax.f32 %v801_v34, 0.0  ;;  %v284_v0 = vld [vmem:[%s749_s26 + $0x90] sm:$0xff]  ;;  %v285_v5 = vld [vmem:[%s749_s26 + $0x98] sm:$0xff] }
  0x18   : > { %v392_v48 = vmax.f32 %v804_v35, 0.0  ;;  %v393_v49 = vmax.f32 %v807_v36, 0.0  ;;  %418 = vst [vmem:[%s795_s29] sm:$0xff] %v386_v40  ;;  %419 = vst [vmem:[%s795_s29 + $0x8] sm:$0xff] %v387_v41  ;;  %v318_v50 = vmul.f32 %v752_v7, %v274_v30  ;;  %v319_v51 = vmul.f32 %v757_v10, %v275_v31  ;;  %v286_v6 = vld [vmem:[%s749_s26 + $0xa0] sm:$0xff]  ;;  %v287_v9 = vld [vmem:[%s749_s26 + $0xa8] sm:$0xff] }
  0x19   : > { %420 = vst [vmem:[%s795_s29 + $0x10] sm:$0xff] %v388_v42  ;;  %421 = vst [vmem:[%s795_s29 + $0x18] sm:$0xff] %v389_v43  ;;  %v320_v52 = vmul.f32 %v752_v7, %v276_v32  ;;  %v321_v53 = vmul.f32 %v757_v10, %v277_v37  ;;  %v322_v54 = vmul.f32 %v752_v7, %v278_v38  ;;  %v288_v16 = vld [vmem:[%s749_s26 + $0xb0] sm:$0xff]  ;;  %v289_v17 = vld [vmem:[%s749_s26 + $0xb8] sm:$0xff] }
  0x1a   : > { %422 = vst [vmem:[%s795_s29 + $0x20] sm:$0xff] %v390_v46  ;;  %423 = vst [vmem:[%s795_s29 + $0x28] sm:$0xff] %v391_v47  ;;  %v323_v55 = vmul.f32 %v757_v10, %v279_v39  ;;  %v324_v56 = vmul.f32 %v752_v7, %v280_v44  ;;  %v325_v57 = vmul.f32 %v757_v10, %v281_v45 }
  0x1b   : > { %424 = vst [vmem:[%s795_s29 + $0x30] sm:$0xff] %v392_v48  ;;  %425 = vst [vmem:[%s795_s29 + $0x38] sm:$0xff] %v393_v49  ;;  %v855_v58 = vadd.f32 %v754_v8, %v318_v50  ;;  %v858_v59 = vadd.f32 %v759_v11, %v319_v51  ;;  %v861_v60 = vadd.f32 %v754_v8, %v320_v52  ;;  %v290_v50 = vld [vmem:[%s749_s26 + $0xc0] sm:$0xff]  ;;  %v291_v51 = vld [vmem:[%s749_s26 + $0xc8] sm:$0xff] }
  0x1c   : > { %v864_v61 = vadd.f32 %v759_v11, %v321_v53  ;;  %v870_v1 = vadd.f32 %v754_v8, %v322_v54  ;;  %v873_v2 = vadd.f32 %v759_v11, %v323_v55  ;;  %v876_v3 = vadd.f32 %v754_v8, %v324_v56  ;;  %v292_v52 = vld [vmem:[%s749_s26 + $0xd0] sm:$0xff] }
  0x1d   : > { %v879_v4 = vadd.f32 %v759_v11, %v325_v57  ;;  %v394_v12 = vmax.f32 %v855_v58, 0.0  ;;  %v395_v13 = vmax.f32 %v858_v59, 0.0  ;;  %v396_v14 = vmax.f32 %v861_v60, 0.0  ;;  %v293_v57 = vld [vmem:[%s749_s26 + $0xd8] sm:$0xff] }
  0x1e   : > { %v397_v15 = vmax.f32 %v864_v61, 0.0  ;;  %v398_v18 = vmax.f32 %v870_v1, 0.0  ;;  %v399_v19 = vmax.f32 %v873_v2, 0.0  ;;  %v400_v20 = vmax.f32 %v876_v3, 0.0 }
  0x1f   : > { %v401_v21 = vmax.f32 %v879_v4, 0.0  ;;  %426 = vst [vmem:[%s795_s29 + $0x40] sm:$0xff] %v394_v12  ;;  %427 = vst [vmem:[%s795_s29 + $0x48] sm:$0xff] %v395_v13  ;;  %v326_v22 = vmul.f32 %v752_v7, %v282_v62  ;;  %v327_v23 = vmul.f32 %v757_v10, %v283_v63  ;;  %v328_v24 = vmul.f32 %v752_v7, %v284_v0  ;;  %v294_v62 = vld [vmem:[%s749_s26 + $0xe0] sm:$0xff]  ;;  %v295_v63 = vld [vmem:[%s749_s26 + $0xe8] sm:$0xff] }
  0x20   : > { %428 = vst [vmem:[%s795_s29 + $0x50] sm:$0xff] %v396_v14  ;;  %429 = vst [vmem:[%s795_s29 + $0x58] sm:$0xff] %v397_v15  ;;  %v329_v25 = vmul.f32 %v757_v10, %v285_v5  ;;  %v330_v30 = vmul.f32 %v752_v7, %v286_v6  ;;  %v331_v31 = vmul.f32 %v757_v10, %v287_v9 }
  0x21   : > { %430 = vst [vmem:[%s795_s29 + $0x60] sm:$0xff] %v398_v18  ;;  %431 = vst [vmem:[%s795_s29 + $0x68] sm:$0xff] %v399_v19  ;;  %v332_v32 = vmul.f32 %v752_v7, %v288_v16  ;;  %v333_v37 = vmul.f32 %v757_v10, %v289_v17  ;;  %v927_v38 = vadd.f32 %v754_v8, %v326_v22  ;;  %v296_v16 = vld [vmem:[%s749_s26 + $0xf0] sm:$0xff]  ;;  %v297_v17 = vld [vmem:[%s749_s26 + $0xf8] sm:$0xff] }
  0x22   : > { %432 = vst [vmem:[%s795_s29 + $0x70] sm:$0xff] %v400_v20  ;;  %433 = vst [vmem:[%s795_s29 + $0x78] sm:$0xff] %v401_v21  ;;  %v930_v39 = vadd.f32 %v759_v11, %v327_v23  ;;  %v933_v44 = vadd.f32 %v754_v8, %v328_v24  ;;  %v936_v45 = vadd.f32 %v759_v11, %v329_v25 }
  0x23   : > { %v942_v53 = vadd.f32 %v754_v8, %v330_v30  ;;  %v945_v54 = vadd.f32 %v759_v11, %v331_v31  ;;  %v948_v55 = vadd.f32 %v754_v8, %v332_v32  ;;  %v951_v56 = vadd.f32 %v759_v11, %v333_v37 }
  0x24   : > { %v402_v0 = vmax.f32 %v927_v38, 0.0  ;;  %v403_v5 = vmax.f32 %v930_v39, 0.0  ;;  %v404_v6 = vmax.f32 %v933_v44, 0.0  ;;  %v405_v9 = vmax.f32 %v936_v45, 0.0 }
  0x25   : > { %v406_v22 = vmax.f32 %v942_v53, 0.0  ;;  %v407_v23 = vmax.f32 %v945_v54, 0.0  ;;  %v408_v24 = vmax.f32 %v948_v55, 0.0  ;;  %v409_v25 = vmax.f32 %v951_v56, 0.0 }
  0x26   : > { %434 = vst [vmem:[%s795_s29 + $0x80] sm:$0xff] %v402_v0  ;;  %435 = vst [vmem:[%s795_s29 + $0x88] sm:$0xff] %v403_v5  ;;  %v334_v30 = vmul.f32 %v752_v7, %v290_v50  ;;  %v335_v31 = vmul.f32 %v757_v10, %v291_v51  ;;  %v336_v32 = vmul.f32 %v752_v7, %v292_v52 }
  0x27   : > { %436 = vst [vmem:[%s795_s29 + $0x90] sm:$0xff] %v404_v6  ;;  %437 = vst [vmem:[%s795_s29 + $0x98] sm:$0xff] %v405_v9  ;;  %v337_v37 = vmul.f32 %v757_v10, %v293_v57  ;;  %v338_v38 = vmul.f32 %v752_v7, %v294_v62  ;;  %v339_v39 = vmul.f32 %v757_v10, %v295_v63 }
  0x28   : > { %438 = vst [vmem:[%s795_s29 + $0xa0] sm:$0xff] %v406_v22  ;;  %439 = vst [vmem:[%s795_s29 + $0xa8] sm:$0xff] %v407_v23  ;;  %v340_v44 = vmul.f32 %v752_v7, %v296_v16  ;;  %v341_v45 = vmul.f32 %v757_v10, %v297_v17  ;;  %v378_v50 = vadd.f32 %v754_v8, %v334_v30 }
  0x29   : > { %440 = vst [vmem:[%s795_s29 + $0xb0] sm:$0xff] %v408_v24  ;;  %441 = vst [vmem:[%s795_s29 + $0xb8] sm:$0xff] %v409_v25  ;;  %v379_v51 = vadd.f32 %v759_v11, %v335_v31  ;;  %v380_v52 = vadd.f32 %v754_v8, %v336_v32  ;;  %v381_v53 = vadd.f32 %v759_v11, %v337_v37 }
  0x2a   : > { %v382_v54 = vadd.f32 %v754_v8, %v338_v38  ;;  %v383_v55 = vadd.f32 %v759_v11, %v339_v39  ;;  %v384_v7 = vadd.f32 %v754_v8, %v340_v44  ;;  %v385_v10 = vadd.f32 %v759_v11, %v341_v45 }
  0x2b   : > { %v410_v56 = vmax.f32 %v378_v50, 0.0  ;;  %v411_v57 = vmax.f32 %v379_v51, 0.0  ;;  %v412_v62 = vmax.f32 %v380_v52, 0.0  ;;  %v413_v63 = vmax.f32 %v381_v53, 0.0 }
  0x2c   : > { %v414_v16 = vmax.f32 %v382_v54, 0.0  ;;  %v415_v17 = vmax.f32 %v383_v55, 0.0  ;;  %v416_v30 = vmax.f32 %v384_v7, 0.0  ;;  %v417_v31 = vmax.f32 %v385_v10, 0.0 }
  0x2d   : > { %442 = vst [vmem:[%s795_s29 + $0xc0] sm:$0xff] %v410_v56  ;;  %443 = vst [vmem:[%s795_s29 + $0xc8] sm:$0xff] %v411_v57  ;;  %v450_v8 = vmax.f32 %v386_v40, %v387_v41  ;;  %v451_v11 = vmax.f32 %v388_v42, %v389_v43  ;;  %v452_v32 = vmax.f32 %v390_v46, %v391_v47 }
  0x2e   : > { %444 = vst [vmem:[%s795_s29 + $0xd0] sm:$0xff] %v412_v62  ;;  %445 = vst [vmem:[%s795_s29 + $0xd8] sm:$0xff] %v413_v63  ;;  %v453_v37 = vmax.f32 %v392_v48, %v393_v49  ;;  %v454_v26 = vmax.f32 %v394_v12, %v395_v13  ;;  %v455_v27 = vmax.f32 %v396_v14, %v397_v15 }
  0x2f   : > { %446 = vst [vmem:[%s795_s29 + $0xe0] sm:$0xff] %v414_v16  ;;  %447 = vst [vmem:[%s795_s29 + $0xe8] sm:$0xff] %v415_v17  ;;  %v456_v28 = vmax.f32 %v398_v18, %v399_v19  ;;  %v457_v29 = vmax.f32 %v400_v20, %v401_v21  ;;  %v466_v33 = vmax.f32 %v450_v8, %v451_v11 }
  0x30   : > { %448 = vst [vmem:[%s795_s29 + $0xf0] sm:$0xff] %v416_v30  ;;  %449 = vst [vmem:[%s795_s29 + $0xf8] sm:$0xff] %v417_v31  ;;  %v467_v34 = vmax.f32 %v452_v32, %v453_v37  ;;  %v458_v35 = vmax.f32 %v402_v0, %v403_v5  ;;  %v459_v36 = vmax.f32 %v404_v6, %v405_v9 }
  0x31   : > { %v468_v40 = vmax.f32 %v454_v26, %v455_v27  ;;  %v469_v41 = vmax.f32 %v456_v28, %v457_v29  ;;  %v460_v42 = vmax.f32 %v406_v22, %v407_v23  ;;  %v461_v43 = vmax.f32 %v408_v24, %v409_v25  ;;  %474 = vst [vmem:[%s264_s7] sm:$0xff] %v466_v33 }
  0x32   : > { %475 = vst [vmem:[%s264_s7 + $0x8] sm:$0xff] %v467_v34  ;;  %v470_v46 = vmax.f32 %v458_v35, %v459_v36  ;;  %v462_v47 = vmax.f32 %v410_v56, %v411_v57  ;;  %v463_v48 = vmax.f32 %v412_v62, %v413_v63  ;;  %v464_v49 = vmax.f32 %v414_v16, %v415_v17 }
  0x33   : > { %476 = vst [vmem:[%s264_s7 + $0x10] sm:$0xff] %v468_v40  ;;  %477 = vst [vmem:[%s264_s7 + $0x18] sm:$0xff] %v469_v41  ;;  %v471_v58 = vmax.f32 %v460_v42, %v461_v43  ;;  %v465_v59 = vmax.f32 %v416_v30, %v417_v31 }
  0x34   : > { %478 = vst [vmem:[%s264_s7 + $0x20] sm:$0xff] %v470_v46  ;;  %v472_v60 = vmax.f32 %v462_v47, %v463_v48 }
  0x35   : > { %479 = vst [vmem:[%s264_s7 + $0x28] sm:$0xff] %v471_v58  ;;  %v473_v61 = vmax.f32 %v464_v49, %v465_v59 }
  0x36   : > { %480 = vst [vmem:[%s264_s7 + $0x30] sm:$0xff] %v472_v60 }
  0x37   : > { %481 = vst [vmem:[%s264_s7 + $0x38] sm:$0xff] %v473_v61 }
  0x38 PF: > { %s15_s17 = sadd.s32 1, %s690_s17   ;;  %s1048_s15 = smov %s686_s16 }
  0x39   : > { %p12_p5 = scmp.ge.s32.totalorder %s15_s17, 4   ;;  %s1049_s16 = smov %s1051_s18 }
  0x3b   :  { %14 = sbr.rel (!%p12_p5) target bundleno = 2 (0x2), region = 74 }

// kernel: encoder_forward.3
= control target key start
LH: loop header
LB: loop body
LE: loop exit
PB: predicated region body
PF: predicated region fallthrough
CT: control target
= control target key end

     0   :  { %s3697_s21 = smov 0   ;;  %s3699_s0 = smov 0   ;;  %s5375_s0 = inlined_call_operand.vmem [shape: f32[1,1,128], index: 0, kind: input, shape index: {}]   ;;  %s5376_s1 = inlined_call_operand.vmem [shape: f32[1,1,128], index: 1, kind: input, shape index: {}]   ;;  %s5377_s2 = inlined_call_operand.vmem [shape: f32[3,384,128], index: 2, kind: input, shape index: {}]   ;;  %s5378_s3 = inlined_call_operand.vmem [shape: f32[2,16,16,128], index: 3, kind: input, shape index: {}, may-alias: {3,4}]   ;;  %s5379_s4 = inlined_call_operand.vmem [shape: f32[2,16,16,128], index: 4, kind: input, shape index: {}, may-alias: {3,4}]   ;;  %s5380_s5 = inlined_call_operand.vmem [shape: f32[2,16,16,128], index: 5, kind: output, shape index: {0}]   ;;  %s5381_s6 = inlined_call_operand.vmem [shape: f32[2,1,8,128], index: 6, kind: output, shape index: {1}]  }
   0x1   :  { %s3701_s1 = smov 0  }
   0x2 LB: > { %s29_s4 = sadd.s32 1, %s3654_s0  ;;  %p2699_p0 = scmp.ge.s32.totalorder %s3658_s1, 1  ;;  %s3658_s1 = sphi %s3701_s1, %s17_s1   ;;  %s3654_s0 = sphi %s3699_s0, %s5478_s0   ;;  %s3650_s21 = sphi %s3697_s21, %s5477_s21  }
   0x3   : > { %p31_p1 = scmp.ge.s32.totalorder %s29_s4, 2  ;;  %p215_p2 = scmp.lt.s32.totalorder %s3658_s1, 3 }
   0x5   : > { %s5480_s4 = smov (%p31_p1, %s29_s4), 0  ;;  %p216_p3 = pnand %p2699_p0, %p215_p2 }
   0x7   : > { %219 = sbr.rel (%p216_p3) target bundleno = 601 (0x259), region = 36 }
   0xe   : > { %v2710_v0 = vld [vmem:[%s5377_s2 + $0x180] sm:$0xff]  ;;  %v2711_v1 = vld [vmem:[%s5377_s2 + $0x188] sm:$0xff]  ;;  %p261_p4 = scmp.lt.s32.totalorder %s3650_s21, 1  ;;  %v5382_v3 = vmov 0.0|0.0   ;;  %v2712_v6 = vld [vmem:[%s5377_s2 + $0x190] sm:$0xff]  ;;  %vm740_vm0 = vcmask 1046528  }
   0xf   : > { %v2742_v2 = vld [vmem:[%s5377_s2 + $0x280] sm:$0xff]  ;;  %3340 = vmatprep.subr.bf16.mxu0 %v5382_v3  ;;  %v3341_v4 = vpack.c.bf16 %v2711_v1, %v2710_v0  ;;  %v2743_v5 = vld [vmem:[%s5377_s2 + $0x288] sm:$0xff]  ;;  %v2713_v7 = vld [vmem:[%s5377_s2 + $0x198] sm:$0xff]  ;;  %vm631_vm1 = vcmask 1040384   ;;  %vm2516_vm3 = vcmask 1041408  }
  0x10   : > { %v3388_v8 = vpack.c.bf16 %v2743_v5, %v2742_v2  ;;  %v2744_v9 = vld [vmem:[%s5377_s2 + $0x290] sm:$0xff]  ;;  %v2745_v10 = vld [vmem:[%s5377_s2 + $0x298] sm:$0xff]  ;;  %s5482_s21 = smov (!%p261_p4, %s3650_s21), 1  ;;  %v3344_v11 = vpack.c.bf16 %v2713_v7, %v2712_v6  ;;  %v2746_v13 = vld [vmem:[%s5377_s2 + $0x2a0] sm:$0xff] }
  0x11   : > { %3342 = vmatpush1.bf16.msra.mxu0 %v3341_v4  ;;  %v3392_v12 = vpack.c.bf16 %v2745_v10, %v2744_v9  ;;  %v2747_v14 = vld [vmem:[%s5377_s2 + $0x2a8] sm:$0xff]  ;;  %v2714_v15 = vld [vmem:[%s5377_s2 + $0x1a0] sm:$0xff]  ;;  %s2954_s23 = sshll.u32 %s5482_s21, 8  ;;  %v2748_v19 = vld [vmem:[%s5377_s2 + $0x2b0] sm:$0xff] }
  0x12   : > { %3389 = vmatprep.subr.bf16.mxu1 %v3388_v8  ;;  %3343 = vmatprep.subr.bf16.mxu0 %v5382_v3  ;;  %v2715_v16 = vld [vmem:[%s5377_s2 + $0x1a8] sm:$0xff]  ;;  %v3396_v17 = vpack.c.bf16 %v2747_v14, %v2746_v13  ;;  %v2749_v20 = vld [vmem:[%s5377_s2 + $0x2b8] sm:$0xff]  ;;  %s3767_s30 = scalar_lea.vmem %s5378_s3, %s2954_s23  ;;  %v2716_v21 = vld [vmem:[%s5377_s2 + $0x1b0] sm:$0xff]  ;;  %s5289_s16 = scalar_lea.vmem %s5380_s5, %s2954_s23 }
  0x13   : > { %3391 = vmatpush3.bf16.msra.mxu1 %v3388_v8  ;;  %v3347_v18 = vpack.c.bf16 %v2715_v16, %v2714_v15  ;;  %v2717_v22 = vld [vmem:[%s5377_s2 + $0x1b8] sm:$0xff]  ;;  %v3400_v23 = vpack.c.bf16 %v2749_v20, %v2748_v19  ;;  %v3777_v24 = vld [vmem:[%s3767_s30] sm:$0xff]  ;;  %v2751_v27 = vld [vmem:[%s5377_s2 + $0x2c8] sm:$0xff]  ;;  %s2704_s23 = sshll.u32 %s5482_s21, 3 }
  0x14   : > { %3393 = vmatprep.subr.bf16.mxu1 %v3392_v12  ;;  %v3350_v25 = vpack.c.bf16 %v2717_v22, %v2716_v21  ;;  %v2750_v26 = vld [vmem:[%s5377_s2 + $0x2c0] sm:$0xff]  ;;  %v3786_v28 = vld [vmem:[%s3767_s30 + $0x8] sm:$0xff]  ;;  %v744_v29 = vrot.slane %v3777_v24, 1  ;;  %1010 = vmatprep.mubr.f32.mxu0 %v3777_v24  ;;  %v2752_v36 = vld [vmem:[%s5377_s2 + $0x2d0] sm:$0xff]  ;;  %s288_s19 = scalar_lea.vmem %s5381_s6, %s2704_s23 }
  0x15   : > { %3345 = vmatpush1.bf16.msra.mxu0 %v3344_v11  ;;  %v2718_v30 = vld [vmem:[%s5377_s2 + $0x1c0] sm:$0xff]  ;;  %v2719_v31 = vld [vmem:[%s5377_s2 + $0x1c8] sm:$0xff]  ;;  %v3798_v32 = vrot.slane %v3786_v28, 1  ;;  %v3404_v33 = vpack.c.bf16 %v2751_v27, %v2750_v26  ;;  %v2753_v37 = vld [vmem:[%s5377_s2 + $0x2d8] sm:$0xff] }
  0x16   : > { %3346 = vmatprep.subr.bf16.mxu0 %v5382_v3  ;;  %v3353_v35 = vpack.c.bf16 %v2719_v31, %v2718_v30  ;;  %v2720_v38 = vld [vmem:[%s5377_s2 + $0x1d0] sm:$0xff]  ;;  %v2721_v39 = vld [vmem:[%s5377_s2 + $0x1d8] sm:$0xff]  ;;  %v3408_v40 = vpack.c.bf16 %v2753_v37, %v2752_v36  ;;  %v2754_v42 = vld [vmem:[%s5377_s2 + $0x2e0] sm:$0xff] }
  0x17   : > { %3395 = vmatpush3.bf16.msra.mxu1 %v3392_v12  ;;  %v3802_v34 = vsel %vm740_vm0, %v744_v29, %v3798_v32  ;;  %v3356_v41 = vpack.c.bf16 %v2721_v39, %v2720_v38  ;;  %v2755_v43 = vld [vmem:[%s5377_s2 + $0x2e8] sm:$0xff]  ;;  %v2722_v44 = vld [vmem:[%s5377_s2 + $0x1e0] sm:$0xff]  ;;  %v2756_v48 = vld [vmem:[%s5377_s2 + $0x2f0] sm:$0xff] }
  0x18   : > { %3397 = vmatprep.subr.bf16.mxu1 %v3396_v17  ;;  %3132 = vmatprep.mubr.f32.mxu1 %v3802_v34  ;;  %v2723_v45 = vld [vmem:[%s5377_s2 + $0x1e8] sm:$0xff]  ;;  %v3412_v46 = vpack.c.bf16 %v2755_v43, %v2754_v42  ;;  %v2757_v49 = vld [vmem:[%s5377_s2 + $0x2f8] sm:$0xff]  ;;  %v2724_v50 = vld [vmem:[%s5377_s2 + $0x1f0] sm:$0xff] }
  0x19   : > { %3348 = vmatpush1.bf16.msra.mxu0 %v3347_v18  ;;  %v3359_v47 = vpack.c.bf16 %v2723_v45, %v2722_v44  ;;  %v2725_v51 = vld [vmem:[%s5377_s2 + $0x1f8] sm:$0xff]  ;;  %v3416_v52 = vpack.c.bf16 %v2757_v49, %v2756_v48  ;;  %v3845_v54 = vld [vmem:[%s3767_s30 + $0x10] sm:$0xff]  ;;  %v2726_v56 = vld [vmem:[%s5377_s2 + $0x200] sm:$0xff] }
  0x1a   : > { %3349 = vmatprep.subr.bf16.mxu0 %v5382_v3  ;;  %v3362_v53 = vpack.c.bf16 %v2725_v51, %v2724_v50  ;;  %v3848_v55 = vld [vmem:[%s3767_s30 + $0x18] sm:$0xff]  ;;  %v2727_v57 = vld [vmem:[%s5377_s2 + $0x208] sm:$0xff]  ;;  %v849_v58 = vld [vmem:[%s5377_s2] sm:$0xff]  ;;  %v747_v60 = vrot.slane %v3845_v54, 1 }
  0x1b   : > { %3399 = vmatpush3.bf16.msra.mxu1 %v3396_v17  ;;  %v850_v59 = vld [vmem:[%s5377_s2 + $0x8] sm:$0xff]  ;;  %v3865_v61 = vrot.slane %v3848_v55, 1  ;;  %v3365_v62 = vpack.c.bf16 %v2727_v57, %v2726_v56  ;;  %v3868_v63 = vld [vmem:[%s3767_s30 + $0x20] sm:$0xff]  ;;  %v2728_v1 = vld [vmem:[%s5377_s2 + $0x210] sm:$0xff] }
  0x1c   : > { %3401 = vmatprep.subr.bf16.mxu1 %v3400_v23  ;;  %v3871_v0 = vld [vmem:[%s3767_s30 + $0x28] sm:$0xff]  ;;  %v2729_v2 = vld [vmem:[%s5377_s2 + $0x218] sm:$0xff]  ;;  %v3421_v4 = vpack.c.bf16 %v850_v59, %v849_v58  ;;  %v851_v6 = vld [vmem:[%s5377_s2 + $0x10] sm:$0xff]  ;;  %v750_v8 = vrot.slane %v3868_v63, 1 }
  0x1d   : > { %3351 = vmatpush1.bf16.msra.mxu0 %v3350_v25  ;;  %v3883_v5 = vsel %vm740_vm0, %v747_v60, %v3865_v61  ;;  %v852_v7 = vld [vmem:[%s5377_s2 + $0x18] sm:$0xff]  ;;  %v3893_v9 = vrot.slane %v3871_v0, 1  ;;  %v3368_v10 = vpack.c.bf16 %v2729_v2, %v2728_v1  ;;  %v3896_v11 = vld [vmem:[%s3767_s30 + $0x30] sm:$0xff]  ;;  %v2730_v13 = vld [vmem:[%s5377_s2 + $0x220] sm:$0xff] }
  0x1e   : > { %3352 = vmatprep.subr.bf16.mxu0 %v5382_v3  ;;  %v3899_v12 = vld [vmem:[%s3767_s30 + $0x38] sm:$0xff]  ;;  %v2731_v14 = vld [vmem:[%s5377_s2 + $0x228] sm:$0xff]  ;;  %v3424_v15 = vpack.c.bf16 %v852_v7, %v851_v6  ;;  %v853_v17 = vld [vmem:[%s5377_s2 + $0x20] sm:$0xff]  ;;  %v753_v19 = vrot.slane %v3896_v11, 1 }
  0x1f   : > { %3403 = vmatpush3.bf16.msra.mxu1 %v3400_v23  ;;  %v3914_v16 = vsel %vm740_vm0, %v750_v8, %v3893_v9  ;;  %v854_v18 = vld [vmem:[%s5377_s2 + $0x28] sm:$0xff]  ;;  %v3924_v20 = vrot.slane %v3899_v12, 1  ;;  %v3371_v21 = vpack.c.bf16 %v2731_v14, %v2730_v13  ;;  %v3927_v22 = vld [vmem:[%s3767_s30 + $0x40] sm:$0xff]  ;;  %v2732_v25 = vld [vmem:[%s5377_s2 + $0x230] sm:$0xff] }
  0x20   : > { %3405 = vmatprep.subr.bf16.mxu1 %v3404_v33  ;;  %v3930_v23 = vld [vmem:[%s3767_s30 + $0x48] sm:$0xff]  ;;  %v2733_v26 = vld [vmem:[%s5377_s2 + $0x238] sm:$0xff]  ;;  %v3427_v27 = vpack.c.bf16 %v854_v18, %v853_v17  ;;  %v855_v30 = vld [vmem:[%s5377_s2 + $0x30] sm:$0xff] }
  0x21   : > { %3354 = vmatpush1.bf16.msra.mxu0 %v3353_v35  ;;  %5428 = vst [vmem:[#allocation6_spill] sm:$0xff] %v3924_v20  ;;  %v3945_v29 = vsel %vm740_vm0, %v753_v19, %v3924_v20  ;;  %v856_v31 = vld [vmem:[%s5377_s2 + $0x38] sm:$0xff]  ;;  %v3955_v35 = vrot.slane %v3930_v23, 1  ;;  %v3374_v36 = vpack.c.bf16 %v2733_v26, %v2732_v25  ;;  %v3958_v37 = vld [vmem:[%s3767_s30 + $0x50] sm:$0xff]  ;;  %v2734_v39 = vld [vmem:[%s5377_s2 + $0x240] sm:$0xff] }
  0x22   : > { %3355 = vmatprep.subr.bf16.mxu0 %v5382_v3  ;;  %v3961_v38 = vld [vmem:[%s3767_s30 + $0x58] sm:$0xff]  ;;  %v857_v43 = vld [vmem:[%s5377_s2 + $0x40] sm:$0xff]  ;;  %v858_v44 = vld [vmem:[%s5377_s2 + $0x48] sm:$0xff]  ;;  %v759_v45 = vrot.slane %v3958_v37, 1 }
  0x23   : > { %3407 = vmatpush3.bf16.msra.mxu1 %v3404_v33  ;;  %v756_v33 = vrot.slane %v3927_v22, 1  ;;  %5429 = vst [vmem:[#allocation7_spill] sm:$0xff] %v3955_v35  ;;  %v3989_v48 = vld [vmem:[%s3767_s30 + $0x60] sm:$0xff]  ;;  %v3992_v49 = vld [vmem:[%s3767_s30 + $0x68] sm:$0xff]  ;;  %v2736_v50 = vld [vmem:[%s5377_s2 + $0x250] sm:$0xff] }
  0x24   : > { %3409 = vmatprep.subr.bf16.mxu1 %v3408_v40  ;;  %v2737_v51 = vld [vmem:[%s5377_s2 + $0x258] sm:$0xff]  ;;  %v859_v56 = vld [vmem:[%s5377_s2 + $0x50] sm:$0xff]  ;;  %v762_v58 = vrot.slane %v3989_v48, 1  ;;  %v4017_v59 = vrot.slane %v3992_v49, 1  ;;  %v2738_v2 = vld [vmem:[%s5377_s2 + $0x260] sm:$0xff] }
  0x25   : > { %3357 = vmatpush1.bf16.msra.mxu0 %v3356_v41  ;;  %v3430_v41 = vpack.c.bf16 %v856_v31, %v855_v30  ;;  %v3976_v42 = vsel %vm740_vm0, %v756_v33, %v3955_v35  ;;  %v860_v57 = vld [vmem:[%s5377_s2 + $0x58] sm:$0xff]  ;;  %v3380_v60 = vpack.c.bf16 %v2737_v51, %v2736_v50  ;;  %v861_v8 = vld [vmem:[%s5377_s2 + $0x60] sm:$0xff]  ;;  %v4054_v18 = vld [vmem:[%s3767_s30 + $0x88] sm:$0xff]  ;;  %v4105_v51 = vrot.slane %v3777_v24, 7 }
  0x26   : > { %3358 = vmatprep.subr.bf16.mxu0 %v5382_v3  ;;  %5430 = vst [vmem:[#allocation8_spill] sm:$0xff] %v3976_v42  ;;  %5433 = vst [vmem:[#allocation11_spill] sm:$0xff] %v4017_v59  ;;  %v4023_v1 = vld [vmem:[%s3767_s30 + $0x78] sm:$0xff]  ;;  %v3436_v6 = vpack.c.bf16 %v860_v57, %v859_v56  ;;  %v4038_v7 = vsel %vm740_vm0, %v762_v58, %v4017_v59  ;;  %v4051_v17 = vld [vmem:[%s3767_s30 + $0x80] sm:$0xff] }
  0x27   : > { %3411 = vmatpush3.bf16.msra.mxu1 %v3408_v40  ;;  %v2735_v40 = vld [vmem:[%s5377_s2 + $0x248] sm:$0xff]  ;;  %5434 = vst [vmem:[#allocation12_spill] sm:$0xff] %v4038_v7  ;;  %v4048_v14 = vrot.slane %v4023_v1, 1  ;;  %v2740_v19 = vld [vmem:[%s5377_s2 + $0x270] sm:$0xff]  ;;  %v881_v26 = vld [vmem:[%s5377_s2 + $0x100] sm:$0xff] }
  0x28   : > { %3413 = vmatprep.subr.bf16.mxu1 %v3412_v46  ;;  %v863_v31 = vld [vmem:[%s5377_s2 + $0x70] sm:$0xff]  ;;  %v864_v33 = vld [vmem:[%s5377_s2 + $0x78] sm:$0xff]  ;;  %v865_v56 = vld [vmem:[%s5377_s2 + $0x80] sm:$0xff] }
  0x29   : > { %3360 = vmatpush1.bf16.msra.mxu0 %v3359_v47  ;;  %v3377_v47 = vpack.c.bf16 %v2735_v40, %v2734_v39  ;;  %5435 = vst [vmem:[#allocation13_spill] sm:$0xff] %v4048_v14  ;;  %v4085_v39 = vrot.slane %v4054_v18, 1  ;;  %v884_v50 = vld [vmem:[%s5377_s2 + $0x118] sm:$0xff]  ;;  %v866_v57 = vld [vmem:[%s5377_s2 + $0x88] sm:$0xff]  ;;  %vm4122_vm2 = vmneg %vm631_vm1 }
  0x2a   : > { %3361 = vmatprep.subr.bf16.mxu0 %v5382_v3 }
  0x2b   : > { %3415 = vmatpush3.bf16.msra.mxu1 %v3412_v46  ;;  %v3986_v46 = vrot.slane %v3961_v38, 1  ;;  %5437 = vst [vmem:[#allocation15_spill] sm:$0xff] %v4085_v39 }
  0x2c   : > { %3417 = vmatprep.subr.bf16.mxu1 %v3416_v52 }
  0x2d   : > { %3363 = vmatpush1.bf16.msra.mxu0 %v3362_v53  ;;  %5431 = vst [vmem:[#allocation9_spill] sm:$0xff] %v3986_v46  ;;  %v4007_v53 = vsel %vm740_vm0, %v759_v45, %v3986_v46  ;;  %v3442_v45 = vpack.c.bf16 %v864_v33, %v863_v31 }
  0x2e   : > { %3364 = vmatprep.subr.bf16.mxu0 %v5382_v3  ;;  %5432 = vst [vmem:[#allocation10_spill] sm:$0xff] %v4007_v53 }
  0x2f   : > { %3419 = vmatpush3.bf16.msra.mxu1 %v3416_v52  ;;  %v3433_v52 = vpack.c.bf16 %v858_v44, %v857_v43  ;;  %v4091_v43 = vld [vmem:[%s3767_s30 + $0x98] sm:$0xff] }
  0x30   : > { %3420 = vmatprep.subr.bf16.mxu1 %v5382_v3 }
  0x31   : > { %3366 = vmatpush1.bf16.msra.mxu0 %v3365_v62  ;;  %v4020_v62 = vld [vmem:[%s3767_s30 + $0x70] sm:$0xff] }
  0x32   : > { %3133 = vmatmul.mubr.msk.f32.vlgmr.msra.gmra.mrb[0].mxu1 %vm740_vm0, %v3798_v32  ;;  %3367 = vmatprep.subr.bf16.mxu0 %v5382_v3  ;;  %v765_v13 = vrot.slane %v4020_v62, 1 }
  0x33   : > { %3422 = vmatpush1.bf16.msra.mxu1 %v3421_v4  ;;  %3135 = vmatprep.mubr.f32.mxu1 %v3883_v5  ;;  %v2739_v4 = vld [vmem:[%s5377_s2 + $0x268] sm:$0xff] }
  0x34   : > { %3423 = vmatprep.subr.bf16.mxu1 %v5382_v3  ;;  %v4075_v30 = vsel %vm740_vm0, %v765_v13, %v4048_v14  ;;  %v3445_v13 = vpack.c.bf16 %v866_v57, %v865_v56  ;;  %v888_v56 = vld [vmem:[%s5377_s2 + $0x138] sm:$0xff] }
  0x35   : > { %3369 = vmatpush1.bf16.msra.mxu0 %v3368_v10  ;;  %v862_v10 = vld [vmem:[%s5377_s2 + $0x68] sm:$0xff]  ;;  %5436 = vst [vmem:[#allocation14_spill] sm:$0xff] %v4075_v30 }
  0x36   : > { %3136 = vmatmul.mubr.msk.f32.gmra.mrb[2].mxu1 %vm740_vm0, %v3865_v61  ;;  %3370 = vmatprep.subr.bf16.mxu0 %v5382_v3  ;;  %v3439_v25 = vpack.c.bf16 %v862_v10, %v861_v8  ;;  %v4131_v8 = vld [vmem:[%s3767_s30 + $0xa8] sm:$0xff] }
  0x37   : > { %3425 = vmatpush1.bf16.msra.mxu1 %v3424_v15  ;;  %3138 = vmatprep.mubr.f32.mxu1 %v3914_v16  ;;  %v3383_v15 = vpack.c.bf16 %v2739_v4, %v2738_v2  ;;  %v636_v4 = vrot.slane %v3786_v28, 7  ;;  %v4158_v31 = vrot.slane %v4131_v8, 1 }
  0x38   : > { %3426 = vmatprep.subr.bf16.mxu1 %v5382_v3 }
  0x39   : > { %3372 = vmatpush1.bf16.msra.mxu0 %v3371_v21  ;;  %v2741_v21 = vld [vmem:[%s5377_s2 + $0x278] sm:$0xff]  ;;  %5443 = vst [vmem:[#allocation19_spill] sm:$0xff] %v4158_v31  ;;  %v4163_v33 = vsel %vm631_vm1, %v4105_v51, %v636_v4  ;;  %v870_v4 = vld [vmem:[%s5377_s2 + $0xa8] sm:$0xff] }
  0x3a   : > { %3139 = vmatmul.mubr.msk.f32.gmra.mrb[4].mxu1 %vm740_vm0, %v3893_v9  ;;  %3373 = vmatprep.subr.bf16.mxu0 %v5382_v3  ;;  %v3386_v40 = vpack.c.bf16 %v2741_v21, %v2740_v19  ;;  %v886_v19 = vld [vmem:[%s5377_s2 + $0x128] sm:$0xff] }
  0x3b   : > { %3428 = vmatpush1.bf16.msra.mxu1 %v3427_v27  ;;  %3141 = vmatprep.mubr.f32.mxu1 %v3945_v29  ;;  %v882_v27 = vld [vmem:[%s5377_s2 + $0x108] sm:$0xff] }
  0x3c   : > { %3429 = vmatprep.subr.bf16.mxu1 %v5382_v3  ;;  %v3468_v44 = vpack.c.bf16 %v882_v27, %v881_v26  ;;  %v868_v26 = vld [vmem:[%s5377_s2 + $0x98] sm:$0xff] }
  0x3d   : > { %3375 = vmatpush1.bf16.msra.mxu0 %v3374_v36  ;;  %v768_v36 = vrot.slane %v4051_v17, 1 }
  0x3e   : > { %3142 = vmatmul.mubr.msk.f32.gmra.mrb[6].mxu1 %vm740_vm0, %v3924_v20  ;;  %3376 = vmatprep.subr.bf16.mxu0 %v5382_v3 }
  0x3f   : > { %3431 = vmatpush1.bf16.msra.mxu1 %v3430_v41  ;;  %3144 = vmatprep.mubr.f32.mxu1 %v3976_v42  ;;  %v4088_v41 = vld [vmem:[%s3767_s30 + $0x90] sm:$0xff] }
  0x40   : > { %3432 = vmatprep.subr.bf16.mxu1 %v5382_v3  ;;  %v771_v58 = vrot.slane %v4088_v41, 1  ;;  %v895_v42 = vld [vmem:[%s5377_s2 + $0x170] sm:$0xff] }
  0x41   : > { %3378 = vmatpush1.bf16.msra.mxu0 %v3377_v47  ;;  %v883_v47 = vld [vmem:[%s5377_s2 + $0x110] sm:$0xff] }
  0x42   : > { %3145 = vmatmul.mubr.msk.f32.gmra.mrb[8].mxu1 %vm740_vm0, %v3955_v35  ;;  %3379 = vmatprep.subr.bf16.mxu0 %v5382_v3  ;;  %v3472_v10 = vpack.c.bf16 %v884_v50, %v883_v47  ;;  %v887_v50 = vld [vmem:[%s5377_s2 + $0x130] sm:$0xff] }
  0x43   : > { %3434 = vmatpush1.bf16.msra.mxu1 %v3433_v52  ;;  %3147 = vmatprep.mubr.f32.mxu1 %v4007_v53  ;;  %v4109_v52 = vsel %vm740_vm0, %v768_v36, %v4085_v39  ;;  %v4166_v36 = vld [vmem:[%s3767_s30 + $0xb0] sm:$0xff]  ;;  %v894_v53 = vld [vmem:[%s5377_s2 + $0x168] sm:$0xff] }
  0x44   : > { %3435 = vmatprep.subr.bf16.mxu1 %v5382_v3  ;;  %5438 = vst [vmem:[#allocation16_spill] sm:$0xff] %v4109_v52 }
  0x45   : > { %3381 = vmatpush1.bf16.msra.mxu0 %v3380_v60  ;;  %v4119_v60 = vrot.slane %v4091_v43, 1 }
  0x46   : > { %3148 = vmatmul.mubr.msk.f32.gmra.mrb[10].mxu1 %vm740_vm0, %v3986_v46  ;;  %3382 = vmatprep.subr.bf16.mxu0 %v5382_v3  ;;  %v893_v46 = vld [vmem:[%s5377_s2 + $0x160] sm:$0xff] }
  0x47   : > { %3437 = vmatpush1.bf16.msra.mxu1 %v3436_v6  ;;  %3150 = vmatprep.mubr.f32.mxu1 %v4038_v7  ;;  %5439 = vst [vmem:[#allocation17_spill] sm:$0xff] %v4119_v60  ;;  %v4128_v6 = vld [vmem:[%s3767_s30 + $0xa0] sm:$0xff]  ;;  %v4148_v21 = vsel %vm740_vm0, %v771_v58, %v4119_v60 }
  0x48   : > { %3438 = vmatprep.subr.bf16.mxu1 %v5382_v3  ;;  %5442 = vst [vmem:[#allocation18_spill] sm:$0xff] %v4148_v21  ;;  %v774_v27 = vrot.slane %v4128_v6, 1  ;;  %v869_v58 = vld [vmem:[%s5377_s2 + $0xa0] sm:$0xff] }
  0x49   : > { %3384 = vmatpush1.bf16.msra.mxu0 %v3383_v15  ;;  %v885_v15 = vld [vmem:[%s5377_s2 + $0x120] sm:$0xff] }
  0x4a   : > { %3151 = vmatmul.mubr.msk.f32.gmra.mrb[12].mxu1 %vm740_vm0, %v4017_v59  ;;  %3385 = vmatprep.subr.bf16.mxu0 %v5382_v3  ;;  %v4187_v57 = vsel %vm740_vm0, %v774_v27, %v4158_v31  ;;  %v3480_v27 = vpack.c.bf16 %v888_v56, %v887_v50  ;;  %v871_v50 = vld [vmem:[%s5377_s2 + $0xb0] sm:$0xff]  ;;  %v872_v56 = vld [vmem:[%s5377_s2 + $0xb8] sm:$0xff] }
  0x4b   : > { %3440 = vmatpush1.bf16.msra.mxu1 %v3439_v25  ;;  %3153 = vmatprep.mubr.f32.mxu1 %v4075_v30  ;;  %v867_v25 = vld [vmem:[%s5377_s2 + $0x90] sm:$0xff]  ;;  %5444 = vst [vmem:[#allocation20_spill] sm:$0xff] %v4187_v57  ;;  %v892_v30 = vld [vmem:[%s5377_s2 + $0x158] sm:$0xff] }
  0x4c   : > { %3441 = vmatprep.subr.bf16.mxu1 %v5382_v3  ;;  %v3448_v47 = vpack.c.bf16 %v868_v26, %v867_v25  ;;  %v4202_v25 = vld [vmem:[%s3767_s30 + $0xc0] sm:$0xff]  ;;  %v4205_v26 = vld [vmem:[%s3767_s30 + $0xc8] sm:$0xff] }
  0x4d   : > { %3387 = vmatpush1.bf16.msra.mxu0 %v3386_v40  ;;  %v4169_v40 = vld [vmem:[%s3767_s30 + $0xb8] sm:$0xff] }
  0x4e   : > { %3154 = vmatmul.mubr.msk.f32.gmra.mrb[14].mxu1 %vm740_vm0, %v4048_v14  ;;  %3469 = vmatprep.subr.bf16.mxu0 %v3468_v44  ;;  %v3454_v14 = vpack.c.bf16 %v872_v56, %v871_v50 }
  0x4f   : > { %3443 = vmatpush1.bf16.msra.mxu1 %v3442_v45  ;;  %3156 = vmatprep.mubr.f32.mxu1 %v4109_v52  ;;  %v3476_v45 = vpack.c.bf16 %v886_v19, %v885_v15  ;;  %v4197_v15 = vrot.slane %v4169_v40, 1  ;;  %v639_v19 = vrot.slane %v3848_v55, 7 }
  0x50   : > { %2759 = vmatmul.mubr.msk.f32.vlgmr.msra.gmra.mrb[0].mxu0 %vm4122_vm2, %v4105_v51  ;;  %3444 = vmatprep.subr.bf16.mxu1 %v5382_v3 }
  0x51   : > { %1015 = vmatprep.mubr.f32.mxu0 %v3786_v28  ;;  %3471 = vmatpush3.bf16.msra.mxu0 %v3468_v44  ;;  %v4183_v44 = vrot.slane %v3845_v54, 7  ;;  %5445 = vst [vmem:[#allocation21_spill] sm:$0xff] %v4197_v15 }
  0x52   : > { %3157 = vmatmul.mubr.msk.f32.gmra.mrb[16].mxu1 %vm740_vm0, %v4085_v39  ;;  %3473 = vmatprep.subr.bf16.mxu0 %v3472_v10  ;;  %v890_v39 = vld [vmem:[%s5377_s2 + $0x148] sm:$0xff] }
  0x53   : > { %3446 = vmatpush1.bf16.msra.mxu1 %v3445_v13  ;;  %3159 = vmatprep.mubr.f32.mxu1 %v4148_v21  ;;  %v777_v13 = vrot.slane %v4166_v36, 1  ;;  %v889_v21 = vld [vmem:[%s5377_s2 + $0x140] sm:$0xff] }
  0x54   : > { %1016 = vmatmul.mubr.f32.gmra.mrb[2].mxu0 %v4163_v33  ;;  %3447 = vmatprep.subr.bf16.mxu1 %v5382_v3  ;;  %v3451_v3 = vpack.c.bf16 %v870_v4, %v869_v58  ;;  %v780_v58 = vrot.slane %v4202_v25, 1  ;;  %v4232_v4 = vrot.slane %v4205_v26, 1  ;;  %v3484_v52 = vpack.c.bf16 %v890_v39, %v889_v21  ;;  %v873_v21 = vld [vmem:[%s5377_s2 + $0xc0] sm:$0xff] }
  0x55   : > { %1020 = vmatprep.mubr.f32.mxu0 %v3845_v54  ;;  %3475 = vmatpush3.bf16.msra.mxu0 %v3472_v10  ;;  %v5446_v10 = vmov 0.0|0.0   ;;  %v4257_v39 = vrot.slane %v3868_v63, 7 }
  0x56   : > { %3160 = vmatmul.mubr.msk.f32.gmra.mrb[18].mxu1 %vm740_vm0, %v4119_v60  ;;  %3477 = vmatprep.subr.bf16.mxu0 %v3476_v45  ;;  %5448 = vst [vmem:[#allocation23_spill] sm:$0xff] %v4232_v4  ;;  %v4243_v60 = vld [vmem:[%s3767_s30 + $0xd8] sm:$0xff] }
  0x57   : > { %3449 = vmatpush1.bf16.msra.mxu1 %v3448_v47  ;;  %3162 = vmatprep.mubr.f32.mxu1 %v4187_v57  ;;  %v4222_v47 = vsel %vm740_vm0, %v777_v13, %v4197_v15  ;;  %v4237_v57 = vsel %vm631_vm1, %v4183_v44, %v639_v19  ;;  %v4240_v13 = vld [vmem:[%s3767_s30 + $0xd0] sm:$0xff]  ;;  %v4271_v56 = vrot.slane %v4243_v60, 1 }
  0x58   : > { %2761 = vmatmul.mubr.msk.f32.gmra.mrb[4].mxu0 %vm4122_vm2, %v4183_v44  ;;  %3450 = vmatprep.subr.bf16.mxu1 %v5446_v10  ;;  %5447 = vst [vmem:[#allocation22_spill] sm:$0xff] %v4222_v47  ;;  %v891_v19 = vld [vmem:[%s5377_s2 + $0x150] sm:$0xff]  ;;  %v783_v50 = vrot.slane %v4240_v13, 1 }
  0x59   : > { %1025 = vmatprep.mubr.f32.mxu0 %v3848_v55  ;;  %3479 = vmatpush3.bf16.msra.mxu0 %v3476_v45  ;;  %v874_v45 = vld [vmem:[%s5377_s2 + $0xc8] sm:$0xff]  ;;  %v3488_v59 = vpack.c.bf16 %v892_v30, %v891_v19  ;;  %v875_v30 = vld [vmem:[%s5377_s2 + $0xd0] sm:$0xff] }
  0x5a   : > { %3163 = vmatmul.mubr.msk.f32.gmra.mrb[20].mxu1 %vm740_vm0, %v4158_v31  ;;  %3481 = vmatprep.subr.bf16.mxu0 %v3480_v27  ;;  %v4276_v31 = vld [vmem:[%s3767_s30 + $0xe0] sm:$0xff]  ;;  %v3457_v7 = vpack.c.bf16 %v874_v45, %v873_v21 }
  0x5b   : > { %3452 = vmatpush1.bf16.msra.mxu1 %v3451_v3  ;;  %3165 = vmatprep.mubr.f32.mxu1 %v4222_v47  ;;  %v4261_v3 = vsel %vm740_vm0, %v780_v58, %v4232_v4  ;;  %v642_v47 = vrot.slane %v3871_v0, 7  ;;  %v4279_v58 = vld [vmem:[%s3767_s30 + $0xe8] sm:$0xff]  ;;  %v786_v19 = vrot.slane %v4276_v31, 1 }
  0x5c   : > { %1026 = vmatmul.mubr.f32.gmra.mrb[6].mxu0 %v4237_v57  ;;  %3453 = vmatprep.subr.bf16.mxu1 %v5446_v10  ;;  %5449 = vst [vmem:[#allocation24_spill] sm:$0xff] %v4261_v3  ;;  %v4306_v21 = vrot.slane %v4279_v58, 1 }
  0x5d   : > { %1030 = vmatprep.mubr.f32.mxu0 %v3868_v63  ;;  %3483 = vmatpush3.bf16.msra.mxu0 %v3480_v27  ;;  %v876_v27 = vld [vmem:[%s5377_s2 + $0xd8] sm:$0xff]  ;;  %v4311_v45 = vsel %vm631_vm1, %v4257_v39, %v642_v47 }
  0x5e   : > { %3166 = vmatmul.mubr.msk.f32.gmra.mrb[22].mxu1 %vm740_vm0, %v4197_v15  ;;  %3485 = vmatprep.subr.bf16.mxu0 %v3484_v52  ;;  %5451 = vst [vmem:[#allocation26_spill] sm:$0xff] %v4306_v21  ;;  %v3492_v15 = vpack.c.bf16 %v894_v53, %v893_v46  ;;  %v3460_v35 = vpack.c.bf16 %v876_v27, %v875_v30  ;;  %v896_v47 = vld [vmem:[%s5377_s2 + $0x178] sm:$0xff]  ;;  %v877_v53 = vld [vmem:[%s5377_s2 + $0xe0] sm:$0xff] }
  0x5f   : > { %3455 = vmatpush1.bf16.msra.mxu1 %v3454_v14  ;;  %3168 = vmatprep.mubr.f32.mxu1 %v4261_v3  ;;  %v4296_v14 = vsel %vm740_vm0, %v783_v50, %v4271_v56  ;;  %v4314_v50 = vld [vmem:[%s3767_s30 + $0xf0] sm:$0xff]  ;;  %v4317_v3 = vld [vmem:[%s3767_s30 + $0xf8] sm:$0xff]  ;;  %v4335_v46 = vsel %vm740_vm0, %v786_v19, %v4306_v21  ;;  %v3496_v19 = vpack.c.bf16 %v896_v47, %v895_v42 }
  0x60   : > { %2763 = vmatmul.mubr.msk.f32.gmra.mrb[8].mxu0 %vm4122_vm2, %v4257_v39  ;;  %3456 = vmatprep.subr.bf16.mxu1 %v5446_v10  ;;  %5450 = vst [vmem:[#allocation25_spill] sm:$0xff] %v4296_v14  ;;  %v789_v30 = vrot.slane %v4314_v50, 1  ;;  %v4345_v27 = vrot.slane %v4317_v3, 1 }
  0x61   : > { %1035 = vmatprep.mubr.f32.mxu0 %v3871_v0  ;;  %3487 = vmatpush3.bf16.msra.mxu0 %v3484_v52  ;;  %v4331_v52 = vrot.slane %v3896_v11, 7 }
  0x62   : > { %3169 = vmatmul.mubr.msk.f32.gmra.mrb[24].mxu1 %vm740_vm0, %v4232_v4  ;;  %3489 = vmatprep.subr.bf16.mxu0 %v3488_v59  ;;  %5452 = vst [vmem:[#allocation27_spill] sm:$0xff] %v4345_v27  ;;  %v4358_v20 = vsel %vm740_vm0, %v789_v30, %v4345_v27 }
  0x63   : > { %3458 = vmatpush1.bf16.msra.mxu1 %v3457_v7  ;;  %3171 = vmatprep.mubr.f32.mxu1 %v4296_v14  ;;  %v878_v7 = vld [vmem:[%s5377_s2 + $0xe8] sm:$0xff]  ;;  %v645_v14 = vrot.slane %v3899_v12, 7  ;;  %5453 = vst [vmem:[#allocation28_spill] sm:$0xff] %v4358_v20 }
  0x64   : > { %1036 = vmatmul.mubr.f32.gmra.mrb[10].mxu0 %v4311_v45  ;;  %3459 = vmatprep.subr.bf16.mxu1 %v5446_v10  ;;  %v3463_v4 = vpack.c.bf16 %v878_v7, %v877_v53  ;;  %v4377_v53 = vrot.slane %v3927_v22, 7  ;;  %v3661_v7 = vmov 0.0  }
  0x65   : > { %1040 = vmatprep.mubr.f32.mxu0 %v3896_v11  ;;  %3491 = vmatpush3.bf16.msra.mxu0 %v3488_v59  ;;  %v879_v59 = vld [vmem:[%s5377_s2 + $0xf0] sm:$0xff]  ;;  %v4369_v42 = vsel %vm631_vm1, %v4331_v52, %v645_v14  ;;  %v2854_v14 = vld [vmem:[%s5377_s2 + $0x300] sm:$0xff]  ;;  %v4390_v30 = vrot.slane %v3661_v7, 7 }
  0x66   : > { %3172 = vmatmul.mubr.msk.f32.gmra.mrb[26].mxu1 %vm740_vm0, %v4271_v56  ;;  %3493 = vmatprep.subr.bf16.mxu0 %v3492_v15 }
  0x67   : > { %3461 = vmatpush1.bf16.msra.mxu1 %v3460_v35  ;;  %3174 = vmatprep.mubr.f32.mxu1 %v4335_v46  ;;  %v880_v35 = vld [vmem:[%s5377_s2 + $0xf8] sm:$0xff] }
  0x68   : > { %2765 = vmatmul.mubr.msk.f32.gmra.mrb[12].mxu0 %vm4122_vm2, %v4331_v52  ;;  %3462 = vmatprep.subr.bf16.mxu1 %v5446_v10  ;;  %v3466_v47 = vpack.c.bf16 %v880_v35, %v879_v59  ;;  %v2886_v59 = vld [vmem:[%s5377_s2 + $0x400] sm:$0xff]  ;;  %v2887_v35 = vld [vmem:[%s5377_s2 + $0x408] sm:$0xff] }
  0x69   : > { %1045 = vmatprep.mubr.f32.mxu0 %v3899_v12  ;;  %3495 = vmatpush3.bf16.msra.mxu0 %v3492_v15  ;;  %v2855_v15 = vld [vmem:[%s5377_s2 + $0x308] sm:$0xff] }
  0x6a   : > { %3175 = vmatmul.mubr.msk.f32.gmra.mrb[28].mxu1 %vm740_vm0, %v4306_v21  ;;  %3497 = vmatprep.subr.bf16.mxu0 %v3496_v19  ;;  %v2857_v21 = vld [vmem:[%s5377_s2 + $0x318] sm:$0xff] }
  0x6b   : > { %3464 = vmatpush1.bf16.msra.mxu1 %v3463_v4  ;;  %3177 = vmatprep.mubr.f32.mxu1 %v4358_v20  ;;  %v648_v4 = vrot.slane %v3930_v23, 7  ;;  %v3501_v20 = vpack.c.bf16 %v2855_v15, %v2854_v14  ;;  %v4423_v15 = vrot.slane %v3958_v37, 7 }
  0x6c   : > { %1046 = vmatmul.mubr.f32.gmra.mrb[14].mxu0 %v4369_v42  ;;  %3465 = vmatprep.subr.bf16.mxu1 %v5446_v10 }
  0x6d   : > { %1050 = vmatprep.mubr.f32.mxu0 %v3927_v22  ;;  %3499 = vmatpush3.bf16.msra.mxu0 %v3496_v19  ;;  %v4399_v19 = vpack.c.bf16 %v2887_v35, %v2886_v59  ;;  %v2859_v59 = vld [vmem:[%s5377_s2 + $0x328] sm:$0xff]  ;;  %v2861_v35 = vld [vmem:[%s5377_s2 + $0x338] sm:$0xff] }
  0x6e   : > { %3178 = vmatmul.mubr.msk.f32.gmra.mrb[30].mxu1 %vm740_vm0, %v4345_v27  ;;  %v2856_v27 = vld [vmem:[%s5377_s2 + $0x310] sm:$0xff] }
  0x6f   : > { %3467 = vmatpush1.bf16.msra.mxu1 %v3466_v47  ;;  %1460 = vmatprep.mubr.f32.mxu1 %v3661_v7  ;;  %v4414_v47 = vsel %vm631_vm1, %v4377_v53, %v648_v4  ;;  %v3504_v14 = vpack.c.bf16 %v2857_v21, %v2856_v27  ;;  %v2858_v4 = vld [vmem:[%s5377_s2 + $0x320] sm:$0xff]  ;;  %v2860_v27 = vld [vmem:[%s5377_s2 + $0x330] sm:$0xff] }
  0x70   : > { %2767 = vmatmul.mubr.msk.f32.gmra.mrb[16].mxu0 %vm4122_vm2, %v4377_v53  ;;  %3500 = vmatprep.subr.bf16.mxu1 %v5446_v10  ;;  %v3507_v21 = vpack.c.bf16 %v2859_v59, %v2858_v4  ;;  %v4457_v4 = vrot.slane %v3989_v48, 7  ;;  %v2862_v59 = vld [vmem:[%s5377_s2 + $0x340] sm:$0xff] }
  0x71   : > { %1055 = vmatprep.mubr.f32.mxu0 %v3930_v23  ;;  %3549 = vmatprep.subr.bf16.mxu0 %v4399_v19 }
  0x72   : > { %2807 = vmatmul.mubr.msk.f32.vlgmr.msra.gmra.mrb[32].mxu1 %vm4122_vm2, %v4390_v30 }
  0x73   : > { %3502 = vmatpush1.bf16.msra.mxu1 %v3501_v20  ;;  %1465 = vmatprep.mubr.f32.mxu1 %v3661_v7  ;;  %v651_v20 = vrot.slane %v3961_v38, 7 }
  0x74   : > { %1056 = vmatmul.mubr.f32.gmra.mrb[18].mxu0 %v4414_v47  ;;  %3503 = vmatprep.subr.bf16.mxu1 %v5446_v10 }
  0x75   : > { %1060 = vmatprep.mubr.f32.mxu0 %v3958_v37 }
  0x76   : > { %1466 = vmatmul.mubr.f32.gmra.mrb[34].mxu1 %v4390_v30 }
  0x77   : > { %1470 = vmatprep.mubr.f32.mxu1 %v3777_v24  ;;  %3505 = vmatpush1.bf16.msra.mxu1 %v3504_v14  ;;  %v4449_v24 = vsel %vm631_vm1, %v4423_v15, %v651_v20  ;;  %v3510_v14 = vpack.c.bf16 %v2861_v35, %v2860_v27  ;;  %v2863_v20 = vld [vmem:[%s5377_s2 + $0x348] sm:$0xff]  ;;  %v2865_v27 = vld [vmem:[%s5377_s2 + $0x358] sm:$0xff]  ;;  %v4491_v35 = vrot.slane %v4020_v62, 7 }
  0x78   : > { %2769 = vmatmul.mubr.msk.f32.gmra.mrb[20].mxu0 %vm4122_vm2, %v4423_v15  ;;  %3506 = vmatprep.subr.bf16.mxu1 %v5446_v10 }
  0x79   : > { %1065 = vmatprep.mubr.f32.mxu0 %v3961_v38 }
  0x7a   : > { %2809 = vmatmul.mubr.msk.f32.gmra.mrb[36].mxu1 %vm4122_vm2, %v4105_v51  ;;  %v3513_v51 = vpack.c.bf16 %v2863_v20, %v2862_v59  ;;  %v2867_v59 = vld [vmem:[%s5377_s2 + $0x368] sm:$0xff] }
  0x7b   : > { %1475 = vmatprep.mubr.f32.mxu1 %v3786_v28  ;;  %3508 = vmatpush1.bf16.msra.mxu1 %v3507_v21  ;;  %v654_v28 = vrot.slane %v3992_v49, 7  ;;  %v2864_v21 = vld [vmem:[%s5377_s2 + $0x350] sm:$0xff] }
  0x7c   : > { %1066 = vmatmul.mubr.f32.gmra.mrb[22].mxu0 %v4449_v24  ;;  %3509 = vmatprep.subr.bf16.mxu1 %v5446_v10 }
  0x7d   : > { %1070 = vmatprep.mubr.f32.mxu0 %v3989_v48 }
  0x7e   : > { %1476 = vmatmul.mubr.f32.gmra.mrb[38].mxu1 %v4163_v33  ;;  %v3516_v33 = vpack.c.bf16 %v2865_v27, %v2864_v21  ;;  %v4525_v27 = vrot.slane %v4051_v17, 7 }
  0x7f   : > { %1480 = vmatprep.mubr.f32.mxu1 %v3845_v54  ;;  %3511 = vmatpush1.bf16.msra.mxu1 %v3510_v14  ;;  %v4483_v54 = vsel %vm631_vm1, %v4457_v4, %v654_v28  ;;  %v2866_v14 = vld [vmem:[%s5377_s2 + $0x360] sm:$0xff]  ;;  %v2868_v28 = vld [vmem:[%s5377_s2 + $0x370] sm:$0xff] }
  0x80   : > { %2771 = vmatmul.mubr.msk.f32.gmra.mrb[24].mxu0 %vm4122_vm2, %v4457_v4  ;;  %3512 = vmatprep.subr.bf16.mxu1 %v5446_v10  ;;  %v3519_v20 = vpack.c.bf16 %v2867_v59, %v2866_v14  ;;  %v2871_v14 = vld [vmem:[%s5377_s2 + $0x388] sm:$0xff] }
  0x81   : > { %1075 = vmatprep.mubr.f32.mxu0 %v3992_v49 }
  0x82   : > { %2811 = vmatmul.mubr.msk.f32.gmra.mrb[40].mxu1 %vm4122_vm2, %v4183_v44 }
  0x83   : > { %1485 = vmatprep.mubr.f32.mxu1 %v3848_v55  ;;  %3514 = vmatpush1.bf16.msra.mxu1 %v3513_v51  ;;  %v657_v55 = vrot.slane %v4023_v1, 7  ;;  %v2869_v51 = vld [vmem:[%s5377_s2 + $0x378] sm:$0xff] }
  0x84   : > { %1076 = vmatmul.mubr.f32.gmra.mrb[26].mxu0 %v4483_v54  ;;  %3515 = vmatprep.subr.bf16.mxu1 %v5446_v10  ;;  %v3522_v21 = vpack.c.bf16 %v2869_v51, %v2868_v28  ;;  %v4559_v51 = vrot.slane %v4088_v41, 7 }
  0x85   : > { %1080 = vmatprep.mubr.f32.mxu0 %v4020_v62 }
  0x86   : > { %1486 = vmatmul.mubr.f32.gmra.mrb[42].mxu1 %v4237_v57 }
  0x87   : > { %1490 = vmatprep.mubr.f32.mxu1 %v3868_v63  ;;  %3517 = vmatpush1.bf16.msra.mxu1 %v3516_v33  ;;  %v4517_v63 = vsel %vm631_vm1, %v4491_v35, %v657_v55  ;;  %v2870_v33 = vld [vmem:[%s5377_s2 + $0x380] sm:$0xff]  ;;  %v2872_v55 = vld [vmem:[%s5377_s2 + $0x390] sm:$0xff] }
  0x88   : > { %2773 = vmatmul.mubr.msk.f32.gmra.mrb[28].mxu0 %vm4122_vm2, %v4491_v35  ;;  %3518 = vmatprep.subr.bf16.mxu1 %v5446_v10  ;;  %v3525_v59 = vpack.c.bf16 %v2871_v14, %v2870_v33  ;;  %v2875_v33 = vld [vmem:[%s5377_s2 + $0x3a8] sm:$0xff] }
  0x89   : > { %1085 = vmatprep.mubr.f32.mxu0 %v4023_v1 }
  0x8a   : > { %2813 = vmatmul.mubr.msk.f32.gmra.mrb[44].mxu1 %vm4122_vm2, %v4257_v39 }
  0x8b   : > { %1495 = vmatprep.mubr.f32.mxu1 %v3871_v0  ;;  %3520 = vmatpush1.bf16.msra.mxu1 %v3519_v20  ;;  %v660_v0 = vrot.slane %v4054_v18, 7  ;;  %v2873_v20 = vld [vmem:[%s5377_s2 + $0x398] sm:$0xff] }
  0x8c   : > { %1086 = vmatmul.mubr.f32.gmra.mrb[30].mxu0 %v4517_v63  ;;  %3521 = vmatprep.subr.bf16.mxu1 %v5446_v10  ;;  %v3528_v28 = vpack.c.bf16 %v2873_v20, %v2872_v55  ;;  %v4593_v20 = vrot.slane %v4128_v6, 7 }
  0x8d   : > { %1090 = vmatprep.mubr.f32.mxu0 %v4051_v17 }
  0x8e   : > { %1496 = vmatmul.mubr.f32.gmra.mrb[46].mxu1 %v4311_v45 }
  0x8f   : > { %1500 = vmatprep.mubr.f32.mxu1 %v3896_v11  ;;  %3523 = vmatpush1.bf16.msra.mxu1 %v3522_v21  ;;  %v4551_v11 = vsel %vm631_vm1, %v4525_v27, %v660_v0  ;;  %v2874_v21 = vld [vmem:[%s5377_s2 + $0x3a0] sm:$0xff]  ;;  %v2876_v0 = vld [vmem:[%s5377_s2 + $0x3b0] sm:$0xff] }
  0x90   : > { %2775 = vmatmul.mubr.msk.f32.gmra.mrb[32].mxu0 %vm4122_vm2, %v4525_v27  ;;  %3524 = vmatprep.subr.bf16.mxu1 %v5446_v10  ;;  %v3531_v14 = vpack.c.bf16 %v2875_v33, %v2874_v21  ;;  %v2879_v21 = vld [vmem:[%s5377_s2 + $0x3c8] sm:$0xff] }
  0x91   : > { %1095 = vmatprep.mubr.f32.mxu0 %v4054_v18 }
  0x92   : > { %2815 = vmatmul.mubr.msk.f32.gmra.mrb[48].mxu1 %vm4122_vm2, %v4331_v52 }
  0x93   : > { %1505 = vmatprep.mubr.f32.mxu1 %v3899_v12  ;;  %3526 = vmatpush1.bf16.msra.mxu1 %v3525_v59  ;;  %v663_v12 = vrot.slane %v4091_v43, 7  ;;  %v2877_v59 = vld [vmem:[%s5377_s2 + $0x3b8] sm:$0xff] }
  0x94   : > { %1096 = vmatmul.mubr.f32.gmra.mrb[34].mxu0 %v4551_v11  ;;  %3527 = vmatprep.subr.bf16.mxu1 %v5446_v10  ;;  %v3534_v55 = vpack.c.bf16 %v2877_v59, %v2876_v0  ;;  %v4627_v59 = vrot.slane %v4166_v36, 7 }
  0x95   : > { %1100 = vmatprep.mubr.f32.mxu0 %v4088_v41 }
  0x96   : > { %1506 = vmatmul.mubr.f32.gmra.mrb[50].mxu1 %v4369_v42 }
  0x97   : > { %1510 = vmatprep.mubr.f32.mxu1 %v3927_v22  ;;  %3529 = vmatpush1.bf16.msra.mxu1 %v3528_v28  ;;  %v4585_v22 = vsel %vm631_vm1, %v4559_v51, %v663_v12  ;;  %v2878_v28 = vld [vmem:[%s5377_s2 + $0x3c0] sm:$0xff]  ;;  %v2880_v12 = vld [vmem:[%s5377_s2 + $0x3d0] sm:$0xff] }
  0x98   : > { %2777 = vmatmul.mubr.msk.f32.gmra.mrb[36].mxu0 %vm4122_vm2, %v4559_v51  ;;  %3530 = vmatprep.subr.bf16.mxu1 %v5446_v10  ;;  %v3537_v33 = vpack.c.bf16 %v2879_v21, %v2878_v28  ;;  %v2883_v28 = vld [vmem:[%s5377_s2 + $0x3e8] sm:$0xff] }
  0x99   : > { %1105 = vmatprep.mubr.f32.mxu0 %v4091_v43 }
  0x9a   : > { %2817 = vmatmul.mubr.msk.f32.gmra.mrb[52].mxu1 %vm4122_vm2, %v4377_v53 }
  0x9b   : > { %1515 = vmatprep.mubr.f32.mxu1 %v3930_v23  ;;  %3532 = vmatpush1.bf16.msra.mxu1 %v3531_v14  ;;  %v666_v23 = vrot.slane %v4131_v8, 7  ;;  %v2881_v14 = vld [vmem:[%s5377_s2 + $0x3d8] sm:$0xff] }
  0x9c   : > { %1106 = vmatmul.mubr.f32.gmra.mrb[38].mxu0 %v4585_v22  ;;  %3533 = vmatprep.subr.bf16.mxu1 %v5446_v10  ;;  %v3540_v0 = vpack.c.bf16 %v2881_v14, %v2880_v12  ;;  %v4661_v14 = vrot.slane %v4202_v25, 7 }
  0x9d   : > { %1110 = vmatprep.mubr.f32.mxu0 %v4128_v6 }
  0x9e   : > { %1516 = vmatmul.mubr.f32.gmra.mrb[54].mxu1 %v4414_v47 }
  0x9f   : > { %1520 = vmatprep.mubr.f32.mxu1 %v3958_v37  ;;  %3535 = vmatpush1.bf16.msra.mxu1 %v3534_v55  ;;  %v4619_v37 = vsel %vm631_vm1, %v4593_v20, %v666_v23  ;;  %v2882_v55 = vld [vmem:[%s5377_s2 + $0x3e0] sm:$0xff]  ;;  %v2884_v23 = vld [vmem:[%s5377_s2 + $0x3f0] sm:$0xff] }
  0xa0   : > { %2779 = vmatmul.mubr.msk.f32.gmra.mrb[40].mxu0 %vm4122_vm2, %v4593_v20  ;;  %3536 = vmatprep.subr.bf16.mxu1 %v5446_v10  ;;  %v3543_v21 = vpack.c.bf16 %v2883_v28, %v2882_v55  ;;  %v678_v55 = vrot.slane %v4279_v58, 7  ;;  %v681_v28 = vrot.slane %v4317_v3, 7 }
  0xa1   : > { %1115 = vmatprep.mubr.f32.mxu0 %v4131_v8 }
  0xa2   : > { %2819 = vmatmul.mubr.msk.f32.gmra.mrb[56].mxu1 %vm4122_vm2, %v4423_v15 }
  0xa3   : > { %1525 = vmatprep.mubr.f32.mxu1 %v3961_v38  ;;  %3538 = vmatpush1.bf16.msra.mxu1 %v3537_v33  ;;  %v669_v38 = vrot.slane %v4169_v40, 7  ;;  %v2885_v33 = vld [vmem:[%s5377_s2 + $0x3f8] sm:$0xff] }
  0xa4   : > { %1116 = vmatmul.mubr.f32.gmra.mrb[42].mxu0 %v4619_v37  ;;  %3539 = vmatprep.subr.bf16.mxu1 %v5446_v10  ;;  %v3546_v12 = vpack.c.bf16 %v2885_v33, %v2884_v23  ;;  %v2892_v23 = vld [vmem:[%s5377_s2 + $0x430] sm:$0xff]  ;;  %v2893_v33 = vld [vmem:[%s5377_s2 + $0x438] sm:$0xff] }
  0xa5   : > { %1120 = vmatprep.mubr.f32.mxu0 %v4166_v36 }
  0xa6   : > { %1526 = vmatmul.mubr.f32.gmra.mrb[58].mxu1 %v4449_v24 }
  0xa7   : > { %1530 = vmatprep.mubr.f32.mxu1 %v3989_v48  ;;  %3541 = vmatpush1.bf16.msra.mxu1 %v3540_v0  ;;  %v4653_v48 = vsel %vm631_vm1, %v4627_v59, %v669_v38  ;;  %v672_v0 = vrot.slane %v4205_v26, 7  ;;  %v4737_v38 = vrot.slane %v3661_v7, 1 }
  0xa8   : > { %2781 = vmatmul.mubr.msk.f32.gmra.mrb[44].mxu0 %vm4122_vm2, %v4627_v59  ;;  %3542 = vmatprep.subr.bf16.mxu1 %v5446_v10 }
  0xa9   : > { %1125 = vmatprep.mubr.f32.mxu0 %v4169_v40 }
  0xaa   : > { %2821 = vmatmul.mubr.msk.f32.gmra.mrb[60].mxu1 %vm4122_vm2, %v4457_v4 }
  0xab   : > { %1535 = vmatprep.mubr.f32.mxu1 %v3992_v49  ;;  %3544 = vmatpush1.bf16.msra.mxu1 %v3543_v21  ;;  %v4674_v49 = vsel %vm631_vm1, %v4661_v14, %v672_v0  ;;  %v2891_v21 = vld [vmem:[%s5377_s2 + $0x428] sm:$0xff] }
  0xac   : > { %1126 = vmatmul.mubr.f32.gmra.mrb[46].mxu0 %v4653_v48  ;;  %3545 = vmatprep.subr.bf16.mxu1 %v5446_v10  ;;  %v675_v10 = vrot.slane %v4243_v60, 7 }
  0xad   : > { %1130 = vmatprep.mubr.f32.mxu0 %v4202_v25 }
  0xae   : > { %1536 = vmatmul.mubr.f32.gmra.mrb[62].mxu1 %v4483_v54 }
  0xaf   : > { %1540 = vmatprep.mubr.f32.mxu1 %v4020_v62  ;;  %3547 = vmatpush1.bf16.msra.mxu1 %v3546_v12  ;;  %v4682_v62 = vrot.slane %v4240_v13, 7  ;;  %v2897_v12 = vld [vmem:[%s5377_s2 + $0x458] sm:$0xff] }
  0xb0   : > { %2783 = vmatmul.mubr.msk.f32.gmra.mrb[48].mxu0 %vm4122_vm2, %v4661_v14 }
  0xb1   : > { %1135 = vmatprep.mubr.f32.mxu0 %v4205_v26 }
  0xb2   : > { %2823 = vmatmul.mubr.msk.f32.gmra.mrb[64].mxu1 %vm4122_vm2, %v4491_v35 }
  0xb3   : > { %1545 = vmatprep.mubr.f32.mxu1 %v4023_v1  ;;  %v4694_v1 = vsel %vm631_vm1, %v4682_v62, %v675_v10  ;;  %v2899_v10 = vld [vmem:[%s5377_s2 + $0x468] sm:$0xff] }
  0xb4   : > { %1136 = vmatmul.mubr.f32.gmra.mrb[50].mxu0 %v4674_v49 }
  0xb5   : > { %1140 = vmatprep.mubr.f32.mxu0 %v4240_v13 }
  0xb6   : > { %1546 = vmatmul.mubr.f32.gmra.mrb[66].mxu1 %v4517_v63 }
  0xb7   : > { %1550 = vmatprep.mubr.f32.mxu1 %v4051_v17  ;;  %v4702_v17 = vrot.slane %v4276_v31, 7 }
  0xb8   : > { %2785 = vmatmul.mubr.msk.f32.gmra.mrb[52].mxu0 %vm4122_vm2, %v4682_v62 }
  0xb9   : > { %1145 = vmatprep.mubr.f32.mxu0 %v4243_v60 }
  0xba   : > { %2825 = vmatmul.mubr.msk.f32.gmra.mrb[68].mxu1 %vm4122_vm2, %v4525_v27 }
  0xbb   : > { %1555 = vmatprep.mubr.f32.mxu1 %v4054_v18  ;;  %v4714_v18 = vsel %vm631_vm1, %v4702_v17, %v678_v55  ;;  %v5454_v55 = vld [vmem:[#allocation6_spill] sm:$0xff] }
  0xbc   : > { %1146 = vmatmul.mubr.f32.gmra.mrb[54].mxu0 %v4694_v1 }
  0xbd   : > { %1150 = vmatprep.mubr.f32.mxu0 %v4276_v31 }
  0xbe   : > { %1556 = vmatmul.mubr.f32.gmra.mrb[70].mxu1 %v4551_v11 }
  0xbf   : > { %1560 = vmatprep.mubr.f32.mxu1 %v4088_v41  ;;  %v4722_v41 = vrot.slane %v4314_v50, 7 }
  0xc0   : > { %2787 = vmatmul.mubr.msk.f32.gmra.mrb[56].mxu0 %vm4122_vm2, %v4702_v17 }
  0xc1   : > { %1155 = vmatprep.mubr.f32.mxu0 %v4279_v58 }
  0xc2   : > { %2827 = vmatmul.mubr.msk.f32.gmra.mrb[72].mxu1 %vm4122_vm2, %v4559_v51 }
  0xc3   : > { %1565 = vmatprep.mubr.f32.mxu1 %v4091_v43  ;;  %v4734_v43 = vsel %vm631_vm1, %v4722_v41, %v681_v28  ;;  %v5455_v28 = vld [vmem:[#allocation8_spill] sm:$0xff] }
  0xc4   : > { %1156 = vmatmul.mubr.f32.gmra.mrb[58].mxu0 %v4714_v18 }
  0xc5   : > { %1160 = vmatprep.mubr.f32.mxu0 %v4314_v50 }
  0xc6   : > { %1566 = vmatmul.mubr.f32.gmra.mrb[74].mxu1 %v4585_v22 }
  0xc7   : > { %1570 = vmatprep.mubr.f32.mxu1 %v4128_v6  ;;  %v2888_v6 = vld [vmem:[%s5377_s2 + $0x410] sm:$0xff] }
  0xc8   : > { %2789 = vmatmul.mubr.msk.f32.gmra.mrb[60].mxu0 %vm4122_vm2, %v4722_v41 }
  0xc9   : > { %1165 = vmatprep.mubr.f32.mxu0 %v4317_v3  ;;  %v2889_v3 = vld [vmem:[%s5377_s2 + $0x418] sm:$0xff] }
  0xca   : > { %2829 = vmatmul.mubr.msk.f32.gmra.mrb[76].mxu1 %vm4122_vm2, %v4593_v20  ;;  %v3552_v50 = vpack.c.bf16 %v2889_v3, %v2888_v6  ;;  %v2900_v6 = vld [vmem:[%s5377_s2 + $0x470] sm:$0xff]  ;;  %v2901_v3 = vld [vmem:[%s5377_s2 + $0x478] sm:$0xff] }
  0xcb   : > { %1575 = vmatprep.mubr.f32.mxu1 %v4131_v8  ;;  %v2890_v8 = vld [vmem:[%s5377_s2 + $0x420] sm:$0xff] }
  0xcc   : > { %1166 = vmatmul.mubr.f32.gmra.mrb[62].mxu0 %v4734_v43 }
  0xcd   : > { %3212 = vmatprep.mubr.f32.mxu0 %v4737_v38 }
  0xce   : > { %1576 = vmatmul.mubr.f32.gmra.mrb[78].mxu1 %v4619_v37 }
  0xcf   : > { %1580 = vmatprep.mubr.f32.mxu1 %v4166_v36  ;;  %v3556_v36 = vpack.c.bf16 %v2891_v21, %v2890_v8  ;;  %v5457_v8 = vld [vmem:[#allocation10_spill] sm:$0xff]  ;;  %v3576_v21 = vpack.c.bf16 %v2901_v3, %v2900_v6  ;;  %v5471_v6 = vld [vmem:[#allocation24_spill] sm:$0xff]  ;;  %v5472_v3 = vld [vmem:[#allocation23_spill] sm:$0xff] }
  0xd0   : > { %3213 = vmatmul.mubr.msk.f32.vlgmr.msra.gmra.mrb[64].mxu0 %vm740_vm0, %v4737_v38 }
  0xd1   : > { %3215 = vmatprep.mubr.f32.mxu0 %v3802_v34  ;;  %3551 = vmatpush3.bf16.msra.mxu0 %v4399_v19  ;;  %v3560_v34 = vpack.c.bf16 %v2893_v33, %v2892_v23  ;;  %v2895_v19 = vld [vmem:[%s5377_s2 + $0x448] sm:$0xff]  ;;  %v5461_v33 = vld [vmem:[#allocation14_spill] sm:$0xff] }
  0xd2   : > { %2831 = vmatmul.mubr.msk.f32.gmra.mrb[80].mxu1 %vm4122_vm2, %v4627_v59  ;;  %3553 = vmatprep.subr.bf16.mxu0 %v3552_v50  ;;  %v5460_v23 = vld [vmem:[#allocation11_spill] sm:$0xff] }
  0xd3   : > { %1585 = vmatprep.mubr.f32.mxu1 %v4169_v40  ;;  %v2894_v40 = vld [vmem:[%s5377_s2 + $0x440] sm:$0xff] }
  0xd4   : > { %3216 = vmatmul.mubr.msk.f32.gmra.mrb[66].mxu0 %vm740_vm0, %v3798_v32  ;;  %v3564_v32 = vpack.c.bf16 %v2895_v19, %v2894_v40  ;;  %v5463_v40 = vld [vmem:[#allocation16_spill] sm:$0xff]  ;;  %v5464_v19 = vld [vmem:[#allocation15_spill] sm:$0xff] }
  0xd5   : > { %3218 = vmatprep.mubr.f32.mxu0 %v3883_v5  ;;  %3555 = vmatpush3.bf16.msra.mxu0 %v3552_v50  ;;  %v5456_v50 = vld [vmem:[#allocation7_spill] sm:$0xff] }
  0xd6   : > { %1586 = vmatmul.mubr.f32.gmra.mrb[82].mxu1 %v4653_v48  ;;  %3557 = vmatprep.subr.bf16.mxu0 %v3556_v36 }
  0xd7   : > { %1590 = vmatprep.mubr.f32.mxu1 %v4202_v25  ;;  %v2896_v25 = vld [vmem:[%s5377_s2 + $0x450] sm:$0xff] }
  0xd8   : > { %3219 = vmatmul.mubr.msk.f32.gmra.mrb[68].mxu0 %vm740_vm0, %v3865_v61  ;;  %v3568_v0 = vpack.c.bf16 %v2897_v12, %v2896_v25  ;;  %v3608_v25 = vld [vmem:[%s3767_s30 + $0x20] sm:$0xff]  ;;  %v5466_v12 = vld [vmem:[#allocation17_spill] sm:$0xff] }
  0xd9   : > { %3221 = vmatprep.mubr.f32.mxu0 %v3914_v16  ;;  %3559 = vmatpush3.bf16.msra.mxu0 %v3556_v36  ;;  %v5459_v36 = vld [vmem:[#allocation12_spill] sm:$0xff] }
  0xda   : > { %2833 = vmatmul.mubr.msk.f32.gmra.mrb[84].mxu1 %vm4122_vm2, %v4661_v14  ;;  %3561 = vmatprep.subr.bf16.mxu0 %v3560_v34 }
  0xdb   : > { %1595 = vmatprep.mubr.f32.mxu1 %v4205_v26  ;;  %v2898_v26 = vld [vmem:[%s5377_s2 + $0x460] sm:$0xff] }
  0xdc   : > { %3222 = vmatmul.mubr.msk.f32.gmra.mrb[70].mxu0 %vm740_vm0, %v3893_v9 }
  0xdd   : > { %3224 = vmatprep.mubr.f32.mxu0 %v3945_v29  ;;  %3563 = vmatpush3.bf16.msra.mxu0 %v3560_v34  ;;  %v5462_v34 = vld [vmem:[#allocation13_spill] sm:$0xff] }
  0xde   : > { %1596 = vmatmul.mubr.f32.gmra.mrb[86].mxu1 %v4674_v49  ;;  %3565 = vmatprep.subr.bf16.mxu0 %v3564_v32 }
  0xdf   : > { %1600 = vmatprep.mubr.f32.mxu1 %v4240_v13  ;;  %v3572_v13 = vpack.c.bf16 %v2899_v10, %v2898_v26  ;;  %v5468_v26 = vld [vmem:[#allocation19_spill] sm:$0xff]  ;;  %v5469_v10 = vld [vmem:[#allocation22_spill] sm:$0xff] }
  0xe0   : > { %3225 = vmatmul.mubr.msk.f32.gmra.mrb[72].mxu0 %vm740_vm0, %v5454_v55 }
  0xe1   : > { %3227 = vmatprep.mubr.f32.mxu0 %v5455_v28  ;;  %3567 = vmatpush3.bf16.msra.mxu0 %v3564_v32  ;;  %v5465_v32 = vld [vmem:[#allocation18_spill] sm:$0xff] }
  0xe2   : > { %2835 = vmatmul.mubr.msk.f32.gmra.mrb[88].mxu1 %vm4122_vm2, %v4682_v62  ;;  %3569 = vmatprep.subr.bf16.mxu0 %v3568_v0 }
  0xe3   : > { %1605 = vmatprep.mubr.f32.mxu1 %v4243_v60  ;;  %v5458_v60 = vld [vmem:[#allocation9_spill] sm:$0xff] }
  0xe4   : > { %3228 = vmatmul.mubr.msk.f32.gmra.mrb[74].mxu0 %vm740_vm0, %v5456_v50 }
  0xe5   : > { %3230 = vmatprep.mubr.f32.mxu0 %v5457_v8  ;;  %3571 = vmatpush3.bf16.msra.mxu0 %v3568_v0  ;;  %v5467_v0 = vld [vmem:[#allocation20_spill] sm:$0xff] }
  0xe6   : > { %1606 = vmatmul.mubr.f32.gmra.mrb[90].mxu1 %v4694_v1  ;;  %3573 = vmatprep.subr.bf16.mxu0 %v3572_v13 }
  0xe7   : > { %1610 = vmatprep.mubr.f32.mxu1 %v4276_v31  ;;  %v3606_v31 = vld [vmem:[%s3767_s30 + $0x10] sm:$0xff] }
  0xe8   : > { %3231 = vmatmul.mubr.msk.f32.gmra.mrb[76].mxu0 %vm740_vm0, %v5458_v60 }
  0xe9   : > { %3233 = vmatprep.mubr.f32.mxu0 %v5459_v36  ;;  %3575 = vmatpush3.bf16.msra.mxu0 %v3572_v13  ;;  %v5470_v13 = vld [vmem:[#allocation21_spill] sm:$0xff] }
  0xea   : > { %2837 = vmatmul.mubr.msk.f32.gmra.mrb[92].mxu1 %vm4122_vm2, %v4702_v17  ;;  %3577 = vmatprep.subr.bf16.mxu0 %v3576_v21 }
  0xeb   : > { %1615 = vmatprep.mubr.f32.mxu1 %v4279_v58  ;;  %v3607_v58 = vld [vmem:[%s3767_s30 + $0x18] sm:$0xff] }
  0xec   : > { %3234 = vmatmul.mubr.msk.f32.gmra.mrb[78].mxu0 %vm740_vm0, %v5460_v23 }
  0xed   : > { %3236 = vmatprep.mubr.f32.mxu0 %v5461_v33  ;;  %3579 = vmatpush3.bf16.msra.mxu0 %v3576_v21 }
  0xee   : > { %1616 = vmatmul.mubr.f32.gmra.mrb[94].mxu1 %v4714_v18 }
  0xef   : > { %1959 = vmatprep.mubr.f32.mxu1 %v3606_v31 }
  0xf0   : > { %3237 = vmatmul.mubr.msk.f32.gmra.mrb[80].mxu0 %vm740_vm0, %v5462_v34 }
  0xf1   : > { %3239 = vmatprep.mubr.f32.mxu0 %v5463_v40 }
  0xf2   : > { %2903 = vmatmul.mubr.msk.f32.vlgmr.msra.gmra.mrb[96].mxu1 %vm4122_vm2, %v4183_v44  ;;  %v3609_v44 = vld [vmem:[%s3767_s30 + $0x28] sm:$0xff] }
  0xf3   : > { %1964 = vmatprep.mubr.f32.mxu1 %v3607_v58  ;;  %v3612_v58 = vld [vmem:[%s3767_s30 + $0x40] sm:$0xff] }
  0xf4   : > { %3240 = vmatmul.mubr.msk.f32.gmra.mrb[82].mxu0 %vm740_vm0, %v5464_v19 }
  0xf5   : > { %3242 = vmatprep.mubr.f32.mxu0 %v5465_v32 }
  0xf6   : > { %1965 = vmatmul.mubr.f32.gmra.mrb[98].mxu1 %v4237_v57  ;;  %v3610_v57 = vld [vmem:[%s3767_s30 + $0x30] sm:$0xff] }
  0xf7   : > { %1969 = vmatprep.mubr.f32.mxu1 %v3608_v25 }
  0xf8   : > { %3243 = vmatmul.mubr.msk.f32.gmra.mrb[84].mxu0 %vm740_vm0, %v5466_v12 }
  0xf9   : > { %3245 = vmatprep.mubr.f32.mxu0 %v5467_v0 }
  0xfa   : > { %2905 = vmatmul.mubr.msk.f32.gmra.mrb[100].mxu1 %vm4122_vm2, %v4257_v39  ;;  %v3611_v39 = vld [vmem:[%s3767_s30 + $0x38] sm:$0xff] }
  0xfb   : > { %1974 = vmatprep.mubr.f32.mxu1 %v3609_v44  ;;  %v3613_v44 = vld [vmem:[%s3767_s30 + $0x48] sm:$0xff] }
  0xfc   : > { %3246 = vmatmul.mubr.msk.f32.gmra.mrb[86].mxu0 %vm740_vm0, %v5468_v26 }
  0xfd   : > { %3248 = vmatprep.mubr.f32.mxu0 %v5469_v10 }
  0xfe   : > { %1975 = vmatmul.mubr.f32.gmra.mrb[102].mxu1 %v4311_v45  ;;  %v5473_v45 = vld [vmem:[#allocation25_spill] sm:$0xff] }
  0xff   : > { %1979 = vmatprep.mubr.f32.mxu1 %v3610_v57  ;;  %v5474_v57 = vld [vmem:[#allocation26_spill] sm:$0xff] }
 0x100   : > { %3249 = vmatmul.mubr.msk.f32.gmra.mrb[88].mxu0 %vm740_vm0, %v5470_v13 }
 0x101   : > { %3251 = vmatprep.mubr.f32.mxu0 %v5471_v6 }
 0x102   : > { %2907 = vmatmul.mubr.msk.f32.gmra.mrb[104].mxu1 %vm4122_vm2, %v4331_v52 }
 0x103   : > { %1984 = vmatprep.mubr.f32.mxu1 %v3611_v39 }
 0x104   : > { %3252 = vmatmul.mubr.msk.f32.gmra.mrb[90].mxu0 %vm740_vm0, %v5472_v3 }
 0x105   : > { %v4871_v21 = vpop.f32.mrb[0].mxu1  ;;  %3254 = vmatprep.mubr.f32.mxu0 %v5473_v45 }
 0x106   : > { %v1237_v31 = vpop.f32.mrb[1].mxu1  ;;  %1985 = vmatmul.mubr.f32.gmra.mrb[106].mxu1 %v4369_v42 }
 0x107   : > { %1989 = vmatprep.mubr.f32.mxu1 %v3612_v58  ;;  %v3614_v58 = vld [vmem:[%s3767_s30 + $0x50] sm:$0xff] }
 0x108   : > { %3255 = vmatmul.mubr.msk.f32.gmra.mrb[92].mxu0 %vm740_vm0, %v4271_v56 }
 0x109   : > { %v4878_v25 = vpop.f32.mrb[2].mxu1  ;;  %3257 = vmatprep.mubr.f32.mxu0 %v4335_v46 }
 0x10a   : > { %v4881_v52 = vpop.f32.mrb[3].mxu1  ;;  %2909 = vmatmul.mubr.msk.f32.gmra.mrb[108].mxu1 %vm4122_vm2, %v4377_v53 }
 0x10b   : > { %1994 = vmatprep.mubr.f32.mxu1 %v3613_v44 }
 0x10c   : > { %3258 = vmatmul.mubr.msk.f32.gmra.mrb[94].mxu0 %vm740_vm0, %v5474_v57 }
 0x10d   : > { %v4889_v42 = vpop.f32.mrb[4].mxu1  ;;  %3292 = vmatprep.mubr.f32.mxu0 %v3883_v5  ;;  %v3615_v5 = vld [vmem:[%s3767_s30 + $0x58] sm:$0xff] }
 0x10e   : > { %v4892_v39 = vpop.f32.mrb[5].mxu1  ;;  %1995 = vmatmul.mubr.f32.gmra.mrb[110].mxu1 %v4414_v47 }
 0x10f   : > { %1999 = vmatprep.mubr.f32.mxu1 %v3614_v58 }
 0x110   : > { %3293 = vmatmul.mubr.msk.f32.vlgmr.msra.gmra.mrb[96].mxu0 %vm740_vm0, %v3865_v61 }
 0x111   : > { %v4898_v53 = vpop.f32.mrb[6].mxu1  ;;  %3295 = vmatprep.mubr.f32.mxu0 %v3914_v16  ;;  %v3616_v16 = vld [vmem:[%s3767_s30 + $0x60] sm:$0xff] }
 0x112   : > { %v4901_v44 = vpop.f32.mrb[7].mxu1  ;;  %2911 = vmatmul.mubr.msk.f32.gmra.mrb[112].mxu1 %vm4122_vm2, %v4423_v15 }
 0x113   : > { %2004 = vmatprep.mubr.f32.mxu1 %v3615_v5 }
 0x114   : > { %3296 = vmatmul.mubr.msk.f32.gmra.mrb[98].mxu0 %vm740_vm0, %v3893_v9  ;;  %v3617_v9 = vld [vmem:[%s3767_s30 + $0x68] sm:$0xff] }
 0x115   : > { %v4909_v47 = vpop.f32.mrb[8].mxu1  ;;  %3298 = vmatprep.mubr.f32.mxu0 %v3945_v29 }
 0x116   : > { %v4912_v61 = vpop.f32.mrb[9].mxu1  ;;  %2005 = vmatmul.mubr.f32.gmra.mrb[114].mxu1 %v4449_v24 }
 0x117   : > { %2009 = vmatprep.mubr.f32.mxu1 %v3616_v16 }
 0x118   : > { %3299 = vmatmul.mubr.msk.f32.gmra.mrb[100].mxu0 %vm740_vm0, %v5454_v55  ;;  %v3618_v55 = vld [vmem:[%s3767_s30 + $0x70] sm:$0xff] }
 0x119   : > { %v4918_v15 = vpop.f32.mrb[10].mxu1  ;;  %3301 = vmatprep.mubr.f32.mxu0 %v5455_v28 }
 0x11a   : > { %v4921_v58 = vpop.f32.mrb[11].mxu1  ;;  %2913 = vmatmul.mubr.msk.f32.gmra.mrb[116].mxu1 %vm4122_vm2, %v4457_v4 }
 0x11b   : > { %2014 = vmatprep.mubr.f32.mxu1 %v3617_v9 }
 0x11c   : > { %3302 = vmatmul.mubr.msk.f32.gmra.mrb[102].mxu0 %vm740_vm0, %v5456_v50 }
 0x11d   : > { %v4929_v29 = vpop.f32.mrb[12].mxu1  ;;  %3304 = vmatprep.mubr.f32.mxu0 %v5457_v8  ;;  %v3619_v8 = vld [vmem:[%s3767_s30 + $0x78] sm:$0xff] }
 0x11e   : > { %v4932_v24 = vpop.f32.mrb[13].mxu1  ;;  %2015 = vmatmul.mubr.f32.gmra.mrb[118].mxu1 %v4483_v54 }
 0x11f   : > { %2019 = vmatprep.mubr.f32.mxu1 %v3618_v55  ;;  %v3621_v55 = vld [vmem:[%s3767_s30 + $0x88] sm:$0xff] }
 0x120   : > { %3305 = vmatmul.mubr.msk.f32.gmra.mrb[104].mxu0 %vm740_vm0, %v5458_v60 }
 0x121   : > { %v4938_v4 = vpop.f32.mrb[14].mxu1  ;;  %3307 = vmatprep.mubr.f32.mxu0 %v5459_v36 }
 0x122   : > { %v4941_v28 = vpop.f32.mrb[15].mxu1  ;;  %2915 = vmatmul.mubr.msk.f32.gmra.mrb[120].mxu1 %vm4122_vm2, %v4491_v35  ;;  %v3620_v35 = vld [vmem:[%s3767_s30 + $0x80] sm:$0xff] }
 0x123   : > { %v1012_v50 = vpop.f32.mrb[0].mxu0  ;;  %2024 = vmatprep.mubr.f32.mxu1 %v3619_v8  ;;  %v3622_v8 = vld [vmem:[%s3767_s30 + $0x90] sm:$0xff] }
 0x124   : > { %v4947_v54 = vadd.f32 %v1237_v31, %v1012_v50  ;;  %3308 = vmatmul.mubr.msk.f32.gmra.mrb[106].mxu0 %vm740_vm0, %v5460_v23  ;;  %v1014_v60 = vpop.f32.mrb[1].mxu0 }
 0x125   : > { %v4951_v5 = vpop.f32.mrb[16].mxu1  ;;  %3310 = vmatprep.mubr.f32.mxu0 %v5461_v33 }
 0x126   : > { %v4954_v36 = vpop.f32.mrb[17].mxu1  ;;  %2025 = vmatmul.mubr.f32.gmra.mrb[122].mxu1 %v4517_v63 }
 0x127   : > { %v1017_v16 = vpop.f32.mrb[2].mxu0  ;;  %2029 = vmatprep.mubr.f32.mxu1 %v3620_v35 }
 0x128   : > { %v4959_v9 = vadd.f32 %v4871_v21, %v1017_v16  ;;  %3311 = vmatmul.mubr.msk.f32.gmra.mrb[108].mxu0 %vm740_vm0, %v5462_v34  ;;  %v1019_v23 = vpop.f32.mrb[3].mxu0  ;;  %v3623_v16 = vld [vmem:[%s3767_s30 + $0x98] sm:$0xff] }
 0x129   : > { %v4963_v31 = vpop.f32.mrb[18].mxu1  ;;  %3313 = vmatprep.mubr.f32.mxu0 %v5463_v40  ;;  %v3624_v23 = vld [vmem:[%s3767_s30 + $0xa0] sm:$0xff] }
 0x12a   : > { %v4966_v33 = vpop.f32.mrb[19].mxu1  ;;  %2917 = vmatmul.mubr.msk.f32.gmra.mrb[124].mxu1 %vm4122_vm2, %v4525_v27 }
 0x12b   : > { %v1022_v63 = vpop.f32.mrb[4].mxu0  ;;  %2034 = vmatprep.mubr.f32.mxu1 %v3621_v55  ;;  %v3625_v55 = vld [vmem:[%s3767_s30 + $0xa8] sm:$0xff] }
 0x12c   : > { %v4973_v21 = vadd.f32 %v4881_v52, %v1022_v63  ;;  %3314 = vmatmul.mubr.msk.f32.gmra.mrb[110].mxu0 %vm740_vm0, %v5464_v19  ;;  %v1024_v34 = vpop.f32.mrb[5].mxu0 }
 0x12d   : > { %v4977_v50 = vpop.f32.mrb[20].mxu1  ;;  %3316 = vmatprep.mubr.f32.mxu0 %v5465_v32 }
 0x12e   : > { %v4980_v40 = vpop.f32.mrb[21].mxu1  ;;  %2035 = vmatmul.mubr.f32.gmra.mrb[126].mxu1 %v4551_v11 }
 0x12f   : > { %v1027_v27 = vpop.f32.mrb[6].mxu0  ;;  %2039 = vmatprep.mubr.f32.mxu1 %v3622_v8 }
 0x130   : > { %v4985_v60 = vadd.f32 %v4878_v25, %v1027_v27  ;;  %3317 = vmatmul.mubr.msk.f32.gmra.mrb[112].mxu0 %vm740_vm0, %v5466_v12  ;;  %v1029_v19 = vpop.f32.mrb[7].mxu0  ;;  %v3626_v27 = vld [vmem:[%s3767_s30 + $0xb0] sm:$0xff] }
 0x131   : > { %v4989_v52 = vpop.f32.mrb[22].mxu1  ;;  %3319 = vmatprep.mubr.f32.mxu0 %v5467_v0  ;;  %v3627_v19 = vld [vmem:[%s3767_s30 + $0xb8] sm:$0xff] }
 0x132   : > { %v4992_v32 = vpop.f32.mrb[23].mxu1  ;;  %2919 = vmatmul.mubr.msk.f32.gmra.mrb[128].mxu1 %vm4122_vm2, %v4559_v51 }
 0x133   : > { %v1032_v11 = vpop.f32.mrb[8].mxu0  ;;  %2044 = vmatprep.mubr.f32.mxu1 %v3623_v16  ;;  %v5475_v16 = vld [vmem:[#allocation28_spill] sm:$0xff] }
 0x134   : > { %v4999_v25 = vadd.f32 %v4892_v39, %v1032_v11  ;;  %v1034_v35 = vpop.f32.mrb[9].mxu0  ;;  %3320 = vmatmul.mubr.msk.f32.gmra.mrb[114].mxu0 %vm740_vm0, %v5468_v26 }
 0x135   : > { %v5003_v12 = vpop.f32.mrb[24].mxu1  ;;  %3322 = vmatprep.mubr.f32.mxu0 %v5469_v10 }
 0x136   : > { %v5006_v0 = vpop.f32.mrb[25].mxu1  ;;  %2045 = vmatmul.mubr.f32.gmra.mrb[130].mxu1 %v4585_v22 }
 0x137   : > { %v1037_v51 = vpop.f32.mrb[10].mxu0  ;;  %2049 = vmatprep.mubr.f32.mxu1 %v3624_v23 }
 0x138   : > { %v5011_v63 = vadd.f32 %v4889_v42, %v1037_v51  ;;  %v1039_v39 = vpop.f32.mrb[11].mxu0  ;;  %3323 = vmatmul.mubr.msk.f32.gmra.mrb[116].mxu0 %vm740_vm0, %v5470_v13  ;;  %v3628_v51 = vld [vmem:[%s3767_s30 + $0xc0] sm:$0xff] }
 0x139   : > { %v5015_v26 = vpop.f32.mrb[26].mxu1  ;;  %3325 = vmatprep.mubr.f32.mxu0 %v5471_v6  ;;  %v5476_v39 = vld [vmem:[#allocation27_spill] sm:$0xff] }
 0x13a   : > { %v5018_v10 = vpop.f32.mrb[27].mxu1  ;;  %2921 = vmatmul.mubr.msk.f32.gmra.mrb[132].mxu1 %vm4122_vm2, %v4593_v20 }
 0x13b   : > { %v1042_v22 = vpop.f32.mrb[12].mxu0  ;;  %2054 = vmatprep.mubr.f32.mxu1 %v3625_v55  ;;  %v3629_v55 = vld [vmem:[%s3767_s30 + $0xc8] sm:$0xff] }
 0x13c   : > { %v5025_v42 = vadd.f32 %v4901_v44, %v1042_v22  ;;  %v1044_v34 = vpop.f32.mrb[13].mxu0  ;;  %3326 = vmatmul.mubr.msk.f32.gmra.mrb[118].mxu0 %vm740_vm0, %v5472_v3 }
 0x13d   : > { %v5029_v13 = vpop.f32.mrb[28].mxu1  ;;  %3328 = vmatprep.mubr.f32.mxu0 %v5473_v45 }
 0x13e   : > { %v5032_v6 = vpop.f32.mrb[29].mxu1  ;;  %2055 = vmatmul.mubr.f32.gmra.mrb[134].mxu1 %v4619_v37 }
 0x13f   : > { %v1047_v20 = vpop.f32.mrb[14].mxu0  ;;  %2059 = vmatprep.mubr.f32.mxu1 %v3626_v27 }
 0x140   : > { %v5037_v8 = vadd.f32 %v4898_v53, %v1047_v20  ;;  %v1049_v44 = vpop.f32.mrb[15].mxu0  ;;  %3329 = vmatmul.mubr.msk.f32.gmra.mrb[120].mxu0 %vm740_vm0, %v4271_v56 }
 0x141   : > { %v5041_v3 = vpop.f32.mrb[30].mxu1  ;;  %3331 = vmatprep.mubr.f32.mxu0 %v4335_v46 }
 0x142   : > { %v5044_v45 = vpop.f32.mrb[31].mxu1  ;;  %2923 = vmatmul.mubr.msk.f32.gmra.mrb[136].mxu1 %vm4122_vm2, %v4627_v59 }
 0x143   : > { %v1052_v37 = vpop.f32.mrb[16].mxu0  ;;  %2064 = vmatprep.mubr.f32.mxu1 %v3627_v19 }
 0x144   : > { %v5051_v53 = vadd.f32 %v4912_v61, %v1052_v37  ;;  %v1054_v11 = vpop.f32.mrb[17].mxu0  ;;  %3332 = vmatmul.mubr.msk.f32.gmra.mrb[122].mxu0 %vm740_vm0, %v5474_v57 }
 0x145   : > { %v1462_v56 = vpop.f32.mrb[32].mxu1  ;;  %3334 = vmatprep.mubr.f32.mxu0 %v5475_v16 }
 0x146   : > { %v5057_v46 = vadd.f32 %v1462_v56, %v4947_v54  ;;  %v1464_v35 = vpop.f32.mrb[33].mxu1  ;;  %2065 = vmatmul.mubr.f32.gmra.mrb[138].mxu1 %v4653_v48  ;;  %v3631_v56 = vld [vmem:[%s3767_s30 + $0xd8] sm:$0xff] }
 0x147   : > { %v1057_v59 = vpop.f32.mrb[18].mxu0  ;;  %2069 = vmatprep.mubr.f32.mxu1 %v3628_v51  ;;  %v3632_v51 = vld [vmem:[%s3767_s30 + $0xe0] sm:$0xff] }
 0x148   : > { %v5062_v61 = vadd.f32 %v4909_v47, %v1057_v59  ;;  %v1059_v23 = vpop.f32.mrb[19].mxu0  ;;  %3335 = vmatmul.mubr.msk.f32.gmra.mrb[124].mxu0 %vm740_vm0, %v5476_v39 }
 0x149   : > { %v1467_v57 = vpop.f32.mrb[34].mxu1  ;;  %3337 = vmatprep.mubr.f32.mxu0 %v4737_v38 }
 0x14a   : > { %v5068_v54 = vadd.f32 %v1467_v57, %v4959_v9  ;;  %v1469_v22 = vpop.f32.mrb[35].mxu1  ;;  %2925 = vmatmul.mubr.msk.f32.gmra.mrb[140].mxu1 %vm4122_vm2, %v4661_v14  ;;  %v3630_v14 = vld [vmem:[%s3767_s30 + $0xd0] sm:$0xff] }
 0x14b   : > { %v1062_v48 = vpop.f32.mrb[20].mxu0  ;;  %2074 = vmatprep.mubr.f32.mxu1 %v3629_v55  ;;  %v3633_v22 = vld [vmem:[%s3767_s30 + $0xe8] sm:$0xff] }
 0x14c   : > { %v5075_v47 = vadd.f32 %v4921_v58, %v1062_v48  ;;  %v1064_v34 = vpop.f32.mrb[21].mxu0  ;;  %3338 = vmatmul.mubr.msk.f32.gmra.mrb[126].mxu0 %vm740_vm0, %v4737_v38 }
 0x14d   : > { %v1472_v20 = vpop.f32.mrb[36].mxu1 }
 0x14e   : > { %v5080_v9 = vadd.f32 %v1472_v20, %v4973_v21  ;;  %v1474_v27 = vpop.f32.mrb[37].mxu1  ;;  %2075 = vmatmul.mubr.f32.gmra.mrb[142].mxu1 %v4674_v49  ;;  %v3634_v20 = vld [vmem:[%s3767_s30 + $0xf0] sm:$0xff] }
 0x14f   : > { %v1067_v44 = vpop.f32.mrb[22].mxu0  ;;  %2079 = vmatprep.mubr.f32.mxu1 %v3630_v14 }
 0x150   : > { %v5085_v37 = vadd.f32 %v4918_v15, %v1067_v44  ;;  %v1069_v58 = vpop.f32.mrb[23].mxu0 }
 0x151   : > { %v1477_v19 = vpop.f32.mrb[38].mxu1  ;;  %v3635_v58 = vld [vmem:[%s3767_s30 + $0xf8] sm:$0xff] }
 0x152   : > { %v5088_v11 = vadd.f32 %v1477_v19, %v4985_v60  ;;  %v1479_v38 = vpop.f32.mrb[39].mxu1  ;;  %2927 = vmatmul.mubr.msk.f32.gmra.mrb[144].mxu1 %vm4122_vm2, %v4682_v62 }
 0x153   : > { %v1072_v21 = vpop.f32.mrb[24].mxu0  ;;  %2084 = vmatprep.mubr.f32.mxu1 %v3631_v56 }
 0x154   : > { %v5095_v49 = vadd.f32 %v4932_v24, %v1072_v21  ;;  %v1074_v15 = vpop.f32.mrb[25].mxu0 }
 0x155   : > { %v1482_v16 = vpop.f32.mrb[40].mxu1 }
 0x156   : > { %v5098_v35 = vadd.f32 %v1482_v16, %v4999_v25  ;;  %v1484_v59 = vpop.f32.mrb[41].mxu1  ;;  %2085 = vmatmul.mubr.f32.gmra.mrb[146].mxu1 %v4694_v1 }
 0x157   : > { %v1077_v60 = vpop.f32.mrb[26].mxu0  ;;  %2089 = vmatprep.mubr.f32.mxu1 %v3632_v51 }
 0x158   : > { %v5103_v62 = vadd.f32 %v4929_v29, %v1077_v60  ;;  %v1079_v23 = vpop.f32.mrb[27].mxu0 }
 0x159   : > { %v1487_v39 = vpop.f32.mrb[42].mxu1 }
 0x15a   : > { %v5106_v24 = vadd.f32 %v1487_v39, %v5011_v63  ;;  %v1489_v57 = vpop.f32.mrb[43].mxu1  ;;  %2929 = vmatmul.mubr.msk.f32.gmra.mrb[148].mxu1 %vm4122_vm2, %v4702_v17 }
 0x15b   : > { %v1082_v25 = vpop.f32.mrb[28].mxu0  ;;  %2094 = vmatprep.mubr.f32.mxu1 %v3633_v22 }
 0x15c   : > { %v1308_v1 = vadd.f32 %v4941_v28, %v1082_v25  ;;  %v1084_v48 = vpop.f32.mrb[29].mxu0 }
 0x15d   : > { %v1492_v29 = vpop.f32.mrb[44].mxu1 }
 0x15e   : > { %v5114_v55 = vadd.f32 %v1492_v29, %v5025_v42  ;;  %v1494_v34 = vpop.f32.mrb[45].mxu1  ;;  %2095 = vmatmul.mubr.f32.gmra.mrb[150].mxu1 %v4714_v18 }
 0x15f   : > { %v1087_v63 = vpop.f32.mrb[30].mxu0  ;;  %2099 = vmatprep.mubr.f32.mxu1 %v3634_v20 }
 0x160   : > { %v1313_v27 = vadd.f32 %v4938_v4, %v1087_v63  ;;  %v1089_v17 = vpop.f32.mrb[31].mxu0 }
 0x161   : > { %v1497_v44 = vpop.f32.mrb[46].mxu1 }
 0x162   : > { %v5120_v14 = vadd.f32 %v1497_v44, %v5037_v8  ;;  %v1499_v28 = vpop.f32.mrb[47].mxu1  ;;  %2931 = vmatmul.mubr.msk.f32.gmra.mrb[152].mxu1 %vm4122_vm2, %v4722_v41 }
 0x163   : > { %v1092_v42 = vpop.f32.mrb[32].mxu0  ;;  %2104 = vmatprep.mubr.f32.mxu1 %v3635_v58 }
 0x164   : > { %v1318_v18 = vadd.f32 %v4954_v36, %v1092_v42  ;;  %v1094_v19 = vpop.f32.mrb[33].mxu0 }
 0x165   : > { %v1502_v38 = vpop.f32.mrb[48].mxu1 }
 0x166   : > { %v5128_v21 = vadd.f32 %v1502_v38, %v5051_v53  ;;  %v1504_v4 = vpop.f32.mrb[49].mxu1  ;;  %2105 = vmatmul.mubr.f32.gmra.mrb[154].mxu1 %v4734_v43 }
 0x167   : > { %v1097_v8 = vpop.f32.mrb[34].mxu0  ;;  %2109 = vmatprep.mubr.f32.mxu1 %v3661_v7 }
 0x168   : > { %v1323_v56 = vadd.f32 %v4951_v5, %v1097_v8  ;;  %v1099_v15 = vpop.f32.mrb[35].mxu0 }
 0x169   : > { %v1507_v41 = vpop.f32.mrb[50].mxu1 }
 0x16a   : > { %v5134_v16 = vadd.f32 %v1507_v41, %v5062_v61  ;;  %v1509_v59 = vpop.f32.mrb[51].mxu1  ;;  %2933 = vmatmul.mubr.msk.f32.gmra.mrb[156].mxu1 %vm4122_vm2, %v4390_v30 }
 0x16b   : > { %v1102_v36 = vpop.f32.mrb[36].mxu0  ;;  %2114 = vmatprep.mubr.f32.mxu1 %v3661_v7 }
 0x16c   : > { %v1328_v43 = vadd.f32 %v4966_v33, %v1102_v36  ;;  %v1104_v53 = vpop.f32.mrb[37].mxu0 }
 0x16d   : > { %v1512_v60 = vpop.f32.mrb[52].mxu1 }
 0x16e   : > { %v5142_v51 = vadd.f32 %v1512_v60, %v5075_v47  ;;  %v1514_v5 = vpop.f32.mrb[53].mxu1  ;;  %2115 = vmatmul.mubr.f32.gmra.mrb[158].mxu1 %v4390_v30 }
 0x16f   : > { %v1107_v61 = vpop.f32.mrb[38].mxu0 }
 0x170   : > { %v1333_v23 = vadd.f32 %v4963_v31, %v1107_v61  ;;  %v1109_v39 = vpop.f32.mrb[39].mxu0 }
 0x171   : > { %v1517_v57 = vpop.f32.mrb[54].mxu1 }
 0x172   : > { %v5147_v2 = vadd.f32 %v1517_v57, %v5085_v37  ;;  %v1519_v25 = vpop.f32.mrb[55].mxu1 }
 0x173   : > { %v1112_v7 = vpop.f32.mrb[40].mxu0 }
 0x174   : > { %v1338_v33 = vadd.f32 %v4980_v40, %v1112_v7  ;;  %v1114_v22 = vpop.f32.mrb[41].mxu0 }
 0x175   : > { %v1522_v48 = vpop.f32.mrb[56].mxu1 }
 0x176   : > { %v5151_v47 = vadd.f32 %v1522_v48, %v5095_v49  ;;  %v1524_v29 = vpop.f32.mrb[57].mxu1 }
 0x177   : > { %v1117_v34 = vpop.f32.mrb[42].mxu0 }
 0x178   : > { %v1343_v30 = vadd.f32 %v4977_v50, %v1117_v34  ;;  %v1119_v63 = vpop.f32.mrb[43].mxu0 }
 0x179   : > { %v1527_v31 = vpop.f32.mrb[58].mxu1 }
 0x17a   : > { %v5155_v20 = vadd.f32 %v1527_v31, %v5103_v62  ;;  %v1529_v37 = vpop.f32.mrb[59].mxu1 }
 0x17b   : > { %v1122_v17 = vpop.f32.mrb[44].mxu0 }
 0x17c   : > { %v1348_v44 = vadd.f32 %v4992_v32, %v1122_v17  ;;  %v1124_v28 = vpop.f32.mrb[45].mxu0 }
 0x17d   : > { %v1532_v40 = vpop.f32.mrb[60].mxu1 }
 0x17e   : > { %v5158_v42 = vadd.f32 %v1532_v40, %v1308_v1  ;;  %v1534_v58 = vpop.f32.mrb[61].mxu1 }
 0x17f   : > { %v1127_v49 = vpop.f32.mrb[46].mxu0 }
 0x180   : > { %v1353_v19 = vadd.f32 %v4989_v52, %v1127_v49  ;;  %v1129_v38 = vpop.f32.mrb[47].mxu0 }
 0x181   : > { %v1537_v4 = vpop.f32.mrb[62].mxu1 }
 0x182   : > { %v5161_v50 = vadd.f32 %v1537_v4, %v1313_v27  ;;  %v1539_v8 = vpop.f32.mrb[63].mxu1 }
 0x183   : > { %v1132_v15 = vpop.f32.mrb[48].mxu0 }
 0x184   : > { %v1358_v62 = vadd.f32 %v5006_v0, %v1132_v15  ;;  %v1134_v41 = vpop.f32.mrb[49].mxu0 }
 0x185   : > { %v1542_v59 = vpop.f32.mrb[64].mxu1 }
 0x186   : > { %v5164_v36 = vadd.f32 %v1542_v59, %v1318_v18  ;;  %v1544_v32 = vpop.f32.mrb[65].mxu1 }
 0x187   : > { %v1137_v53 = vpop.f32.mrb[50].mxu0 }
 0x188   : > { %v1363_v1 = vadd.f32 %v5003_v12, %v1137_v53  ;;  %v1139_v60 = vpop.f32.mrb[51].mxu0 }
 0x189   : > { %v1547_v5 = vpop.f32.mrb[66].mxu1 }
 0x18a   : > { %v5167_v61 = vadd.f32 %v1547_v5, %v1323_v56  ;;  %v1549_v52 = vpop.f32.mrb[67].mxu1 }
 0x18b   : > { %v1142_v39 = vpop.f32.mrb[52].mxu0 }
 0x18c   : > { %v1368_v27 = vadd.f32 %v5018_v10, %v1142_v39  ;;  %v1144_v57 = vpop.f32.mrb[53].mxu0 }
 0x18d   : > { %v1552_v25 = vpop.f32.mrb[68].mxu1 }
 0x18e   : > { %v5170_v7 = vadd.f32 %v1552_v25, %v1328_v43  ;;  %v1554_v0 = vpop.f32.mrb[69].mxu1 }
 0x18f   : > { %v1147_v22 = vpop.f32.mrb[54].mxu0 }
 0x190   : > { %v1373_v18 = vadd.f32 %v5015_v26, %v1147_v22  ;;  %v1149_v48 = vpop.f32.mrb[55].mxu0 }
 0x191   : > { %v1557_v29 = vpop.f32.mrb[70].mxu1 }
 0x192   : > { %v5173_v34 = vadd.f32 %v1557_v29, %v1333_v23  ;;  %v1559_v12 = vpop.f32.mrb[71].mxu1 }
 0x193   : > { %v1152_v63 = vpop.f32.mrb[56].mxu0 }
 0x194   : > { %v1378_v56 = vadd.f32 %v5032_v6, %v1152_v63  ;;  %v1154_v31 = vpop.f32.mrb[57].mxu0 }
 0x195   : > { %v1562_v37 = vpop.f32.mrb[72].mxu1 }
 0x196   : > { %v5176_v17 = vadd.f32 %v1562_v37, %v1338_v33  ;;  %v1564_v10 = vpop.f32.mrb[73].mxu1 }
 0x197   : > { %v1157_v28 = vpop.f32.mrb[58].mxu0 }
 0x198   : > { %v1383_v43 = vadd.f32 %v5029_v13, %v1157_v28  ;;  %v1159_v40 = vpop.f32.mrb[59].mxu0 }
 0x199   : > { %v1567_v58 = vpop.f32.mrb[74].mxu1 }
 0x19a   : > { %v5179_v49 = vadd.f32 %v1567_v58, %v1343_v30  ;;  %v1569_v26 = vpop.f32.mrb[75].mxu1 }
 0x19b   : > { %v1162_v38 = vpop.f32.mrb[60].mxu0 }
 0x19c   : > { %v1388_v23 = vadd.f32 %v5044_v45, %v1162_v38  ;;  %v1164_v4 = vpop.f32.mrb[61].mxu0 }
 0x19d   : > { %v1572_v8 = vpop.f32.mrb[76].mxu1 }
 0x19e   : > { %v5182_v15 = vadd.f32 %v1572_v8, %v1348_v44  ;;  %v1574_v6 = vpop.f32.mrb[77].mxu1 }
 0x19f   : > { %v1167_v41 = vpop.f32.mrb[62].mxu0 }
 0x1a0   : > { %v1393_v33 = vadd.f32 %v5041_v3, %v1167_v41  ;;  %v1169_v59 = vpop.f32.mrb[63].mxu0 }
 0x1a1   : > { %v1577_v32 = vpop.f32.mrb[78].mxu1 }
 0x1a2   : > { %v5185_v53 = vadd.f32 %v1577_v32, %v1353_v19  ;;  %v1579_v13 = vpop.f32.mrb[79].mxu1 }
 0x1a3   : > { %v3214_v60 = vpop.f32.mrb[64].mxu0 }
 0x1a4   : > { %v5188_v30 = vadd.f32 %v3214_v60, %v5068_v54  ;;  %v1687_v5 = vpop.f32.mrb[65].mxu0 }
 0x1a5   : > { %v1582_v52 = vpop.f32.mrb[80].mxu1  ;;  %v5191_v45 = vadd.f32 %v1687_v5, %v5057_v46 }
 0x1a6   : > { %v5193_v44 = vadd.f32 %v1582_v52, %v1358_v62  ;;  %v1584_v39 = vpop.f32.mrb[81].mxu1 }
 0x1a7   : > { %v3217_v57 = vpop.f32.mrb[66].mxu0 }
 0x1a8   : > { %v5196_v3 = vadd.f32 %v3217_v57, %v5088_v11  ;;  %v1697_v25 = vpop.f32.mrb[67].mxu0 }
 0x1a9   : > { %v1587_v19 = vpop.f32.mrb[82].mxu1  ;;  %v5199_v0 = vadd.f32 %v1697_v25, %v5080_v9 }
 0x1aa   : > { %v5201_v22 = vadd.f32 %v1587_v19, %v1363_v1  ;;  %v1589_v54 = vpop.f32.mrb[83].mxu1 }
 0x1ab   : > { %v3220_v48 = vpop.f32.mrb[68].mxu0 }
 0x1ac   : > { %v5204_v29 = vadd.f32 %v3220_v48, %v5106_v24  ;;  %v1707_v46 = vpop.f32.mrb[69].mxu0 }
 0x1ad   : > { %v1592_v62 = vpop.f32.mrb[84].mxu1  ;;  %v5207_v12 = vadd.f32 %v1707_v46, %v5098_v35 }
 0x1ae   : > { %v5209_v63 = vadd.f32 %v1592_v62, %v1368_v27  ;;  %v1594_v11 = vpop.f32.mrb[85].mxu1 }
 0x1af   : > { %v3223_v31 = vpop.f32.mrb[70].mxu0 }
 0x1b0   : > { %v5212_v37 = vadd.f32 %v3223_v31, %v5120_v14  ;;  %v1717_v9 = vpop.f32.mrb[71].mxu0 }
 0x1b1   : > { %v1597_v1 = vpop.f32.mrb[86].mxu1  ;;  %v5215_v10 = vadd.f32 %v1717_v9, %v5114_v55 }
 0x1b2   : > { %v1598_v28 = vadd.f32 %v1597_v1, %v1373_v18  ;;  %v1599_v24 = vpop.f32.mrb[87].mxu1 }
 0x1b3   : > { %v3226_v40 = vpop.f32.mrb[72].mxu0 }
 0x1b4   : > { %v5218_v58 = vadd.f32 %v3226_v40, %v5134_v16  ;;  %v1727_v35 = vpop.f32.mrb[73].mxu0 }
 0x1b5   : > { %v1602_v26 = vpop.f32.mrb[88].mxu1  ;;  %v5221_v27 = vadd.f32 %v1727_v35, %v5128_v21 }
 0x1b6   : > { %v1603_v38 = vadd.f32 %v1602_v26, %v1378_v56  ;;  %v1604_v4 = vpop.f32.mrb[89].mxu1 }
 0x1b7   : > { %v3229_v14 = vpop.f32.mrb[74].mxu0 }
 0x1b8   : > { %v5224_v8 = vadd.f32 %v3229_v14, %v5147_v2  ;;  %v1737_v6 = vpop.f32.mrb[75].mxu0 }
 0x1b9   : > { %v1607_v55 = vpop.f32.mrb[90].mxu1  ;;  %v5227_v18 = vadd.f32 %v1737_v6, %v5142_v51 }
 0x1ba   : > { %v1608_v41 = vadd.f32 %v1607_v55, %v1383_v43  ;;  %v1609_v59 = vpop.f32.mrb[91].mxu1 }
 0x1bb   : > { %v3232_v16 = vpop.f32.mrb[76].mxu0 }
 0x1bc   : > { %v5230_v32 = vadd.f32 %v3232_v16, %v5155_v20  ;;  %v1747_v13 = vpop.f32.mrb[77].mxu0 }
 0x1bd   : > { %v1612_v21 = vpop.f32.mrb[92].mxu1  ;;  %v5233_v56 = vadd.f32 %v1747_v13, %v5151_v47 }
 0x1be   : > { %v1613_v60 = vadd.f32 %v1612_v21, %v1388_v23  ;;  %v1614_v5 = vpop.f32.mrb[93].mxu1 }
 0x1bf   : > { %v3235_v2 = vpop.f32.mrb[78].mxu0 }
 0x1c0   : > { %v5236_v52 = vadd.f32 %v3235_v2, %v5161_v50  ;;  %v1757_v39 = vpop.f32.mrb[79].mxu0 }
 0x1c1   : > { %v1617_v51 = vpop.f32.mrb[94].mxu1  ;;  %v5239_v43 = vadd.f32 %v1757_v39, %v5158_v42 }
 0x1c2   : > { %v1618_v57 = vadd.f32 %v1617_v51, %v1393_v33  ;;  %v1619_v25 = vpop.f32.mrb[95].mxu1 }
 0x1c3   : > { %v3238_v20 = vpop.f32.mrb[80].mxu0 }
 0x1c4   : > { %v5242_v19 = vadd.f32 %v3238_v20, %v5167_v61  ;;  %v1767_v54 = vpop.f32.mrb[81].mxu0 }
 0x1c5   : > { %v5245_v47 = vadd.f32 %v1767_v54, %v5164_v36  ;;  %v1961_v23 = vpop.f32.mrb[96].mxu1 }
 0x1c6   : > { %v1963_v48 = vpop.f32.mrb[97].mxu1 }
 0x1c7   : > { %v3241_v46 = vpop.f32.mrb[82].mxu0 }
 0x1c8   : > { %v5248_v50 = vadd.f32 %v3241_v46, %v5173_v34  ;;  %v1777_v62 = vpop.f32.mrb[83].mxu0 }
 0x1c9   : > { %v5251_v42 = vadd.f32 %v1777_v62, %v5170_v7  ;;  %v1966_v33 = vpop.f32.mrb[98].mxu1 }
 0x1ca   : > { %v1968_v11 = vpop.f32.mrb[99].mxu1 }
 0x1cb   : > { %v3244_v31 = vpop.f32.mrb[84].mxu0 }
 0x1cc   : > { %v5254_v61 = vadd.f32 %v3244_v31, %v5179_v49  ;;  %v1787_v9 = vpop.f32.mrb[85].mxu0 }
 0x1cd   : > { %v5257_v36 = vadd.f32 %v1787_v9, %v5176_v17  ;;  %v1971_v1 = vpop.f32.mrb[100].mxu1 }
 0x1ce   : > { %v1973_v24 = vpop.f32.mrb[101].mxu1 }
 0x1cf   : > { %v3247_v40 = vpop.f32.mrb[86].mxu0 }
 0x1d0   : > { %v5260_v34 = vadd.f32 %v3247_v40, %v5185_v53  ;;  %v1797_v35 = vpop.f32.mrb[87].mxu0 }
 0x1d1   : > { %v5263_v7 = vadd.f32 %v1797_v35, %v5182_v15  ;;  %v1976_v26 = vpop.f32.mrb[102].mxu1 }
 0x1d2   : > { %v1978_v4 = vpop.f32.mrb[103].mxu1 }
 0x1d3   : > { %v3250_v14 = vpop.f32.mrb[88].mxu0 }
 0x1d4   : > { %v5266_v49 = vadd.f32 %v3250_v14, %v5201_v22  ;;  %v1807_v6 = vpop.f32.mrb[89].mxu0 }
 0x1d5   : > { %v5269_v17 = vadd.f32 %v1807_v6, %v5193_v44  ;;  %v1981_v55 = vpop.f32.mrb[104].mxu1 }
 0x1d6   : > { %v1983_v59 = vpop.f32.mrb[105].mxu1 }
 0x1d7   : > { %v3253_v16 = vpop.f32.mrb[90].mxu0 }
 0x1d8   : > { %v5271_v13 = vadd.f32 %v3253_v16, %v1598_v28  ;;  %v1817_v53 = vpop.f32.mrb[91].mxu0 }
 0x1d9   : > { %v5274_v21 = vadd.f32 %v1817_v53, %v5209_v63  ;;  %v1986_v15 = vpop.f32.mrb[106].mxu1 }
 0x1da   : > { %v1988_v5 = vpop.f32.mrb[107].mxu1 }
 0x1db   : > { %v3256_v2 = vpop.f32.mrb[92].mxu0 }
 0x1dc   : > { %v5276_v39 = vadd.f32 %v3256_v2, %v1608_v41  ;;  %v1827_v22 = vpop.f32.mrb[93].mxu0 }
 0x1dd   : > { %v5278_v51 = vadd.f32 %v1827_v22, %v1603_v38  ;;  %v1991_v44 = vpop.f32.mrb[108].mxu1 }
 0x1de   : > { %v1993_v25 = vpop.f32.mrb[109].mxu1 }
 0x1df   : > { %v3259_v20 = vpop.f32.mrb[94].mxu0 }
 0x1e0   : > { %v5280_v54 = vadd.f32 %v3259_v20, %v1618_v57  ;;  %v1837_v28 = vpop.f32.mrb[95].mxu0 }
 0x1e1   : > { %v5282_v48 = vadd.f32 %v1837_v28, %v1613_v60  ;;  %v1996_v46 = vpop.f32.mrb[110].mxu1 }
 0x1e2   : > { %v1998_v63 = vpop.f32.mrb[111].mxu1 }
 0x1e3   : > { %v3294_v62 = vpop.f32.mrb[96].mxu0 }
 0x1e4   : > { %v2192_v11 = vadd.f32 %v3294_v62, %v1966_v33  ;;  %v2186_v31 = vpop.f32.mrb[97].mxu0 }
 0x1e5   : > { %v2001_v38 = vpop.f32.mrb[112].mxu1  ;;  %v2187_v41 = vadd.f32 %v2186_v31, %v1961_v23 }
 0x1e6   : > { %v2346_v57 = vadd.f32 %v2192_v11, %v5188_v30  ;;  %v2003_v9 = vpop.f32.mrb[113].mxu1 }
 0x1e7   : > { %v2345_v60 = vadd.f32 %v2187_v41, %v5191_v45  ;;  %v3297_v24 = vpop.f32.mrb[98].mxu0 }
 0x1e8   : > { %2378 = vst [vmem:[%s5289_s16 + $0x8] sm:$0xff] %v2346_v57  ;;  %v2447_v33 = vmul.f32 %v2346_v57, %v2346_v57  ;;  %v2202_v40 = vadd.f32 %v3297_v24, %v1976_v26  ;;  %v2196_v35 = vpop.f32.mrb[99].mxu0 }
 0x1e9   : > { %2377 = vst [vmem:[%s5289_s16] sm:$0xff] %v2345_v60  ;;  %v2409_v4 = vadd.f32 %v2346_v57, %v2345_v60  ;;  %v2446_v14 = vmul.f32 %v2345_v60, %v2345_v60  ;;  %v2006_v6 = vpop.f32.mrb[114].mxu1  ;;  %v2197_v59 = vadd.f32 %v2196_v35, %v1971_v1 }
 0x1ea   : > { %v2348_v16 = vadd.f32 %v2202_v40, %v5196_v3  ;;  %v2008_v23 = vpop.f32.mrb[115].mxu1 }
 0x1eb   : > { %v2478_v53 = vadd.f32 %v2447_v33, %v2446_v14  ;;  %v2347_v30 = vadd.f32 %v2197_v59, %v5199_v0  ;;  %v3300_v5 = vpop.f32.mrb[100].mxu0 }
 0x1ec   : > { %2380 = vst [vmem:[%s5289_s16 + $0x18] sm:$0xff] %v2348_v16  ;;  %v2212_v45 = vadd.f32 %v3300_v5, %v1986_v15  ;;  %v2206_v2 = vpop.f32.mrb[101].mxu0  ;;  %v2449_v63 = vmul.f32 %v2348_v16, %v2348_v16 }
 0x1ed   : > { %2379 = vst [vmem:[%s5289_s16 + $0x10] sm:$0xff] %v2347_v30  ;;  %v2410_v26 = vadd.f32 %v2409_v4, %v2347_v30  ;;  %v2448_v22 = vmul.f32 %v2347_v30, %v2347_v30  ;;  %v2011_v25 = vpop.f32.mrb[116].mxu1  ;;  %v2207_v20 = vadd.f32 %v2206_v2, %v1981_v55 }
 0x1ee   : > { %v2350_v28 = vadd.f32 %v2212_v45, %v5204_v29  ;;  %v2013_v1 = vpop.f32.mrb[117].mxu1 }
 0x1ef   : > { %v2479_v3 = vadd.f32 %v2478_v53, %v2448_v22  ;;  %v2349_v62 = vadd.f32 %v2207_v20, %v5207_v12  ;;  %v2411_v11 = vadd.f32 %v2410_v26, %v2348_v16  ;;  %v3303_v0 = vpop.f32.mrb[102].mxu0 }
 0x1f0   : > { %2382 = vst [vmem:[%s5289_s16 + $0x28] sm:$0xff] %v2350_v28  ;;  %v2222_v31 = vadd.f32 %v3303_v0, %v1996_v46  ;;  %v2216_v15 = vpop.f32.mrb[103].mxu0  ;;  %v2451_v33 = vmul.f32 %v2350_v28, %v2350_v28 }
 0x1f1   : > { %2381 = vst [vmem:[%s5289_s16 + $0x20] sm:$0xff] %v2349_v62  ;;  %v2412_v41 = vadd.f32 %v2411_v11, %v2349_v62  ;;  %v2450_v57 = vmul.f32 %v2349_v62, %v2349_v62  ;;  %v2480_v9 = vadd.f32 %v2479_v3, %v2449_v63  ;;  %v2016_v60 = vpop.f32.mrb[118].mxu1  ;;  %v2217_v55 = vadd.f32 %v2216_v15, %v1991_v44 }
 0x1f2   : > { %v2352_v29 = vadd.f32 %v2222_v31, %v5212_v37  ;;  %v2018_v24 = vpop.f32.mrb[119].mxu1 }
 0x1f3   : > { %v2481_v40 = vadd.f32 %v2480_v9, %v2450_v57  ;;  %v2351_v12 = vadd.f32 %v2217_v55, %v5215_v10  ;;  %v2413_v35 = vadd.f32 %v2412_v41, %v2350_v28  ;;  %v3306_v4 = vpop.f32.mrb[104].mxu0 }
 0x1f4   : > { %2384 = vst [vmem:[%s5289_s16 + $0x38] sm:$0xff] %v2352_v29  ;;  %v2232_v46 = vadd.f32 %v3306_v4, %v2006_v6  ;;  %v2226_v14 = vpop.f32.mrb[105].mxu0  ;;  %v2453_v5 = vmul.f32 %v2352_v29, %v2352_v29 }
 0x1f5   : > { %2383 = vst [vmem:[%s5289_s16 + $0x30] sm:$0xff] %v2351_v12  ;;  %v2414_v59 = vadd.f32 %v2413_v35, %v2351_v12  ;;  %v2452_v16 = vmul.f32 %v2351_v12, %v2351_v12  ;;  %v2482_v23 = vadd.f32 %v2481_v40, %v2451_v33  ;;  %v2021_v53 = vpop.f32.mrb[120].mxu1  ;;  %v2227_v44 = vadd.f32 %v2226_v14, %v2001_v38 }
 0x1f6   : > { %v2354_v37 = vadd.f32 %v2232_v46, %v5218_v58  ;;  %v2023_v30 = vpop.f32.mrb[121].mxu1 }
 0x1f7   : > { %v2483_v45 = vadd.f32 %v2482_v23, %v2452_v16  ;;  %v2353_v10 = vadd.f32 %v2227_v44, %v5221_v27  ;;  %v2415_v2 = vadd.f32 %v2414_v59, %v2352_v29  ;;  %v3309_v26 = vpop.f32.mrb[106].mxu0 }
 0x1f8   : > { %2386 = vst [vmem:[%s5289_s16 + $0x48] sm:$0xff] %v2354_v37  ;;  %v2242_v6 = vadd.f32 %v3309_v26, %v2016_v60  ;;  %v2236_v22 = vpop.f32.mrb[107].mxu0  ;;  %v2455_v62 = vmul.f32 %v2354_v37, %v2354_v37 }
 0x1f9   : > { %2385 = vst [vmem:[%s5289_s16 + $0x40] sm:$0xff] %v2353_v10  ;;  %v2416_v20 = vadd.f32 %v2415_v2, %v2353_v10  ;;  %v2454_v28 = vmul.f32 %v2353_v10, %v2353_v10  ;;  %v2484_v1 = vadd.f32 %v2483_v45, %v2453_v5  ;;  %v2026_v63 = vpop.f32.mrb[122].mxu1  ;;  %v2237_v38 = vadd.f32 %v2236_v22, %v2011_v25 }
 0x1fa   : > { %v2356_v58 = vadd.f32 %v2242_v6, %v5224_v8  ;;  %v2028_v3 = vpop.f32.mrb[123].mxu1 }
 0x1fb   : > { %v2485_v11 = vadd.f32 %v2484_v1, %v2454_v28  ;;  %v2355_v27 = vadd.f32 %v2237_v38, %v5227_v18  ;;  %v2417_v0 = vadd.f32 %v2416_v20, %v2354_v37  ;;  %v3312_v31 = vpop.f32.mrb[108].mxu0 }
 0x1fc   : > { %2388 = vst [vmem:[%s5289_s16 + $0x58] sm:$0xff] %v2356_v58  ;;  %v2252_v15 = vadd.f32 %v3312_v31, %v2026_v63  ;;  %v2246_v41 = vpop.f32.mrb[109].mxu0  ;;  %v2457_v24 = vmul.f32 %v2356_v58, %v2356_v58 }
 0x1fd   : > { %2387 = vst [vmem:[%s5289_s16 + $0x50] sm:$0xff] %v2355_v27  ;;  %v2418_v57 = vadd.f32 %v2417_v0, %v2355_v27  ;;  %v2456_v9 = vmul.f32 %v2355_v27, %v2355_v27  ;;  %v2486_v60 = vadd.f32 %v2485_v11, %v2455_v62  ;;  %v2031_v55 = vpop.f32.mrb[124].mxu1  ;;  %v2247_v25 = vadd.f32 %v2246_v41, %v2021_v53 }
 0x1fe   : > { %v2358_v8 = vadd.f32 %v2252_v15, %v5230_v32  ;;  %v2033_v29 = vpop.f32.mrb[125].mxu1 }
 0x1ff   : > { %v2487_v33 = vadd.f32 %v2486_v60, %v2456_v9  ;;  %v2357_v18 = vadd.f32 %v2247_v25, %v5233_v56  ;;  %v2419_v40 = vadd.f32 %v2418_v57, %v2356_v58  ;;  %v3315_v12 = vpop.f32.mrb[110].mxu0 }
 0x200   : > { %2390 = vst [vmem:[%s5289_s16 + $0x68] sm:$0xff] %v2358_v8  ;;  %v2256_v35 = vpop.f32.mrb[111].mxu0  ;;  %v2459_v32 = vmul.f32 %v2358_v8, %v2358_v8 }
 0x201   : > { %2389 = vst [vmem:[%s5289_s16 + $0x60] sm:$0xff] %v2357_v18  ;;  %v2420_v4 = vadd.f32 %v2419_v40, %v2357_v18  ;;  %v2458_v46 = vmul.f32 %v2357_v18, %v2357_v18  ;;  %v2488_v14 = vadd.f32 %v2487_v33, %v2457_v24  ;;  %v2036_v59 = vpop.f32.mrb[126].mxu1  ;;  %v2257_v16 = vadd.f32 %v2256_v35, %v2031_v55 }
 0x202   : > { %v2262_v23 = vadd.f32 %v3315_v12, %v2036_v59  ;;  %v2038_v53 = vpop.f32.mrb[127].mxu1 }
 0x203   : > { %v2489_v44 = vadd.f32 %v2488_v14, %v2458_v46  ;;  %v2359_v37 = vadd.f32 %v2257_v16, %v5239_v43  ;;  %v2421_v30 = vadd.f32 %v2420_v4, %v2358_v8  ;;  %v3318_v56 = vpop.f32.mrb[112].mxu0 }
 0x204   : > { %v2360_v5 = vadd.f32 %v2262_v23, %v5236_v52  ;;  %v2266_v45 = vpop.f32.mrb[113].mxu0 }
 0x205   : > { %2391 = vst [vmem:[%s5289_s16 + $0x70] sm:$0xff] %v2359_v37  ;;  %v2422_v10 = vadd.f32 %v2421_v30, %v2359_v37  ;;  %v2460_v2 = vmul.f32 %v2359_v37, %v2359_v37  ;;  %v2490_v26 = vadd.f32 %v2489_v44, %v2459_v32  ;;  %v2041_v6 = vpop.f32.mrb[128].mxu1 }
 0x206   : > { %2392 = vst [vmem:[%s5289_s16 + $0x78] sm:$0xff] %v2360_v5  ;;  %v2267_v22 = vadd.f32 %v2266_v45, %v2041_v6  ;;  %v2043_v20 = vpop.f32.mrb[129].mxu1  ;;  %v2461_v28 = vmul.f32 %v2360_v5, %v2360_v5 }
 0x207   : > { %v2491_v1 = vadd.f32 %v2490_v26, %v2460_v2  ;;  %v2423_v63 = vadd.f32 %v2422_v10, %v2360_v5  ;;  %v3321_v38 = vpop.f32.mrb[114].mxu0 }
 0x208   : > { %v2361_v43 = vadd.f32 %v2267_v22, %v5245_v47  ;;  %v2276_v58 = vpop.f32.mrb[115].mxu0 }
 0x209   : > { %v2492_v3 = vadd.f32 %v2491_v1, %v2461_v28  ;;  %v2046_v52 = vpop.f32.mrb[130].mxu1 }
 0x20a   : > { %2393 = vst [vmem:[%s5289_s16 + $0x80] sm:$0xff] %v2361_v43  ;;  %v2424_v62 = vadd.f32 %v2423_v63, %v2361_v43  ;;  %v2462_v11 = vmul.f32 %v2361_v43, %v2361_v43  ;;  %v2272_v27 = vadd.f32 %v3318_v56, %v2046_v52  ;;  %v2048_v0 = vpop.f32.mrb[131].mxu1 }
 0x20b   : > { %v3324_v31 = vpop.f32.mrb[116].mxu0 }
 0x20c   : > { %v2493_v15 = vadd.f32 %v2492_v3, %v2462_v11  ;;  %v2362_v41 = vadd.f32 %v2272_v27, %v5242_v19  ;;  %v2286_v57 = vpop.f32.mrb[117].mxu0 }
 0x20d   : > { %v2051_v9 = vpop.f32.mrb[132].mxu1 }
 0x20e   : > { %2394 = vst [vmem:[%s5289_s16 + $0x88] sm:$0xff] %v2362_v41  ;;  %v2425_v60 = vadd.f32 %v2424_v62, %v2362_v41  ;;  %v2463_v55 = vmul.f32 %v2362_v41, %v2362_v41  ;;  %v2277_v25 = vadd.f32 %v2276_v58, %v2051_v9  ;;  %v2053_v47 = vpop.f32.mrb[133].mxu1 }
 0x20f   : > { %v3327_v8 = vpop.f32.mrb[118].mxu0 }
 0x210   : > { %v2494_v29 = vadd.f32 %v2493_v15, %v2463_v55  ;;  %v2363_v24 = vadd.f32 %v2277_v25, %v5251_v42  ;;  %v2296_v33 = vpop.f32.mrb[119].mxu0 }
 0x211   : > { %v2056_v18 = vpop.f32.mrb[134].mxu1 }
 0x212   : > { %2395 = vst [vmem:[%s5289_s16 + $0x90] sm:$0xff] %v2363_v24  ;;  %v2426_v40 = vadd.f32 %v2425_v60, %v2363_v24  ;;  %v2464_v12 = vmul.f32 %v2363_v24, %v2363_v24  ;;  %v2282_v35 = vadd.f32 %v3321_v38, %v2056_v18  ;;  %v2058_v4 = vpop.f32.mrb[135].mxu1 }
 0x213   : > { %v3330_v19 = vpop.f32.mrb[120].mxu0 }
 0x214   : > { %v2495_v46 = vadd.f32 %v2494_v29, %v2464_v12  ;;  %v2364_v14 = vadd.f32 %v2282_v35, %v5248_v50  ;;  %v2306_v59 = vpop.f32.mrb[121].mxu0 }
 0x215   : > { %v2061_v16 = vpop.f32.mrb[136].mxu1 }
 0x216   : > { %2396 = vst [vmem:[%s5289_s16 + $0x98] sm:$0xff] %v2364_v14  ;;  %v2427_v23 = vadd.f32 %v2426_v40, %v2364_v14  ;;  %v2465_v53 = vmul.f32 %v2364_v14, %v2364_v14  ;;  %v2287_v32 = vadd.f32 %v2286_v57, %v2061_v16  ;;  %v2063_v44 = vpop.f32.mrb[137].mxu1 }
 0x217   : > { %v3333_v42 = vpop.f32.mrb[122].mxu0 }
 0x218   : > { %v2496_v37 = vadd.f32 %v2495_v46, %v2465_v53  ;;  %v2365_v30 = vadd.f32 %v2287_v32, %v5257_v36  ;;  %v2316_v56 = vpop.f32.mrb[123].mxu0 }
 0x219   : > { %v2066_v5 = vpop.f32.mrb[138].mxu1 }
 0x21a   : > { %2397 = vst [vmem:[%s5289_s16 + $0xa0] sm:$0xff] %v2365_v30  ;;  %v2428_v45 = vadd.f32 %v2427_v23, %v2365_v30  ;;  %v2466_v10 = vmul.f32 %v2365_v30, %v2365_v30  ;;  %v2292_v2 = vadd.f32 %v3324_v31, %v2066_v5  ;;  %v2068_v26 = vpop.f32.mrb[139].mxu1 }
 0x21b   : > { %v5333_v50 = vpop.f32.mrb[124].mxu0 }
 0x21c   : > { %v2497_v6 = vadd.f32 %v2496_v37, %v2466_v10  ;;  %v2366_v22 = vadd.f32 %v2292_v2, %v5254_v61  ;;  %v2326_v20 = vpop.f32.mrb[125].mxu0 }
 0x21d   : > { %v2071_v28 = vpop.f32.mrb[140].mxu1 }
 0x21e   : > { %2398 = vst [vmem:[%s5289_s16 + $0xa8] sm:$0xff] %v2366_v22  ;;  %v2429_v1 = vadd.f32 %v2428_v45, %v2366_v22  ;;  %v2467_v63 = vmul.f32 %v2366_v22, %v2366_v22  ;;  %v2297_v36 = vadd.f32 %v2296_v33, %v2071_v28  ;;  %v2073_v38 = vpop.f32.mrb[141].mxu1 }
 0x21f   : > { %v5337_v43 = vpop.f32.mrb[126].mxu0 }
 0x220   : > { %v2498_v58 = vadd.f32 %v2497_v6, %v2467_v63  ;;  %v2367_v3 = vadd.f32 %v2297_v36, %v5263_v7  ;;  %v2336_v52 = vpop.f32.mrb[127].mxu0 }
 0x221   : > { %v2076_v62 = vpop.f32.mrb[142].mxu1 }
 0x222   : > { %2399 = vst [vmem:[%s5289_s16 + $0xb0] sm:$0xff] %v2367_v3  ;;  %v2430_v11 = vadd.f32 %v2429_v1, %v2367_v3  ;;  %v2468_v27 = vmul.f32 %v2367_v3, %v2367_v3  ;;  %v2302_v61 = vadd.f32 %v3327_v8, %v2076_v62  ;;  %v2078_v0 = vpop.f32.mrb[143].mxu1 }
 0x224   : > { %v2499_v31 = vadd.f32 %v2498_v58, %v2468_v27  ;;  %v2368_v15 = vadd.f32 %v2302_v61, %v5260_v34 }
 0x225   : > { %v2081_v41 = vpop.f32.mrb[144].mxu1 }
 0x226   : > { %2400 = vst [vmem:[%s5289_s16 + $0xb8] sm:$0xff] %v2368_v15  ;;  %v2431_v57 = vadd.f32 %v2430_v11, %v2368_v15  ;;  %v2469_v9 = vmul.f32 %v2368_v15, %v2368_v15  ;;  %v2307_v60 = vadd.f32 %v2306_v59, %v2081_v41  ;;  %v2083_v55 = vpop.f32.mrb[145].mxu1 }
 0x228   : > { %v2500_v25 = vadd.f32 %v2499_v31, %v2469_v9  ;;  %v2369_v7 = vadd.f32 %v2307_v60, %v5269_v17 }
 0x229   : > { %v2086_v47 = vpop.f32.mrb[146].mxu1 }
 0x22a   : > { %2401 = vst [vmem:[%s5289_s16 + $0xc0] sm:$0xff] %v2369_v7  ;;  %v2432_v29 = vadd.f32 %v2431_v57, %v2369_v7  ;;  %v2470_v24 = vmul.f32 %v2369_v7, %v2369_v7  ;;  %v2312_v8 = vadd.f32 %v3330_v19, %v2086_v47  ;;  %v2088_v33 = vpop.f32.mrb[147].mxu1 }
 0x22c   : > { %v2501_v18 = vadd.f32 %v2500_v25, %v2470_v24  ;;  %v2370_v34 = vadd.f32 %v2312_v8, %v5266_v49 }
 0x22d   : > { %v2091_v40 = vpop.f32.mrb[148].mxu1 }
 0x22e   : > { %2402 = vst [vmem:[%s5289_s16 + $0xc8] sm:$0xff] %v2370_v34  ;;  %v2433_v12 = vadd.f32 %v2432_v29, %v2370_v34  ;;  %v2471_v35 = vmul.f32 %v2370_v34, %v2370_v34  ;;  %v2317_v4 = vadd.f32 %v2316_v56, %v2091_v40  ;;  %v2093_v46 = vpop.f32.mrb[149].mxu1 }
 0x230   : > { %v2502_v14 = vadd.f32 %v2501_v18, %v2471_v35  ;;  %v2371_v17 = vadd.f32 %v2317_v4, %v5274_v21 }
 0x231   : > { %v2096_v59 = vpop.f32.mrb[150].mxu1 }
 0x232   : > { %2403 = vst [vmem:[%s5289_s16 + $0xd0] sm:$0xff] %v2371_v17  ;;  %v2434_v16 = vadd.f32 %v2433_v12, %v2371_v17  ;;  %v2472_v23 = vmul.f32 %v2371_v17, %v2371_v17  ;;  %v2322_v19 = vadd.f32 %v3333_v42, %v2096_v59  ;;  %v2098_v53 = vpop.f32.mrb[151].mxu1 }
 0x234   : > { %v2503_v32 = vadd.f32 %v2502_v14, %v2472_v23  ;;  %v2372_v49 = vadd.f32 %v2322_v19, %v5271_v13 }
 0x235   : > { %v2101_v44 = vpop.f32.mrb[152].mxu1 }
 0x236   : > { %2404 = vst [vmem:[%s5289_s16 + $0xd8] sm:$0xff] %v2372_v49  ;;  %v2435_v37 = vadd.f32 %v2434_v16, %v2372_v49  ;;  %v2473_v30 = vmul.f32 %v2372_v49, %v2372_v49  ;;  %v2327_v56 = vadd.f32 %v2326_v20, %v2101_v44  ;;  %v2103_v5 = vpop.f32.mrb[153].mxu1 }
 0x238   : > { %v2504_v45 = vadd.f32 %v2503_v32, %v2473_v30  ;;  %v2373_v21 = vadd.f32 %v2327_v56, %v5278_v51 }
 0x239   : > { %v2106_v10 = vpop.f32.mrb[154].mxu1 }
 0x23a   : > { %2405 = vst [vmem:[%s5289_s16 + $0xe0] sm:$0xff] %v2373_v21  ;;  %v2436_v2 = vadd.f32 %v2435_v37, %v2373_v21  ;;  %v2474_v26 = vmul.f32 %v2373_v21, %v2373_v21  ;;  %v2332_v42 = vadd.f32 %v5333_v50, %v2106_v10  ;;  %v2108_v6 = vpop.f32.mrb[155].mxu1 }
 0x23c   : > { %v2505_v22 = vadd.f32 %v2504_v45, %v2474_v26  ;;  %v2374_v13 = vadd.f32 %v2332_v42, %v5276_v39 }
 0x23d   : > { %v2111_v28 = vpop.f32.mrb[156].mxu1 }
 0x23e   : > { %2406 = vst [vmem:[%s5289_s16 + $0xe8] sm:$0xff] %v2374_v13  ;;  %v2437_v1 = vadd.f32 %v2436_v2, %v2374_v13  ;;  %v2475_v20 = vmul.f32 %v2374_v13, %v2374_v13  ;;  %v2337_v63 = vadd.f32 %v2336_v52, %v2111_v28  ;;  %v2113_v36 = vpop.f32.mrb[157].mxu1 }
 0x240   : > { %v2506_v38 = vadd.f32 %v2505_v22, %v2475_v20  ;;  %v2375_v51 = vadd.f32 %v2337_v63, %v5282_v48 }
 0x241   : > { %v2116_v58 = vpop.f32.mrb[158].mxu1 }
 0x242   : > { %2407 = vst [vmem:[%s5289_s16 + $0xf0] sm:$0xff] %v2375_v51  ;;  %v2438_v3 = vadd.f32 %v2437_v1, %v2375_v51  ;;  %v2476_v62 = vmul.f32 %v2375_v51, %v2375_v51  ;;  %v2342_v50 = vadd.f32 %v5337_v43, %v2116_v58  ;;  %v2118_v11 = vpop.f32.mrb[159].mxu1 }
 0x244   : > { %v2507_v27 = vadd.f32 %v2506_v38, %v2476_v62  ;;  %v2376_v39 = vadd.f32 %v2342_v50, %v5280_v54 }
 0x246   : > { %2408 = vst [vmem:[%s5289_s16 + $0xf8] sm:$0xff] %v2376_v39  ;;  %v2439_v61 = vadd.f32 %v2438_v3, %v2376_v39  ;;  %v2477_v0 = vmul.f32 %v2376_v39, %v2376_v39 }
 0x248   : > { %v2440_v31 = vrot.slane %v2439_v61, 4  ;;  %v2508_v52 = vadd.f32 %v2507_v27, %v2477_v0 }
 0x24a   : > { %v2441_v15 = vadd.f32 %v2440_v31, %v2439_v61  ;;  %v2509_v41 = vrot.slane %v2508_v52, 4 }
 0x24c   : > { %v2442_v57 = vrot.slane %v2441_v15, 2  ;;  %v2510_v48 = vadd.f32 %v2509_v41, %v2508_v52 }
 0x24e   : > { %v2443_v9 = vadd.f32 %v2442_v57, %v2441_v15  ;;  %v2511_v60 = vrot.slane %v2510_v48, 2 }
 0x250   : > { %v2444_v55 = vrot.slane %v2443_v9, 1  ;;  %v2512_v25 = vadd.f32 %v2511_v60, %v2510_v48 }
 0x252   : > { %v2513_v43 = vrot.slane %v2512_v25, 1  ;;  %v2445_v7 = vadd.f32 %v2444_v55, %v2443_v9 }
 0x254   : > { %v2514_v47 = vadd.f32 %v2513_v43, %v2512_v25 }
 0x256   : > { %v2515_v54 = vsel %vm631_vm1, %v2445_v7, %v2514_v47 }
 0x257   : > { %v2517_v29 = vsel %vm2516_vm3, %v2515_v54, 0.0 }
 0x258   : > { %2518 = vst [vmem:[%s288_s19] sm:$0xff] %v2517_v29 }
 0x259 PF: > { %s17_s1 = sadd.s32 1, %s3658_s1   ;;  %s5477_s21 = smov %s3654_s0 }
 0x25a   : > { %p14_p5 = scmp.ge.s32.totalorder %s17_s1, 4   ;;  %s5478_s0 = smov %s5480_s4 }
 0x25c   :  { %16 = sbr.rel (!%p14_p5) target bundleno = 2 (0x2), region = 187 }
 0x263   :  { %2571 = vsyncmov [#allocation3] }
 0x266   :  { %s2572_s20 = vpop.sfrf %2571 }
 0x267   :  { %p2952_p6 = scmp.ne.s32.totalorder %s2572_s20, 0 }
 0x269   :  { %2576 = shalt.err (%p2952_p6)  }
 0x26a   :  { %2578 = vsyncmov [#allocation3 + $0x1] }
 0x26d   :  { %s2579_s22 = vpop.sfrf %2578 }
 0x26e   :  { %p2953_p7 = scmp.ne.s32.totalorder %s2579_s22, 0 }
 0x270   :  { %2583 = shalt.err (%p2953_p7)  }

// kernel: encoder_forward.4
= control target key start
LH: loop header
LB: loop body
LE: loop exit
PB: predicated region body
PF: predicated region fallthrough
CT: control target
= control target key end

     0   :  { %s3791_s21 = smov 0   ;;  %s3793_s22 = smov 0   ;;  %s5555_s0 = inlined_call_operand.vmem [shape: f32[1,1,128], index: 0, kind: input, shape index: {}]   ;;  %s5556_s1 = inlined_call_operand.vmem [shape: f32[1,1,128], index: 1, kind: input, shape index: {}]   ;;  %s5557_s2 = inlined_call_operand.vmem [shape: f32[3,384,128], index: 2, kind: input, shape index: {}]   ;;  %s5558_s3 = inlined_call_operand.vmem [shape: f32[2,16,16,128], index: 3, kind: input, shape index: {}, may-alias: {3,4}]   ;;  %s5559_s4 = inlined_call_operand.vmem [shape: f32[2,16,16,128], index: 4, kind: input, shape index: {}, may-alias: {3,4}]   ;;  %s5560_s5 = inlined_call_operand.vmem [shape: f32[2,16,16,128], index: 5, kind: output, shape index: {0}]   ;;  %s5561_s6 = inlined_call_operand.vmem [shape: f32[2,1,8,128], index: 6, kind: output, shape index: {1}]  }
   0x1   :  { %s3795_s23 = smov 0  }
   0x2 LB: > { %s29_s4 = sadd.s32 1, %s3748_s22  ;;  %p2821_p0 = scmp.ge.s32.totalorder %s3752_s23, 1  ;;  %s3752_s23 = sphi %s3795_s23, %s17_s23   ;;  %s3748_s22 = sphi %s3793_s22, %s5743_s22   ;;  %s3744_s21 = sphi %s3791_s21, %s5742_s21  }
   0x3   : > { %p31_p1 = scmp.ge.s32.totalorder %s29_s4, 2  ;;  %p215_p2 = scmp.lt.s32.totalorder %s3752_s23, 3 }
   0x5   : > { %s5745_s4 = smov (%p31_p1, %s29_s4), 0  ;;  %p216_p3 = pnand %p2821_p0, %p215_p2 }
   0x7   : > { %219 = sbr.rel (%p216_p3) target bundleno = 601 (0x259), region = 36 }
   0xe   : > { %v2834_v0 = vld [vmem:[%s5557_s2 + $0x180] sm:$0xff]  ;;  %v2835_v1 = vld [vmem:[%s5557_s2 + $0x188] sm:$0xff]  ;;  %p261_p4 = scmp.lt.s32.totalorder %s3744_s21, 1  ;;  %v5568_v3 = vmov 0.0|0.0   ;;  %v2836_v6 = vld [vmem:[%s5557_s2 + $0x190] sm:$0xff]  ;;  %vm862_vm0 = vcmask 1046528  }
   0xf   : > { %v2866_v2 = vld [vmem:[%s5557_s2 + $0x280] sm:$0xff]  ;;  %3464 = vmatprep.subr.bf16.mxu0 %v5568_v3  ;;  %v3465_v4 = vpack.c.bf16 %v2835_v1, %v2834_v0  ;;  %v2867_v5 = vld [vmem:[%s5557_s2 + $0x288] sm:$0xff]  ;;  %v2837_v7 = vld [vmem:[%s5557_s2 + $0x198] sm:$0xff]  ;;  %vm753_vm1 = vcmask 1040384   ;;  %vm2638_vm3 = vcmask 1041408  }
  0x10   : > { %v3512_v8 = vpack.c.bf16 %v2867_v5, %v2866_v2  ;;  %v2868_v9 = vld [vmem:[%s5557_s2 + $0x290] sm:$0xff]  ;;  %v2869_v10 = vld [vmem:[%s5557_s2 + $0x298] sm:$0xff]  ;;  %s5747_s21 = smov (!%p261_p4, %s3744_s21), 1  ;;  %v3468_v11 = vpack.c.bf16 %v2837_v7, %v2836_v6  ;;  %v2870_v13 = vld [vmem:[%s5557_s2 + $0x2a0] sm:$0xff] }
  0x11   : > { %3466 = vmatpush1.bf16.msra.mxu0 %v3465_v4  ;;  %v3516_v12 = vpack.c.bf16 %v2869_v10, %v2868_v9  ;;  %v2871_v14 = vld [vmem:[%s5557_s2 + $0x2a8] sm:$0xff]  ;;  %v2838_v15 = vld [vmem:[%s5557_s2 + $0x1a0] sm:$0xff]  ;;  %s3078_s27 = sshll.u32 %s5747_s21, 8  ;;  %v2872_v19 = vld [vmem:[%s5557_s2 + $0x2b0] sm:$0xff] }
  0x12   : > { %3513 = vmatprep.subr.bf16.mxu1 %v3512_v8  ;;  %3467 = vmatprep.subr.bf16.mxu0 %v5568_v3  ;;  %v2839_v16 = vld [vmem:[%s5557_s2 + $0x1a8] sm:$0xff]  ;;  %v3520_v17 = vpack.c.bf16 %v2871_v14, %v2870_v13  ;;  %v2873_v20 = vld [vmem:[%s5557_s2 + $0x2b8] sm:$0xff]  ;;  %s3861_s10 = scalar_lea.vmem %s5558_s3, %s3078_s27  ;;  %v2840_v21 = vld [vmem:[%s5557_s2 + $0x1b0] sm:$0xff]  ;;  %s5469_s25 = scalar_lea.vmem %s5560_s5, %s3078_s27 }
  0x13   : > { %3515 = vmatpush3.bf16.msra.mxu1 %v3512_v8  ;;  %v3471_v18 = vpack.c.bf16 %v2839_v16, %v2838_v15  ;;  %v2841_v22 = vld [vmem:[%s5557_s2 + $0x1b8] sm:$0xff]  ;;  %v3524_v23 = vpack.c.bf16 %v2873_v20, %v2872_v19  ;;  %v2874_v24 = vld [vmem:[%s5557_s2 + $0x2c0] sm:$0xff]  ;;  %v2875_v25 = vld [vmem:[%s5557_s2 + $0x2c8] sm:$0xff]  ;;  %s2826_s27 = sshll.u32 %s5747_s21, 3 }
  0x14   : > { %3517 = vmatprep.subr.bf16.mxu1 %v3516_v12  ;;  %v415_v26 = vld [vmem:[%s3861_s10] sm:$0xff]  ;;  %v3474_v27 = vpack.c.bf16 %v2841_v22, %v2840_v21  ;;  %v416_v28 = vld [vmem:[%s3861_s10 + $0x8] sm:$0xff]  ;;  %v3528_v35 = vpack.c.bf16 %v2875_v25, %v2874_v24  ;;  %v417_v38 = vld [vmem:[%s3861_s10 + $0x10] sm:$0xff]  ;;  %s288_s28 = scalar_lea.vmem %s5561_s6, %s2826_s27 }
  0x15   : > { %3469 = vmatpush1.bf16.msra.mxu0 %v3468_v11  ;;  %v3881_v29 = vld [vmem:[%s5555_s0] ss:$0 sm:$0xff]  ;;  %v2843_v32 = vld [vmem:[%s5557_s2 + $0x1c8] sm:$0xff]  ;;  %v418_v39 = vld [vmem:[%s3861_s10 + $0x18] sm:$0xff] }
  0x16   : > { %3470 = vmatprep.subr.bf16.mxu0 %v5568_v3  ;;  %v3886_v30 = vld [vmem:[%s5556_s1] ss:$0 sm:$0xff]  ;;  %v459_v33 = vmul.f32 %v3881_v29, %v415_v26  ;;  %v460_v34 = vmul.f32 %v3881_v29, %v416_v28  ;;  %v2876_v41 = vld [vmem:[%s5557_s2 + $0x2d0] sm:$0xff]  ;;  %v2877_v42 = vld [vmem:[%s5557_s2 + $0x2d8] sm:$0xff]  ;;  %v461_v47 = vmul.f32 %v3881_v29, %v417_v38  ;;  %v462_v48 = vmul.f32 %v3881_v29, %v418_v39 }
  0x17   : > { %3519 = vmatpush3.bf16.msra.mxu1 %v3516_v12  ;;  %v2842_v31 = vld [vmem:[%s5557_s2 + $0x1c0] sm:$0xff]  ;;  %v2844_v43 = vld [vmem:[%s5557_s2 + $0x1d0] sm:$0xff]  ;;  %v2845_v44 = vld [vmem:[%s5557_s2 + $0x1d8] sm:$0xff]  ;;  %v3532_v49 = vpack.c.bf16 %v2877_v42, %v2876_v41 }
  0x18   : > { %3521 = vmatprep.subr.bf16.mxu1 %v3520_v17  ;;  %v502_v36 = vadd.f32 %v3886_v30, %v459_v33  ;;  %v503_v37 = vadd.f32 %v3886_v30, %v460_v34  ;;  %v3477_v40 = vpack.c.bf16 %v2843_v32, %v2842_v31  ;;  %v2878_v50 = vld [vmem:[%s5557_s2 + $0x2e0] sm:$0xff]  ;;  %v3480_v53 = vpack.c.bf16 %v2845_v44, %v2844_v43  ;;  %v2879_v54 = vld [vmem:[%s5557_s2 + $0x2e8] sm:$0xff]  ;;  %v421_v62 = vld [vmem:[%s3861_s10 + $0x30] sm:$0xff] }
  0x19   : > { %3472 = vmatpush1.bf16.msra.mxu0 %v3471_v18  ;;  %v419_v55 = vld [vmem:[%s3861_s10 + $0x20] sm:$0xff]  ;;  %v420_v56 = vld [vmem:[%s3861_s10 + $0x28] sm:$0xff]  ;;  %v504_v60 = vadd.f32 %v3886_v30, %v461_v47  ;;  %v505_v61 = vadd.f32 %v3886_v30, %v462_v48  ;;  %v422_v63 = vld [vmem:[%s3861_s10 + $0x38] sm:$0xff]  ;;  %v3536_v0 = vpack.c.bf16 %v2879_v54, %v2878_v50  ;;  %v465_v9 = vmul.f32 %v3881_v29, %v421_v62 }
  0x1a   : > { %3473 = vmatprep.subr.bf16.mxu0 %v5568_v3  ;;  %v3914_v45 = vmax.f32 %v502_v36, 0.0  ;;  %v3916_v46 = vmax.f32 %v503_v37, 0.0  ;;  %v2846_v57 = vld [vmem:[%s5557_s2 + $0x1e0] sm:$0xff]  ;;  %v2847_v58 = vld [vmem:[%s5557_s2 + $0x1e8] sm:$0xff]  ;;  %v463_v1 = vmul.f32 %v3881_v29, %v419_v55  ;;  %v464_v2 = vmul.f32 %v3881_v29, %v420_v56  ;;  %v2880_v5 = vld [vmem:[%s5557_s2 + $0x2f0] sm:$0xff] }
  0x1b   : > { %3523 = vmatpush3.bf16.msra.mxu1 %v3520_v17  ;;  %v3483_v4 = vpack.c.bf16 %v2847_v58, %v2846_v57  ;;  %v2881_v6 = vld [vmem:[%s5557_s2 + $0x2f8] sm:$0xff]  ;;  %v2848_v7 = vld [vmem:[%s5557_s2 + $0x1f0] sm:$0xff]  ;;  %v466_v10 = vmul.f32 %v3881_v29, %v422_v63  ;;  %v3966_v11 = vmax.f32 %v504_v60, 0.0  ;;  %v3968_v12 = vmax.f32 %v505_v61, 0.0  ;;  %v423_v16 = vld [vmem:[%s3861_s10 + $0x40] sm:$0xff] }
  0x1c   : > { %3525 = vmatprep.subr.bf16.mxu1 %v3524_v23  ;;  %v866_v51 = vrot.slane %v3914_v45, 1  ;;  %v3925_v52 = vrot.slane %v3916_v46, 1  ;;  %1132 = vmatprep.mubr.f32.mxu0 %v3914_v45  ;;  %v2849_v8 = vld [vmem:[%s5557_s2 + $0x1f8] sm:$0xff]  ;;  %v3540_v13 = vpack.c.bf16 %v2881_v6, %v2880_v5  ;;  %v506_v14 = vadd.f32 %v3886_v30, %v463_v1  ;;  %v424_v17 = vld [vmem:[%s3861_s10 + $0x48] sm:$0xff]  ;;  %v2850_v19 = vld [vmem:[%s5557_s2 + $0x200] sm:$0xff] }
  0x1d   : > { %3475 = vmatpush1.bf16.msra.mxu0 %v3474_v27  ;;  %v507_v15 = vadd.f32 %v3886_v30, %v464_v2  ;;  %v3486_v18 = vpack.c.bf16 %v2849_v8, %v2848_v7  ;;  %v2851_v20 = vld [vmem:[%s5557_s2 + $0x208] sm:$0xff]  ;;  %v508_v21 = vadd.f32 %v3886_v30, %v465_v9  ;;  %v509_v22 = vadd.f32 %v3886_v30, %v466_v10  ;;  %v971_v27 = vld [vmem:[%s5557_s2] sm:$0xff]  ;;  %v425_v34 = vld [vmem:[%s3861_s10 + $0x50] sm:$0xff] }
  0x1e   : > { %3476 = vmatprep.subr.bf16.mxu0 %v5568_v3  ;;  %v3942_v59 = vsel %vm862_vm0, %v866_v51, %v3925_v52  ;;  %v3985_v24 = vrot.slane %v3968_v12, 1  ;;  %v467_v25 = vmul.f32 %v3881_v29, %v423_v16  ;;  %v468_v26 = vmul.f32 %v3881_v29, %v424_v17  ;;  %v972_v28 = vld [vmem:[%s5557_s2 + $0x8] sm:$0xff]  ;;  %v2852_v36 = vld [vmem:[%s5557_s2 + $0x210] sm:$0xff]  ;;  %v2853_v37 = vld [vmem:[%s5557_s2 + $0x218] sm:$0xff] }
  0x1f   : > { %3527 = vmatpush3.bf16.msra.mxu1 %v3524_v23  ;;  %3256 = vmatprep.mubr.f32.mxu1 %v3942_v59  ;;  %v869_v23 = vrot.slane %v3966_v11, 1  ;;  %v3995_v31 = vmax.f32 %v506_v14, 0.0  ;;  %v3997_v32 = vmax.f32 %v507_v15, 0.0  ;;  %v3489_v33 = vpack.c.bf16 %v2851_v20, %v2850_v19  ;;  %v973_v44 = vld [vmem:[%s5557_s2 + $0x10] sm:$0xff]  ;;  %v974_v47 = vld [vmem:[%s5557_s2 + $0x18] sm:$0xff]  ;;  %v428_v55 = vld [vmem:[%s3861_s10 + $0x68] sm:$0xff] }
  0x20   : > { %3529 = vmatprep.subr.bf16.mxu1 %v3528_v35  ;;  %v4008_v38 = vmax.f32 %v508_v21, 0.0  ;;  %v4010_v39 = vmax.f32 %v509_v22, 0.0  ;;  %v510_v42 = vadd.f32 %v3886_v30, %v467_v25  ;;  %v511_v43 = vadd.f32 %v3886_v30, %v468_v26  ;;  %v2854_v56 = vld [vmem:[%s5557_s2 + $0x220] sm:$0xff]  ;;  %v2855_v57 = vld [vmem:[%s5557_s2 + $0x228] sm:$0xff]  ;;  %v429_v8 = vld [vmem:[%s3861_s10 + $0x70] sm:$0xff] }
  0x21   : > { %3478 = vmatpush1.bf16.msra.mxu0 %v3477_v40  ;;  %v3545_v40 = vpack.c.bf16 %v972_v28, %v971_v27  ;;  %v4014_v41 = vsel %vm862_vm0, %v869_v23, %v3985_v24  ;;  %v872_v48 = vrot.slane %v3995_v31, 1  ;;  %v469_v50 = vmul.f32 %v3881_v29, %v425_v34  ;;  %v975_v62 = vld [vmem:[%s5557_s2 + $0x20] sm:$0xff]  ;;  %v976_v63 = vld [vmem:[%s5557_s2 + $0x28] sm:$0xff]  ;;  %v430_v10 = vld [vmem:[%s3861_s10 + $0x78] sm:$0xff] }
  0x22   : > { %3479 = vmatprep.subr.bf16.mxu0 %v5568_v3  ;;  %v3492_v54 = vpack.c.bf16 %v2853_v37, %v2852_v36  ;;  %v875_v58 = vrot.slane %v4008_v38, 1  ;;  %v4044_v60 = vrot.slane %v4010_v39, 1  ;;  %v3548_v61 = vpack.c.bf16 %v974_v47, %v973_v44  ;;  %v2856_v15 = vld [vmem:[%s5557_s2 + $0x230] sm:$0xff]  ;;  %v2857_v16 = vld [vmem:[%s5557_s2 + $0x238] sm:$0xff]  ;;  %v431_v17 = vld [vmem:[%s3861_s10 + $0x80] sm:$0xff] }
  0x23   : > { %3531 = vmatpush3.bf16.msra.mxu1 %v3528_v35  ;;  %v426_v35 = vld [vmem:[%s3861_s10 + $0x58] sm:$0xff]  ;;  %v4055_v1 = vmax.f32 %v511_v43, 0.0  ;;  %v512_v5 = vadd.f32 %v3886_v30, %v469_v50  ;;  %v472_v7 = vmul.f32 %v3881_v29, %v428_v55  ;;  %v3495_v9 = vpack.c.bf16 %v2855_v57, %v2854_v56  ;;  %v432_v25 = vld [vmem:[%s3861_s10 + $0x88] sm:$0xff]  ;;  %v2858_v26 = vld [vmem:[%s5557_s2 + $0x240] sm:$0xff] }
  0x24   : > { %3533 = vmatprep.subr.bf16.mxu1 %v3532_v49  ;;  %v470_v51 = vmul.f32 %v3881_v29, %v426_v35  ;;  %5639 = vst [vmem:[#allocation6_spill] sm:$0xff] %v4044_v60  ;;  %v4073_v14 = vsel %vm862_vm0, %v875_v58, %v4044_v60  ;;  %v978_v19 = vld [vmem:[%s5557_s2 + $0x38] sm:$0xff]  ;;  %v473_v23 = vmul.f32 %v3881_v29, %v429_v8  ;;  %v2859_v27 = vld [vmem:[%s5557_s2 + $0x248] sm:$0xff]  ;;  %v4112_v37 = vld [vmem:[%s5557_s2 + $0x40] sm:$0xff] }
  0x25   : > { %3481 = vmatpush1.bf16.msra.mxu0 %v3480_v53  ;;  %v427_v53 = vld [vmem:[%s3861_s10 + $0x60] sm:$0xff]  ;;  %5641 = vst [vmem:[#allocation8_spill] sm:$0xff] %v4055_v1  ;;  %v4091_v21 = vrot.slane %v4055_v1, 1  ;;  %v4103_v28 = vmax.f32 %v512_v5, 0.0  ;;  %v515_v34 = vadd.f32 %v3886_v30, %v472_v7  ;;  %v474_v35 = vmul.f32 %v3881_v29, %v430_v10  ;;  %v980_v43 = vld [vmem:[%s5557_s2 + $0x48] sm:$0xff]  ;;  %v433_v47 = vld [vmem:[%s3861_s10 + $0x90] sm:$0xff] }
  0x26   : > { %3482 = vmatprep.subr.bf16.mxu0 %v5568_v3  ;;  %v471_v2 = vmul.f32 %v3881_v29, %v427_v53  ;;  %v513_v6 = vadd.f32 %v3886_v30, %v470_v51  ;;  %v3498_v36 = vpack.c.bf16 %v2857_v16, %v2856_v15  ;;  %v476_v44 = vmul.f32 %v3881_v29, %v432_v25  ;;  %v434_v55 = vld [vmem:[%s3861_s10 + $0x98] sm:$0xff]  ;;  %v444_v25 = vld [vmem:[%s3861_s10 + $0xe8] sm:$0xff]  ;;  %vm4319_vm2 = vmneg %vm753_vm1 }
  0x27   : > { %3535 = vmatpush3.bf16.msra.mxu1 %v3532_v49  ;;  %v4027_v49 = vrot.slane %v3997_v32, 1  ;;  %5642 = vst [vmem:[#allocation9_spill] sm:$0xff] %v4091_v21  ;;  %5643 = vst [vmem:[#allocation10_spill] sm:$0xff] %v4103_v28  ;;  %v3501_v51 = vpack.c.bf16 %v2859_v27, %v2858_v26  ;;  %v442_v56 = vld [vmem:[%s3861_s10 + $0xd8] sm:$0xff]  ;;  %v881_v57 = vrot.slane %v4103_v28, 1  ;;  %v3557_v5 = vpack.c.bf16 %v980_v43, %v4112_v37  ;;  %v445_v37 = vld [vmem:[%s3861_s10 + $0xf0] sm:$0xff] }
  0x28   : > { %3537 = vmatprep.subr.bf16.mxu1 %v3536_v0  ;;  %v514_v22 = vadd.f32 %v3886_v30, %v471_v2  ;;  %v517_v2 = vadd.f32 %v3886_v30, %v474_v35  ;;  %v477_v7 = vmul.f32 %v3881_v29, %v433_v47  ;;  %v982_v10 = vld [vmem:[%s5557_s2 + $0x58] sm:$0xff]  ;;  %v478_v15 = vmul.f32 %v3881_v29, %v434_v55  ;;  %v436_v35 = vld [vmem:[%s3861_s10 + $0xa8] sm:$0xff] }
  0x29   : > { %3484 = vmatpush1.bf16.msra.mxu0 %v3483_v4  ;;  %v4061_v4 = vsel %vm862_vm0, %v872_v48, %v4027_v49  ;;  %v441_v48 = vld [vmem:[%s3861_s10 + $0xd0] sm:$0xff]  ;;  %v486_v16 = vmul.f32 %v3881_v29, %v442_v56  ;;  %v446_v47 = vld [vmem:[%s3861_s10 + $0xf8] sm:$0xff] }
  0x2a   : > { %3485 = vmatprep.subr.bf16.mxu0 %v5568_v3  ;;  %v4129_v53 = vmax.f32 %v514_v22, 0.0  ;;  %v485_v8 = vmul.f32 %v3881_v29, %v441_v48  ;;  %v435_v22 = vld [vmem:[%s3861_s10 + $0xa0] sm:$0xff]  ;;  %v520_v43 = vadd.f32 %v3886_v30, %v477_v7  ;;  %v521_v55 = vadd.f32 %v3886_v30, %v478_v15 }
  0x2b   : > { %3539 = vmatpush3.bf16.msra.mxu1 %v3536_v0  ;;  %v4053_v0 = vmax.f32 %v510_v42, 0.0  ;;  %v2862_v48 = vld [vmem:[%s5557_s2 + $0x260] sm:$0xff]  ;;  %v479_v56 = vmul.f32 %v3881_v29, %v435_v22 }
  0x2c   : > { %3541 = vmatprep.subr.bf16.mxu1 %v3540_v13 }
  0x2d   : > { %3487 = vmatpush1.bf16.msra.mxu0 %v3486_v18  ;;  %5640 = vst [vmem:[#allocation7_spill] sm:$0xff] %v4053_v0  ;;  %v977_v18 = vld [vmem:[%s5557_s2 + $0x30] sm:$0xff]  ;;  %v878_v20 = vrot.slane %v4053_v0, 1 }
  0x2e   : > { %3488 = vmatprep.subr.bf16.mxu0 %v5568_v3  ;;  %v3554_v42 = vpack.c.bf16 %v978_v19, %v977_v18  ;;  %v884_v19 = vrot.slane %v4129_v53, 1 }
  0x2f   : > { %3543 = vmatpush3.bf16.msra.mxu1 %v3540_v13  ;;  %v3551_v13 = vpack.c.bf16 %v976_v63, %v975_v62  ;;  %v4127_v50 = vsel %vm862_vm0, %v878_v20, %v4091_v21  ;;  %v2861_v62 = vld [vmem:[%s5557_s2 + $0x258] sm:$0xff]  ;;  %v4145_v63 = vmax.f32 %v515_v34, 0.0  ;;  %v4182_v34 = vmax.f32 %v517_v2, 0.0 }
  0x30   : > { %3544 = vmatprep.subr.bf16.mxu1 %v5568_v3  ;;  %5645 = vst [vmem:[#allocation12_spill] sm:$0xff] %v4127_v50 }
  0x31   : > { %3490 = vmatpush1.bf16.msra.mxu0 %v3489_v33  ;;  %v4105_v33 = vmax.f32 %v513_v6, 0.0  ;;  %v4180_v27 = vrot.slane %v4145_v63, 1 }
  0x32   : > { %3257 = vmatmul.mubr.msk.f32.vlgmr.msra.gmra.mrb[0].mxu1 %vm862_vm0, %v3925_v52  ;;  %3491 = vmatprep.subr.bf16.mxu0 %v5568_v3 }
  0x33   : > { %3546 = vmatpush1.bf16.msra.mxu1 %v3545_v40  ;;  %3259 = vmatprep.mubr.f32.mxu1 %v4014_v41  ;;  %5644 = vst [vmem:[#allocation11_spill] sm:$0xff] %v4105_v33  ;;  %v475_v40 = vmul.f32 %v3881_v29, %v431_v17  ;;  %v4137_v58 = vrot.slane %v4105_v33, 1  ;;  %v443_v17 = vld [vmem:[%s3861_s10 + $0xe0] sm:$0xff]  ;;  %5648 = vst [vmem:[#allocation15_spill] sm:$0xff] %v4180_v27 }
  0x34   : > { %3547 = vmatprep.subr.bf16.mxu1 %v5568_v3 }
  0x35   : > { %3493 = vmatpush1.bf16.msra.mxu0 %v3492_v54  ;;  %v516_v54 = vadd.f32 %v3886_v30, %v473_v23  ;;  %5646 = vst [vmem:[#allocation13_spill] sm:$0xff] %v4137_v58  ;;  %v518_v6 = vadd.f32 %v3886_v30, %v475_v40  ;;  %v4171_v23 = vadd.f32 %v3886_v30, %v485_v8 }
  0x36   : > { %3260 = vmatmul.mubr.msk.f32.gmra.mrb[2].mxu1 %vm862_vm0, %v3985_v24  ;;  %3494 = vmatprep.subr.bf16.mxu0 %v5568_v3  ;;  %v4177_v26 = vsel %vm862_vm0, %v881_v57, %v4137_v58  ;;  %v488_v57 = vmul.f32 %v3881_v29, %v444_v25  ;;  %v4224_v8 = vsel %vm862_vm0, %v884_v19, %v4180_v27  ;;  %v2864_v25 = vld [vmem:[%s5557_s2 + $0x270] sm:$0xff] }
  0x37   : > { %3549 = vmatpush1.bf16.msra.mxu1 %v3548_v61  ;;  %3262 = vmatprep.mubr.f32.mxu1 %v4061_v4  ;;  %v2860_v61 = vld [vmem:[%s5557_s2 + $0x250] sm:$0xff]  ;;  %v4167_v20 = vmax.f32 %v516_v54, 0.0  ;;  %5647 = vst [vmem:[#allocation14_spill] sm:$0xff] %v4177_v26  ;;  %5649 = vst [vmem:[#allocation16_spill] sm:$0xff] %v4224_v8 }
  0x38   : > { %3550 = vmatprep.subr.bf16.mxu1 %v5568_v3  ;;  %v3504_v18 = vpack.c.bf16 %v2861_v62, %v2860_v61  ;;  %v983_v61 = vld [vmem:[%s5557_s2 + $0x60] sm:$0xff]  ;;  %v984_v62 = vld [vmem:[%s5557_s2 + $0x68] sm:$0xff] }
  0x39   : > { %3496 = vmatpush1.bf16.msra.mxu0 %v3495_v9  ;;  %v981_v9 = vld [vmem:[%s5557_s2 + $0x50] sm:$0xff]  ;;  %v887_v2 = vrot.slane %v4167_v20, 1  ;;  %v3563_v19 = vpack.c.bf16 %v984_v62, %v983_v61  ;;  %v522_v61 = vadd.f32 %v3886_v30, %v479_v56 }
  0x3a   : > { %3263 = vmatmul.mubr.msk.f32.gmra.mrb[4].mxu1 %vm862_vm0, %v4027_v49  ;;  %3497 = vmatprep.subr.bf16.mxu0 %v5568_v3  ;;  %v3560_v40 = vpack.c.bf16 %v982_v10, %v981_v9  ;;  %v4227_v9 = vrot.slane %v4182_v34, 1  ;;  %v4230_v10 = vadd.f32 %v3886_v30, %v488_v57  ;;  %v4263_v57 = vmax.f32 %v521_v55, 0.0 }
  0x3b   : > { %3552 = vmatpush1.bf16.msra.mxu1 %v3551_v13  ;;  %3265 = vmatprep.mubr.f32.mxu1 %v4073_v14  ;;  %v519_v13 = vadd.f32 %v3886_v30, %v476_v44  ;;  %v487_v44 = vmul.f32 %v3881_v29, %v443_v17  ;;  %v438_v17 = vld [vmem:[%s3861_s10 + $0xb8] sm:$0xff] }
  0x3c   : > { %3553 = vmatprep.subr.bf16.mxu1 %v5568_v3  ;;  %5650 = vst [vmem:[#allocation17_spill] sm:$0xff] %v4227_v9  ;;  %5653 = vst [vmem:[#allocation20_spill] sm:$0xff] %v4263_v57  ;;  %v482_v56 = vmul.f32 %v3881_v29, %v438_v17  ;;  %v4295_v17 = vrot.slane %v4263_v57, 1 }
  0x3d   : > { %3499 = vmatpush1.bf16.msra.mxu0 %v3498_v36  ;;  %v4186_v36 = vadd.f32 %v3886_v30, %v486_v16  ;;  %v4203_v54 = vmax.f32 %v519_v13, 0.0  ;;  %v4218_v7 = vadd.f32 %v3886_v30, %v487_v44  ;;  %v490_v13 = vmul.f32 %v3881_v29, %v446_v47  ;;  %v437_v16 = vld [vmem:[%s3861_s10 + $0xb0] sm:$0xff] }
  0x3e   : > { %3266 = vmatmul.mubr.msk.f32.gmra.mrb[6].mxu1 %vm862_vm0, %v4044_v60  ;;  %3500 = vmatprep.subr.bf16.mxu0 %v5568_v3  ;;  %v481_v55 = vmul.f32 %v3881_v29, %v437_v16  ;;  %5656 = vst [vmem:[#allocation23_spill] sm:$0xff] %v4295_v17  ;;  %v1018_v60 = vld [vmem:[%s5557_s2 + $0x178] sm:$0xff] }
  0x3f   : > { %3555 = vmatpush1.bf16.msra.mxu1 %v3554_v42  ;;  %3268 = vmatprep.mubr.f32.mxu1 %v4127_v50  ;;  %v4189_v42 = vmax.f32 %v518_v6, 0.0  ;;  %v480_v6 = vmul.f32 %v3881_v29, %v436_v35  ;;  %v985_v35 = vld [vmem:[%s5557_s2 + $0x70] sm:$0xff]  ;;  %v4252_v44 = vrot.slane %v4203_v54, 1  ;;  %v4255_v47 = vadd.f32 %v3886_v30, %v490_v13  ;;  %v439_v13 = vld [vmem:[%s3861_s10 + $0xc0] sm:$0xff] }
  0x40   : > { %3556 = vmatprep.subr.bf16.mxu1 %v5568_v3 }
  0x41   : > { %3502 = vmatpush1.bf16.msra.mxu0 %v3501_v51  ;;  %v2863_v51 = vld [vmem:[%s5557_s2 + $0x268] sm:$0xff]  ;;  %5651 = vst [vmem:[#allocation18_spill] sm:$0xff] %v4252_v44  ;;  %v523_v62 = vadd.f32 %v3886_v30, %v480_v6 }
  0x42   : > { %3269 = vmatmul.mubr.msk.f32.gmra.mrb[8].mxu1 %vm862_vm0, %v4091_v21  ;;  %3503 = vmatprep.subr.bf16.mxu0 %v5568_v3  ;;  %v3507_v15 = vpack.c.bf16 %v2863_v51, %v2862_v48  ;;  %v986_v48 = vld [vmem:[%s5557_s2 + $0x78] sm:$0xff]  ;;  %v4261_v51 = vmax.f32 %v520_v43, 0.0  ;;  %v4276_v43 = vsel %vm862_vm0, %v887_v2, %v4227_v9 }
  0x43   : > { %3558 = vmatpush1.bf16.msra.mxu1 %v3557_v5  ;;  %3271 = vmatprep.mubr.f32.mxu1 %v4177_v26  ;;  %v489_v5 = vmul.f32 %v3881_v29, %v445_v37  ;;  %v890_v37 = vrot.slane %v4189_v42, 1  ;;  %5654 = vst [vmem:[#allocation21_spill] sm:$0xff] %v4276_v43  ;;  %v4286_v26 = vrot.slane %v3914_v45, 7 }
  0x44   : > { %3559 = vmatprep.subr.bf16.mxu1 %v5568_v3  ;;  %5652 = vst [vmem:[#allocation19_spill] sm:$0xff] %v4261_v51 }
  0x45   : > { %3505 = vmatpush1.bf16.msra.mxu0 %v3504_v18  ;;  %v4236_v22 = vadd.f32 %v3886_v30, %v489_v5  ;;  %v2865_v18 = vld [vmem:[%s5557_s2 + $0x278] sm:$0xff]  ;;  %v1004_v5 = vld [vmem:[%s5557_s2 + $0x108] sm:$0xff]  ;;  %v4290_v2 = vsel %vm862_vm0, %v890_v37, %v4252_v44 }
  0x46   : > { %3272 = vmatmul.mubr.msk.f32.gmra.mrb[10].mxu1 %vm862_vm0, %v4137_v58  ;;  %3506 = vmatprep.subr.bf16.mxu0 %v5568_v3  ;;  %v3510_v6 = vpack.c.bf16 %v2865_v18, %v2864_v25  ;;  %v3566_v58 = vpack.c.bf16 %v986_v48, %v985_v35  ;;  %5655 = vst [vmem:[#allocation22_spill] sm:$0xff] %v4290_v2  ;;  %v4297_v25 = vmax.f32 %v522_v61, 0.0  ;;  %v4299_v18 = vmax.f32 %v523_v62, 0.0  ;;  %v1005_v35 = vld [vmem:[%s5557_s2 + $0x110] sm:$0xff]  ;;  %v1006_v37 = vld [vmem:[%s5557_s2 + $0x118] sm:$0xff]  ;;  %v988_v48 = vld [vmem:[%s5557_s2 + $0x88] sm:$0xff] }
  0x47   : > { %3561 = vmatpush1.bf16.msra.mxu1 %v3560_v40  ;;  %3274 = vmatprep.mubr.f32.mxu1 %v4224_v8  ;;  %v1003_v40 = vld [vmem:[%s5557_s2 + $0x100] sm:$0xff]  ;;  %v440_v8 = vld [vmem:[%s3861_s10 + $0xc8] sm:$0xff]  ;;  %v524_v61 = vadd.f32 %v3886_v30, %v481_v55  ;;  %v525_v62 = vadd.f32 %v3886_v30, %v482_v56 }
  0x48   : > { %3562 = vmatprep.subr.bf16.mxu1 %v5568_v3  ;;  %v3592_v16 = vpack.c.bf16 %v1004_v5, %v1003_v40  ;;  %v483_v40 = vmul.f32 %v3881_v29, %v439_v13  ;;  %v484_v5 = vmul.f32 %v3881_v29, %v440_v8  ;;  %v896_v8 = vrot.slane %v4297_v25, 1 }
  0x49   : > { %3508 = vmatpush1.bf16.msra.mxu0 %v3507_v15  ;;  %v893_v15 = vrot.slane %v4261_v51, 1  ;;  %v4333_v56 = vrot.slane %v4299_v18, 1  ;;  %v5661_v13 = vmov 0.0|0.0  }
  0x4a   : > { %3275 = vmatmul.mubr.msk.f32.gmra.mrb[12].mxu1 %vm862_vm0, %v4180_v27  ;;  %3509 = vmatprep.subr.bf16.mxu0 %v5568_v3  ;;  %v3596_v27 = vpack.c.bf16 %v1006_v37, %v1005_v35  ;;  %v990_v35 = vld [vmem:[%s5557_s2 + $0x98] sm:$0xff]  ;;  %v4351_v37 = vmax.f32 %v524_v61, 0.0 }
  0x4b   : > { %3564 = vmatpush1.bf16.msra.mxu1 %v3563_v19  ;;  %3277 = vmatprep.mubr.f32.mxu1 %v4276_v43  ;;  %v987_v19 = vld [vmem:[%s5557_s2 + $0x80] sm:$0xff]  ;;  %v758_v43 = vrot.slane %v3916_v46, 7  ;;  %v4329_v29 = vsel %vm862_vm0, %v893_v15, %v4295_v17  ;;  %5660 = vst [vmem:[#allocation25_spill] sm:$0xff] %v4333_v56  ;;  %v989_v15 = vld [vmem:[%s5557_s2 + $0x90] sm:$0xff] }
  0x4c   : > { %3565 = vmatprep.subr.bf16.mxu1 %v5568_v3  ;;  %v3569_v55 = vpack.c.bf16 %v988_v48, %v987_v19  ;;  %5659 = vst [vmem:[#allocation24_spill] sm:$0xff] %v4329_v29  ;;  %v4353_v19 = vmax.f32 %v525_v62, 0.0  ;;  %v526_v48 = vadd.f32 %v3886_v30, %v483_v40  ;;  %v3572_v61 = vpack.c.bf16 %v990_v35, %v989_v15  ;;  %v991_v40 = vld [vmem:[%s5557_s2 + $0xa0] sm:$0xff] }
  0x4d   : > { %3511 = vmatpush1.bf16.msra.mxu0 %v3510_v6  ;;  %v1007_v6 = vld [vmem:[%s5557_s2 + $0x120] sm:$0xff]  ;;  %v4366_v62 = vrot.slane %v3966_v11, 7  ;;  %v761_v15 = vrot.slane %v3968_v12, 7 }
  0x4e   : > { %3278 = vmatmul.mubr.msk.f32.gmra.mrb[14].mxu1 %vm862_vm0, %v4227_v9  ;;  %3593 = vmatprep.subr.bf16.mxu0 %v3592_v16  ;;  %v4360_v9 = vsel %vm753_vm1, %v4286_v26, %v758_v43  ;;  %v1009_v43 = vld [vmem:[%s5557_s2 + $0x130] sm:$0xff] }
  0x4f   : > { %3567 = vmatpush1.bf16.msra.mxu1 %v3566_v58  ;;  %3280 = vmatprep.mubr.f32.mxu1 %v4290_v2  ;;  %v1008_v58 = vld [vmem:[%s5557_s2 + $0x128] sm:$0xff]  ;;  %v527_v2 = vadd.f32 %v3886_v30, %v484_v5  ;;  %v4370_v30 = vsel %vm862_vm0, %v896_v8, %v4333_v56  ;;  %v4388_v8 = vrot.slane %v4353_v19, 1 }
  0x50   : > { %2883 = vmatmul.mubr.msk.f32.vlgmr.msra.gmra.mrb[0].mxu0 %vm4319_vm2, %v4286_v26  ;;  %3568 = vmatprep.subr.bf16.mxu1 %v5661_v13  ;;  %v3600_v21 = vpack.c.bf16 %v1008_v58, %v1007_v6  ;;  %5662 = vst [vmem:[#allocation26_spill] sm:$0xff] %v4370_v30  ;;  %v992_v5 = vld [vmem:[%s5557_s2 + $0xa8] sm:$0xff]  ;;  %v4390_v6 = vmax.f32 %v526_v48, 0.0  ;;  %v1011_v48 = vld [vmem:[%s5557_s2 + $0x140] sm:$0xff] }
  0x51   : > { %1137 = vmatprep.mubr.f32.mxu0 %v3916_v46  ;;  %3595 = vmatpush3.bf16.msra.mxu0 %v3592_v16  ;;  %v1010_v16 = vld [vmem:[%s5557_s2 + $0x138] sm:$0xff]  ;;  %5663 = vst [vmem:[#allocation27_spill] sm:$0xff] %v4388_v8  ;;  %v4392_v58 = vmax.f32 %v527_v2, 0.0  ;;  %v4403_v2 = vmax.f32 %v4186_v36, 0.0  ;;  %v993_v36 = vld [vmem:[%s5557_s2 + $0xb0] sm:$0xff] }
  0x52   : > { %3281 = vmatmul.mubr.msk.f32.gmra.mrb[16].mxu1 %vm862_vm0, %v4252_v44  ;;  %3597 = vmatprep.subr.bf16.mxu0 %v3596_v27  ;;  %v3604_v35 = vpack.c.bf16 %v1010_v16, %v1009_v43  ;;  %v4400_v44 = vmax.f32 %v4171_v23, 0.0  ;;  %v902_v43 = vrot.slane %v4390_v6, 1 }
  0x53   : > { %3570 = vmatpush1.bf16.msra.mxu1 %v3569_v55  ;;  %3283 = vmatprep.mubr.f32.mxu1 %v4329_v29  ;;  %v899_v55 = vrot.slane %v4351_v37, 1  ;;  %5664 = vst [vmem:[#allocation28_spill] sm:$0xff] %v4392_v58  ;;  %v3575_v29 = vpack.c.bf16 %v992_v5, %v991_v40  ;;  %5666 = vst [vmem:[#allocation30_spill] sm:$0xff] %v4403_v2  ;;  %v4427_v16 = vrot.slane %v4392_v58, 1 }
  0x54   : > { %1138 = vmatmul.mubr.f32.gmra.mrb[2].mxu0 %v4360_v9  ;;  %3571 = vmatprep.subr.bf16.mxu1 %v5661_v13  ;;  %5665 = vst [vmem:[#allocation29_spill] sm:$0xff] %v4400_v44  ;;  %v4432_v40 = vsel %vm753_vm1, %v4366_v62, %v761_v15  ;;  %v1013_v15 = vld [vmem:[%s5557_s2 + $0x150] sm:$0xff] }
  0x55   : > { %1142 = vmatprep.mubr.f32.mxu0 %v3966_v11  ;;  %3599 = vmatpush3.bf16.msra.mxu0 %v3596_v27  ;;  %v1012_v27 = vld [vmem:[%s5557_s2 + $0x148] sm:$0xff]  ;;  %v4417_v23 = vsel %vm862_vm0, %v899_v55, %v4388_v8  ;;  %5668 = vst [vmem:[#allocation32_spill] sm:$0xff] %v4427_v16 }
  0x56   : > { %3284 = vmatmul.mubr.msk.f32.gmra.mrb[18].mxu1 %vm862_vm0, %v4295_v17  ;;  %3601 = vmatprep.subr.bf16.mxu0 %v3600_v21  ;;  %5667 = vst [vmem:[#allocation31_spill] sm:$0xff] %v4417_v23  ;;  %v3608_v5 = vpack.c.bf16 %v1012_v27, %v1011_v48  ;;  %v4439_v17 = vrot.slane %v4403_v2, 1  ;;  %v4454_v48 = vsel %vm862_vm0, %v902_v43, %v4427_v16  ;;  %v995_v27 = vld [vmem:[%s5557_s2 + $0xc0] sm:$0xff] }
  0x57   : > { %3573 = vmatpush1.bf16.msra.mxu1 %v3572_v61  ;;  %3286 = vmatprep.mubr.f32.mxu1 %v4370_v30  ;;  %v994_v61 = vld [vmem:[%s5557_s2 + $0xb8] sm:$0xff]  ;;  %v905_v30 = vrot.slane %v4400_v44, 1  ;;  %5670 = vst [vmem:[#allocation34_spill] sm:$0xff] %v4454_v48 }
  0x58   : > { %2885 = vmatmul.mubr.msk.f32.gmra.mrb[4].mxu0 %vm4319_vm2, %v4366_v62  ;;  %3574 = vmatprep.subr.bf16.mxu1 %v5661_v13  ;;  %v3578_v55 = vpack.c.bf16 %v994_v61, %v993_v36  ;;  %5669 = vst [vmem:[#allocation33_spill] sm:$0xff] %v4439_v17  ;;  %v996_v36 = vld [vmem:[%s5557_s2 + $0xc8] sm:$0xff]  ;;  %v4463_v61 = vmax.f32 %v4218_v7, 0.0 }
  0x59   : > { %1147 = vmatprep.mubr.f32.mxu0 %v3968_v12  ;;  %3603 = vmatpush3.bf16.msra.mxu0 %v3600_v21  ;;  %v1014_v21 = vld [vmem:[%s5557_s2 + $0x158] sm:$0xff]  ;;  %v3581_v50 = vpack.c.bf16 %v996_v36, %v995_v27  ;;  %v4475_v7 = vsel %vm862_vm0, %v905_v30, %v4439_v17  ;;  %v4498_v27 = vmax.f32 %v4236_v22, 0.0  ;;  %v4501_v36 = vmax.f32 %v4255_v47, 0.0  ;;  %v1017_v47 = vld [vmem:[%s5557_s2 + $0x170] sm:$0xff] }
  0x5a   : > { %3287 = vmatmul.mubr.msk.f32.gmra.mrb[20].mxu1 %vm862_vm0, %v4333_v56  ;;  %3605 = vmatprep.subr.bf16.mxu0 %v3604_v35  ;;  %5671 = vst [vmem:[#allocation35_spill] sm:$0xff] %v4463_v61  ;;  %v764_v56 = vrot.slane %v3997_v32, 7  ;;  %v3612_v43 = vpack.c.bf16 %v1014_v21, %v1013_v15  ;;  %5673 = vst [vmem:[#allocation37_spill] sm:$0xff] %v4475_v7  ;;  %v998_v30 = vld [vmem:[%s5557_s2 + $0xd8] sm:$0xff]  ;;  %v908_v15 = vrot.slane %v4463_v61, 1 }
  0x5b   : > { %3576 = vmatpush1.bf16.msra.mxu1 %v3575_v29  ;;  %3289 = vmatprep.mubr.f32.mxu1 %v4417_v23  ;;  %v4450_v29 = vrot.slane %v3995_v31, 7  ;;  %v4466_v23 = vmax.f32 %v4230_v10, 0.0  ;;  %v1015_v10 = vld [vmem:[%s5557_s2 + $0x160] sm:$0xff]  ;;  %5675 = vst [vmem:[#allocation39_spill] sm:$0xff] %v4498_v27  ;;  %5676 = vst [vmem:[#allocation40_spill] sm:$0xff] %v4501_v36 }
  0x5c   : > { %1148 = vmatmul.mubr.f32.gmra.mrb[6].mxu0 %v4432_v40  ;;  %3577 = vmatprep.subr.bf16.mxu1 %v5661_v13 }
  0x5d   : > { %5672 = vst [vmem:[#allocation36_spill] sm:$0xff] %v4466_v23  ;;  %1152 = vmatprep.mubr.f32.mxu0 %v3995_v31  ;;  %3607 = vmatpush3.bf16.msra.mxu0 %v3604_v35  ;;  %v1016_v35 = vld [vmem:[%s5557_s2 + $0x168] sm:$0xff]  ;;  %v4495_v21 = vrot.slane %v4466_v23, 1 }
  0x5e   : > { %3290 = vmatmul.mubr.msk.f32.gmra.mrb[22].mxu1 %vm862_vm0, %v4388_v8  ;;  %3609 = vmatprep.subr.bf16.mxu0 %v3608_v5  ;;  %v3616_v8 = vpack.c.bf16 %v1016_v35, %v1015_v10  ;;  %v1000_v10 = vld [vmem:[%s5557_s2 + $0xe8] sm:$0xff]  ;;  %v911_v35 = vrot.slane %v4498_v27, 1 }
  0x5f   : > { %3579 = vmatpush1.bf16.msra.mxu1 %v3578_v55  ;;  %3292 = vmatprep.mubr.f32.mxu1 %v4454_v48  ;;  %v997_v55 = vld [vmem:[%s5557_s2 + $0xd0] sm:$0xff]  ;;  %5674 = vst [vmem:[#allocation38_spill] sm:$0xff] %v4495_v21  ;;  %v4506_v48 = vsel %vm753_vm1, %v4450_v29, %v764_v56  ;;  %v4520_v56 = vrot.slane %v4008_v38, 7 }
  0x60   : > { %2887 = vmatmul.mubr.msk.f32.gmra.mrb[8].mxu0 %vm4319_vm2, %v4450_v29  ;;  %3580 = vmatprep.subr.bf16.mxu1 %v5661_v13  ;;  %v3584_v22 = vpack.c.bf16 %v998_v30, %v997_v55  ;;  %v4534_v55 = vrot.slane %v4501_v36, 1  ;;  %v767_v30 = vrot.slane %v4010_v39, 7 }
  0x61   : > { %1157 = vmatprep.mubr.f32.mxu0 %v3997_v32  ;;  %3611 = vmatpush3.bf16.msra.mxu0 %v3608_v5  ;;  %v999_v5 = vld [vmem:[%s5557_s2 + $0xe0] sm:$0xff] }
  0x62   : > { %3293 = vmatmul.mubr.msk.f32.gmra.mrb[24].mxu1 %vm862_vm0, %v4427_v16  ;;  %3613 = vmatprep.subr.bf16.mxu0 %v3612_v43  ;;  %5678 = vst [vmem:[#allocation42_spill] sm:$0xff] %v4534_v55  ;;  %v4547_v16 = vsel %vm862_vm0, %v911_v35, %v4534_v55  ;;  %v5608_v35 = vmov 0.0  }
  0x63   : > { %3582 = vmatpush1.bf16.msra.mxu1 %v3581_v50  ;;  %3295 = vmatprep.mubr.f32.mxu1 %v4475_v7  ;;  %v4524_v50 = vsel %vm862_vm0, %v908_v15, %v4495_v21  ;;  %v3620_v15 = vpack.c.bf16 %v1018_v60, %v1017_v47  ;;  %v3587_v7 = vpack.c.bf16 %v1000_v10, %v999_v5  ;;  %v1002_v60 = vld [vmem:[%s5557_s2 + $0xf8] sm:$0xff]  ;;  %v4566_v5 = vrot.slane %v4053_v0, 7  ;;  %v2978_v10 = vld [vmem:[%s5557_s2 + $0x300] sm:$0xff] }
  0x64   : > { %1158 = vmatmul.mubr.f32.gmra.mrb[10].mxu0 %v4506_v48  ;;  %3583 = vmatprep.subr.bf16.mxu1 %v5661_v13  ;;  %5677 = vst [vmem:[#allocation41_spill] sm:$0xff] %v4524_v50  ;;  %5679 = vst [vmem:[#allocation43_spill] sm:$0xff] %v4547_v16 }
  0x65   : > { %1162 = vmatprep.mubr.f32.mxu0 %v4008_v38  ;;  %3615 = vmatpush3.bf16.msra.mxu0 %v3612_v43  ;;  %v1001_v43 = vld [vmem:[%s5557_s2 + $0xf0] sm:$0xff] }
  0x66   : > { %3296 = vmatmul.mubr.msk.f32.gmra.mrb[26].mxu1 %vm862_vm0, %v4439_v17  ;;  %3617 = vmatprep.subr.bf16.mxu0 %v3616_v8  ;;  %v3590_v47 = vpack.c.bf16 %v1002_v60, %v1001_v43  ;;  %v3010_v43 = vld [vmem:[%s5557_s2 + $0x400] sm:$0xff]  ;;  %v3011_v60 = vld [vmem:[%s5557_s2 + $0x408] sm:$0xff]  ;;  %v3001_v17 = vld [vmem:[%s5557_s2 + $0x3b8] sm:$0xff] }
  0x67   : > { %3585 = vmatpush1.bf16.msra.mxu1 %v3584_v22  ;;  %3298 = vmatprep.mubr.f32.mxu1 %v4524_v50  ;;  %v4558_v22 = vsel %vm753_vm1, %v4520_v56, %v767_v30  ;;  %v4579_v30 = vrot.slane %v5608_v35, 7  ;;  %v2999_v50 = vld [vmem:[%s5557_s2 + $0x3a8] sm:$0xff] }
  0x68   : > { %2889 = vmatmul.mubr.msk.f32.gmra.mrb[12].mxu0 %vm4319_vm2, %v4520_v56  ;;  %3586 = vmatprep.subr.bf16.mxu1 %v5661_v13 }
  0x69   : > { %1167 = vmatprep.mubr.f32.mxu0 %v4010_v39  ;;  %3619 = vmatpush3.bf16.msra.mxu0 %v3616_v8  ;;  %v2979_v8 = vld [vmem:[%s5557_s2 + $0x308] sm:$0xff]  ;;  %5680 = vst [vmem:[#allocation44_spill] sm:$0xff] %v4579_v30 }
  0x6a   : > { %3299 = vmatmul.mubr.msk.f32.gmra.mrb[28].mxu1 %vm862_vm0, %v4495_v21  ;;  %3621 = vmatprep.subr.bf16.mxu0 %v3620_v15  ;;  %v2981_v21 = vld [vmem:[%s5557_s2 + $0x318] sm:$0xff] }
  0x6b   : > { %3588 = vmatpush1.bf16.msra.mxu1 %v3587_v7  ;;  %3301 = vmatprep.mubr.f32.mxu1 %v4547_v16  ;;  %v770_v7 = vrot.slane %v4055_v1, 7  ;;  %v3625_v16 = vpack.c.bf16 %v2979_v8, %v2978_v10  ;;  %v4612_v8 = vrot.slane %v4103_v28, 7 }
  0x6c   : > { %1168 = vmatmul.mubr.f32.gmra.mrb[14].mxu0 %v4558_v22  ;;  %3589 = vmatprep.subr.bf16.mxu1 %v5661_v13 }
  0x6d   : > { %1172 = vmatprep.mubr.f32.mxu0 %v4053_v0  ;;  %3623 = vmatpush3.bf16.msra.mxu0 %v3620_v15  ;;  %v4588_v15 = vpack.c.bf16 %v3011_v60, %v3010_v43  ;;  %v2983_v43 = vld [vmem:[%s5557_s2 + $0x328] sm:$0xff]  ;;  %v2985_v60 = vld [vmem:[%s5557_s2 + $0x338] sm:$0xff] }
  0x6e   : > { %3302 = vmatmul.mubr.msk.f32.gmra.mrb[30].mxu1 %vm862_vm0, %v4534_v55  ;;  %v2980_v55 = vld [vmem:[%s5557_s2 + $0x310] sm:$0xff] }
  0x6f   : > { %3591 = vmatpush1.bf16.msra.mxu1 %v3590_v47  ;;  %1582 = vmatprep.mubr.f32.mxu1 %v5608_v35  ;;  %v4603_v47 = vsel %vm753_vm1, %v4566_v5, %v770_v7  ;;  %v3628_v10 = vpack.c.bf16 %v2981_v21, %v2980_v55  ;;  %v2982_v7 = vld [vmem:[%s5557_s2 + $0x320] sm:$0xff]  ;;  %v2984_v55 = vld [vmem:[%s5557_s2 + $0x330] sm:$0xff] }
  0x70   : > { %2891 = vmatmul.mubr.msk.f32.gmra.mrb[16].mxu0 %vm4319_vm2, %v4566_v5  ;;  %3624 = vmatprep.subr.bf16.mxu1 %v5661_v13  ;;  %v3631_v21 = vpack.c.bf16 %v2983_v43, %v2982_v7  ;;  %v4646_v7 = vrot.slane %v4129_v53, 7  ;;  %v2986_v43 = vld [vmem:[%s5557_s2 + $0x340] sm:$0xff] }
  0x71   : > { %1177 = vmatprep.mubr.f32.mxu0 %v4055_v1  ;;  %3673 = vmatprep.subr.bf16.mxu0 %v4588_v15 }
  0x72   : > { %2931 = vmatmul.mubr.msk.f32.vlgmr.msra.gmra.mrb[32].mxu1 %vm4319_vm2, %v4579_v30 }
  0x73   : > { %3626 = vmatpush1.bf16.msra.mxu1 %v3625_v16  ;;  %1587 = vmatprep.mubr.f32.mxu1 %v5608_v35  ;;  %v773_v16 = vrot.slane %v4105_v33, 7  ;;  %v2995_v35 = vld [vmem:[%s5557_s2 + $0x388] sm:$0xff] }
  0x74   : > { %1178 = vmatmul.mubr.f32.gmra.mrb[18].mxu0 %v4603_v47  ;;  %3627 = vmatprep.subr.bf16.mxu1 %v5661_v13 }
  0x75   : > { %1182 = vmatprep.mubr.f32.mxu0 %v4103_v28 }
  0x76   : > { %1588 = vmatmul.mubr.f32.gmra.mrb[34].mxu1 %v4579_v30  ;;  %v2997_v30 = vld [vmem:[%s5557_s2 + $0x398] sm:$0xff] }
  0x77   : > { %1592 = vmatprep.mubr.f32.mxu1 %v3914_v45  ;;  %3629 = vmatpush1.bf16.msra.mxu1 %v3628_v10  ;;  %v4638_v45 = vsel %vm753_vm1, %v4612_v8, %v773_v16  ;;  %v3634_v10 = vpack.c.bf16 %v2985_v60, %v2984_v55  ;;  %v2987_v16 = vld [vmem:[%s5557_s2 + $0x348] sm:$0xff]  ;;  %v2989_v55 = vld [vmem:[%s5557_s2 + $0x358] sm:$0xff] }
  0x78   : > { %2893 = vmatmul.mubr.msk.f32.gmra.mrb[20].mxu0 %vm4319_vm2, %v4612_v8  ;;  %3630 = vmatprep.subr.bf16.mxu1 %v5661_v13 }
  0x79   : > { %1187 = vmatprep.mubr.f32.mxu0 %v4105_v33 }
  0x7a   : > { %2933 = vmatmul.mubr.msk.f32.gmra.mrb[36].mxu1 %vm4319_vm2, %v4286_v26  ;;  %v3637_v26 = vpack.c.bf16 %v2987_v16, %v2986_v43  ;;  %v2990_v43 = vld [vmem:[%s5557_s2 + $0x360] sm:$0xff]  ;;  %v2991_v16 = vld [vmem:[%s5557_s2 + $0x368] sm:$0xff] }
  0x7b   : > { %1597 = vmatprep.mubr.f32.mxu1 %v3916_v46  ;;  %3632 = vmatpush1.bf16.msra.mxu1 %v3631_v21  ;;  %v776_v46 = vrot.slane %v4145_v63, 7  ;;  %v2988_v21 = vld [vmem:[%s5557_s2 + $0x350] sm:$0xff] }
  0x7c   : > { %1188 = vmatmul.mubr.f32.gmra.mrb[22].mxu0 %v4638_v45  ;;  %3633 = vmatprep.subr.bf16.mxu1 %v5661_v13  ;;  %v3640_v60 = vpack.c.bf16 %v2989_v55, %v2988_v21  ;;  %v2992_v21 = vld [vmem:[%s5557_s2 + $0x370] sm:$0xff]  ;;  %v2993_v55 = vld [vmem:[%s5557_s2 + $0x378] sm:$0xff] }
  0x7d   : > { %1192 = vmatprep.mubr.f32.mxu0 %v4129_v53 }
  0x7e   : > { %1598 = vmatmul.mubr.f32.gmra.mrb[38].mxu1 %v4360_v9  ;;  %v4672_v9 = vsel %vm753_vm1, %v4646_v7, %v776_v46  ;;  %v779_v46 = vrot.slane %v4182_v34, 7 }
  0x7f   : > { %1602 = vmatprep.mubr.f32.mxu1 %v3966_v11  ;;  %3635 = vmatpush1.bf16.msra.mxu1 %v3634_v10  ;;  %v4680_v10 = vrot.slane %v4167_v20, 7 }
  0x80   : > { %2895 = vmatmul.mubr.msk.f32.gmra.mrb[24].mxu0 %vm4319_vm2, %v4646_v7  ;;  %3636 = vmatprep.subr.bf16.mxu1 %v5661_v13 }
  0x81   : > { %1197 = vmatprep.mubr.f32.mxu0 %v4145_v63 }
  0x82   : > { %2935 = vmatmul.mubr.msk.f32.gmra.mrb[40].mxu1 %vm4319_vm2, %v4366_v62 }
  0x83   : > { %1607 = vmatprep.mubr.f32.mxu1 %v3968_v12  ;;  %3638 = vmatpush1.bf16.msra.mxu1 %v3637_v26  ;;  %v3643_v26 = vpack.c.bf16 %v2991_v16, %v2990_v43  ;;  %v3646_v43 = vpack.c.bf16 %v2993_v55, %v2992_v21  ;;  %v4714_v16 = vrot.slane %v4189_v42, 7  ;;  %v2996_v55 = vld [vmem:[%s5557_s2 + $0x390] sm:$0xff] }
  0x84   : > { %1198 = vmatmul.mubr.f32.gmra.mrb[26].mxu0 %v4672_v9  ;;  %3639 = vmatprep.subr.bf16.mxu1 %v5661_v13 }
  0x85   : > { %1202 = vmatprep.mubr.f32.mxu0 %v4167_v20 }
  0x86   : > { %1608 = vmatmul.mubr.f32.gmra.mrb[42].mxu1 %v4432_v40 }
  0x87   : > { %1612 = vmatprep.mubr.f32.mxu1 %v3995_v31  ;;  %3641 = vmatpush1.bf16.msra.mxu1 %v3640_v60  ;;  %v4706_v60 = vsel %vm753_vm1, %v4680_v10, %v779_v46  ;;  %v2994_v46 = vld [vmem:[%s5557_s2 + $0x380] sm:$0xff] }
  0x88   : > { %2897 = vmatmul.mubr.msk.f32.gmra.mrb[28].mxu0 %vm4319_vm2, %v4680_v10  ;;  %3642 = vmatprep.subr.bf16.mxu1 %v5661_v13  ;;  %v3649_v21 = vpack.c.bf16 %v2995_v35, %v2994_v46  ;;  %v3652_v35 = vpack.c.bf16 %v2997_v30, %v2996_v55  ;;  %v4748_v46 = vrot.slane %v4261_v51, 7  ;;  %v3000_v55 = vld [vmem:[%s5557_s2 + $0x3b0] sm:$0xff] }
  0x89   : > { %1207 = vmatprep.mubr.f32.mxu0 %v4182_v34 }
  0x8a   : > { %2937 = vmatmul.mubr.msk.f32.gmra.mrb[44].mxu1 %vm4319_vm2, %v4450_v29  ;;  %5682 = vst [vmem:[#allocation46_spill] sm:$0xff] %v4748_v46 }
  0x8b   : > { %1617 = vmatprep.mubr.f32.mxu1 %v3997_v32  ;;  %3644 = vmatpush1.bf16.msra.mxu1 %v3643_v26  ;;  %v782_v26 = vrot.slane %v4203_v54, 7 }
  0x8c   : > { %1208 = vmatmul.mubr.f32.gmra.mrb[30].mxu0 %v4706_v60  ;;  %3645 = vmatprep.subr.bf16.mxu1 %v5661_v13 }
  0x8d   : > { %1212 = vmatprep.mubr.f32.mxu0 %v4189_v42 }
  0x8e   : > { %1618 = vmatmul.mubr.f32.gmra.mrb[46].mxu1 %v4506_v48 }
  0x8f   : > { %1622 = vmatprep.mubr.f32.mxu1 %v4008_v38  ;;  %3647 = vmatpush1.bf16.msra.mxu1 %v3646_v43  ;;  %v4740_v43 = vsel %vm753_vm1, %v4714_v16, %v782_v26  ;;  %v2998_v26 = vld [vmem:[%s5557_s2 + $0x3a0] sm:$0xff] }
  0x90   : > { %2899 = vmatmul.mubr.msk.f32.gmra.mrb[32].mxu0 %vm4319_vm2, %v4714_v16  ;;  %3648 = vmatprep.subr.bf16.mxu1 %v5661_v13  ;;  %5681 = vst [vmem:[#allocation45_spill] sm:$0xff] %v4740_v43  ;;  %v3655_v30 = vpack.c.bf16 %v2999_v50, %v2998_v26  ;;  %v3658_v50 = vpack.c.bf16 %v3001_v17, %v3000_v55  ;;  %v4782_v26 = vrot.slane %v4297_v25, 7  ;;  %v3004_v55 = vld [vmem:[%s5557_s2 + $0x3d0] sm:$0xff] }
  0x91   : > { %1217 = vmatprep.mubr.f32.mxu0 %v4203_v54 }
  0x92   : > { %2939 = vmatmul.mubr.msk.f32.gmra.mrb[48].mxu1 %vm4319_vm2, %v4520_v56 }
  0x93   : > { %1627 = vmatprep.mubr.f32.mxu1 %v4010_v39  ;;  %3650 = vmatpush1.bf16.msra.mxu1 %v3649_v21  ;;  %v785_v21 = vrot.slane %v4263_v57, 7 }
  0x94   : > { %1218 = vmatmul.mubr.f32.gmra.mrb[34].mxu0 %v4740_v43  ;;  %3651 = vmatprep.subr.bf16.mxu1 %v5661_v13 }
  0x95   : > { %1222 = vmatprep.mubr.f32.mxu0 %v4261_v51 }
  0x96   : > { %1628 = vmatmul.mubr.f32.gmra.mrb[50].mxu1 %v4558_v22 }
  0x97   : > { %1632 = vmatprep.mubr.f32.mxu1 %v4053_v0  ;;  %3653 = vmatpush1.bf16.msra.mxu1 %v3652_v35  ;;  %v4774_v35 = vsel %vm753_vm1, %v4748_v46, %v785_v21  ;;  %v3002_v21 = vld [vmem:[%s5557_s2 + $0x3c0] sm:$0xff]  ;;  %v3003_v0 = vld [vmem:[%s5557_s2 + $0x3c8] sm:$0xff] }
  0x98   : > { %2901 = vmatmul.mubr.msk.f32.gmra.mrb[36].mxu0 %vm4319_vm2, %v4748_v46  ;;  %3654 = vmatprep.subr.bf16.mxu1 %v5661_v13  ;;  %v3661_v17 = vpack.c.bf16 %v3003_v0, %v3002_v21  ;;  %v4816_v21 = vrot.slane %v4351_v37, 7 }
  0x99   : > { %1227 = vmatprep.mubr.f32.mxu0 %v4263_v57 }
  0x9a   : > { %2941 = vmatmul.mubr.msk.f32.gmra.mrb[52].mxu1 %vm4319_vm2, %v4566_v5 }
  0x9b   : > { %1637 = vmatprep.mubr.f32.mxu1 %v4055_v1  ;;  %3656 = vmatpush1.bf16.msra.mxu1 %v3655_v30  ;;  %v788_v30 = vrot.slane %v4299_v18, 7  ;;  %v3005_v1 = vld [vmem:[%s5557_s2 + $0x3d8] sm:$0xff] }
  0x9c   : > { %1228 = vmatmul.mubr.f32.gmra.mrb[38].mxu0 %v4774_v35  ;;  %3657 = vmatprep.subr.bf16.mxu1 %v5661_v13  ;;  %v3664_v0 = vpack.c.bf16 %v3005_v1, %v3004_v55  ;;  %v3008_v55 = vld [vmem:[%s5557_s2 + $0x3f0] sm:$0xff] }
  0x9d   : > { %1232 = vmatprep.mubr.f32.mxu0 %v4297_v25 }
  0x9e   : > { %1638 = vmatmul.mubr.f32.gmra.mrb[54].mxu1 %v4603_v47 }
  0x9f   : > { %1642 = vmatprep.mubr.f32.mxu1 %v4103_v28  ;;  %3659 = vmatpush1.bf16.msra.mxu1 %v3658_v50  ;;  %v4808_v50 = vsel %vm753_vm1, %v4782_v26, %v788_v30  ;;  %v3006_v30 = vld [vmem:[%s5557_s2 + $0x3e0] sm:$0xff]  ;;  %v3007_v28 = vld [vmem:[%s5557_s2 + $0x3e8] sm:$0xff] }
  0xa0   : > { %2903 = vmatmul.mubr.msk.f32.gmra.mrb[40].mxu0 %vm4319_vm2, %v4782_v26  ;;  %3660 = vmatprep.subr.bf16.mxu1 %v5661_v13  ;;  %v3667_v1 = vpack.c.bf16 %v3007_v28, %v3006_v30  ;;  %v4850_v30 = vrot.slane %v4390_v6, 7 }
  0xa1   : > { %1237 = vmatprep.mubr.f32.mxu0 %v4299_v18 }
  0xa2   : > { %2943 = vmatmul.mubr.msk.f32.gmra.mrb[56].mxu1 %vm4319_vm2, %v4612_v8  ;;  %5683 = vst [vmem:[#allocation47_spill] sm:$0xff] %v4850_v30 }
  0xa3   : > { %1647 = vmatprep.mubr.f32.mxu1 %v4105_v33  ;;  %3662 = vmatpush1.bf16.msra.mxu1 %v3661_v17  ;;  %v791_v17 = vrot.slane %v4353_v19, 7  ;;  %v3009_v33 = vld [vmem:[%s5557_s2 + $0x3f8] sm:$0xff] }
  0xa4   : > { %1238 = vmatmul.mubr.f32.gmra.mrb[42].mxu0 %v4808_v50  ;;  %3663 = vmatprep.subr.bf16.mxu1 %v5661_v13  ;;  %v3670_v28 = vpack.c.bf16 %v3009_v33, %v3008_v55 }
  0xa5   : > { %1242 = vmatprep.mubr.f32.mxu0 %v4351_v37 }
  0xa6   : > { %1648 = vmatmul.mubr.f32.gmra.mrb[58].mxu1 %v4638_v45 }
  0xa7   : > { %1652 = vmatprep.mubr.f32.mxu1 %v4129_v53  ;;  %3665 = vmatpush1.bf16.msra.mxu1 %v3664_v0  ;;  %v4842_v0 = vsel %vm753_vm1, %v4816_v21, %v791_v17  ;;  %v794_v17 = vrot.slane %v4392_v58, 7 }
  0xa8   : > { %2905 = vmatmul.mubr.msk.f32.gmra.mrb[44].mxu0 %vm4319_vm2, %v4816_v21  ;;  %3666 = vmatprep.subr.bf16.mxu1 %v5661_v13 }
  0xa9   : > { %1247 = vmatprep.mubr.f32.mxu0 %v4353_v19  ;;  %v4863_v33 = vsel %vm753_vm1, %v4850_v30, %v794_v17  ;;  %v800_v17 = vrot.slane %v4466_v23, 7 }
  0xaa   : > { %2945 = vmatmul.mubr.msk.f32.gmra.mrb[60].mxu1 %vm4319_vm2, %v4646_v7  ;;  %5684 = vst [vmem:[#allocation48_spill] sm:$0xff] %v4863_v33 }
  0xab   : > { %1657 = vmatprep.mubr.f32.mxu1 %v4145_v63  ;;  %3668 = vmatpush1.bf16.msra.mxu1 %v3667_v1  ;;  %v797_v1 = vrot.slane %v4403_v2, 7 }
  0xac   : > { %1248 = vmatmul.mubr.f32.gmra.mrb[46].mxu0 %v4842_v0  ;;  %3669 = vmatprep.subr.bf16.mxu1 %v5661_v13  ;;  %v4871_v13 = vrot.slane %v4400_v44, 7 }
  0xad   : > { %1252 = vmatprep.mubr.f32.mxu0 %v4390_v6 }
  0xae   : > { %1658 = vmatmul.mubr.f32.gmra.mrb[62].mxu1 %v4672_v9  ;;  %5685 = vst [vmem:[#allocation49_spill] sm:$0xff] %v4871_v13  ;;  %v4883_v55 = vsel %vm753_vm1, %v4871_v13, %v797_v1 }
  0xaf   : > { %1662 = vmatprep.mubr.f32.mxu1 %v4167_v20  ;;  %3671 = vmatpush1.bf16.msra.mxu1 %v3670_v28  ;;  %5686 = vst [vmem:[#allocation50_spill] sm:$0xff] %v4883_v55  ;;  %v4891_v28 = vrot.slane %v4463_v61, 7 }
  0xb0   : > { %2907 = vmatmul.mubr.msk.f32.gmra.mrb[48].mxu0 %vm4319_vm2, %v4850_v30 }
  0xb1   : > { %1257 = vmatprep.mubr.f32.mxu0 %v4392_v58  ;;  %5687 = vst [vmem:[#allocation51_spill] sm:$0xff] %v4891_v28  ;;  %v4903_v1 = vsel %vm753_vm1, %v4891_v28, %v800_v17 }
  0xb2   : > { %2947 = vmatmul.mubr.msk.f32.gmra.mrb[64].mxu1 %vm4319_vm2, %v4680_v10  ;;  %5688 = vst [vmem:[#allocation52_spill] sm:$0xff] %v4903_v1 }
  0xb3   : > { %1667 = vmatprep.mubr.f32.mxu1 %v4182_v34 }
  0xb4   : > { %1258 = vmatmul.mubr.f32.gmra.mrb[50].mxu0 %v4863_v33 }
  0xb5   : > { %1262 = vmatprep.mubr.f32.mxu0 %v4400_v44 }
  0xb6   : > { %1668 = vmatmul.mubr.f32.gmra.mrb[66].mxu1 %v4706_v60 }
  0xb7   : > { %1672 = vmatprep.mubr.f32.mxu1 %v4189_v42 }
  0xb8   : > { %2909 = vmatmul.mubr.msk.f32.gmra.mrb[52].mxu0 %vm4319_vm2, %v4871_v13 }
  0xb9   : > { %1267 = vmatprep.mubr.f32.mxu0 %v4403_v2 }
  0xba   : > { %2949 = vmatmul.mubr.msk.f32.gmra.mrb[68].mxu1 %vm4319_vm2, %v4714_v16 }
  0xbb   : > { %1677 = vmatprep.mubr.f32.mxu1 %v4203_v54 }
  0xbc   : > { %1268 = vmatmul.mubr.f32.gmra.mrb[54].mxu0 %v4883_v55 }
  0xbd   : > { %1272 = vmatprep.mubr.f32.mxu0 %v4463_v61 }
  0xbe   : > { %1678 = vmatmul.mubr.f32.gmra.mrb[70].mxu1 %v4740_v43  ;;  %v803_v43 = vrot.slane %v4501_v36, 7 }
  0xbf   : > { %1682 = vmatprep.mubr.f32.mxu1 %v4261_v51  ;;  %v4911_v51 = vrot.slane %v4498_v27, 7 }
  0xc0   : > { %2911 = vmatmul.mubr.msk.f32.gmra.mrb[56].mxu0 %vm4319_vm2, %v4891_v28 }
  0xc1   : > { %1277 = vmatprep.mubr.f32.mxu0 %v4466_v23  ;;  %5689 = vst [vmem:[#allocation53_spill] sm:$0xff] %v4911_v51  ;;  %v4923_v17 = vsel %vm753_vm1, %v4911_v51, %v803_v43 }
  0xc2   : > { %2951 = vmatmul.mubr.msk.f32.gmra.mrb[72].mxu1 %vm4319_vm2, %v4748_v46  ;;  %5690 = vst [vmem:[#allocation54_spill] sm:$0xff] %v4923_v17 }
  0xc3   : > { %1687 = vmatprep.mubr.f32.mxu1 %v4263_v57  ;;  %v5691_v57 = vmov 0.0  }
  0xc4   : > { %1278 = vmatmul.mubr.f32.gmra.mrb[58].mxu0 %v4903_v1  ;;  %v4926_v46 = vrot.slane %v5691_v57, 1  ;;  %v3014_v57 = vld [vmem:[%s5557_s2 + $0x420] sm:$0xff] }
  0xc5   : > { %1282 = vmatprep.mubr.f32.mxu0 %v4498_v27  ;;  %v3012_v27 = vld [vmem:[%s5557_s2 + $0x410] sm:$0xff] }
  0xc6   : > { %1688 = vmatmul.mubr.f32.gmra.mrb[74].mxu1 %v4774_v35 }
  0xc7   : > { %1692 = vmatprep.mubr.f32.mxu1 %v4297_v25 }
  0xc8   : > { %2913 = vmatmul.mubr.msk.f32.gmra.mrb[60].mxu0 %vm4319_vm2, %v4911_v51  ;;  %v3015_v51 = vld [vmem:[%s5557_s2 + $0x428] sm:$0xff] }
  0xc9   : > { %1287 = vmatprep.mubr.f32.mxu0 %v4501_v36  ;;  %v3013_v36 = vld [vmem:[%s5557_s2 + $0x418] sm:$0xff] }
  0xca   : > { %2953 = vmatmul.mubr.msk.f32.gmra.mrb[76].mxu1 %vm4319_vm2, %v4782_v26  ;;  %v3676_v43 = vpack.c.bf16 %v3013_v36, %v3012_v27  ;;  %v3680_v27 = vpack.c.bf16 %v3015_v51, %v3014_v57  ;;  %v3016_v36 = vld [vmem:[%s5557_s2 + $0x430] sm:$0xff]  ;;  %v3018_v51 = vld [vmem:[%s5557_s2 + $0x440] sm:$0xff]  ;;  %v3019_v57 = vld [vmem:[%s5557_s2 + $0x448] sm:$0xff] }
  0xcb   : > { %1697 = vmatprep.mubr.f32.mxu1 %v4299_v18 }
  0xcc   : > { %1288 = vmatmul.mubr.f32.gmra.mrb[62].mxu0 %v4923_v17  ;;  %v3017_v17 = vld [vmem:[%s5557_s2 + $0x438] sm:$0xff] }
  0xcd   : > { %3336 = vmatprep.mubr.f32.mxu0 %v4926_v46 }
  0xce   : > { %1698 = vmatmul.mubr.f32.gmra.mrb[78].mxu1 %v4808_v50 }
  0xcf   : > { %1702 = vmatprep.mubr.f32.mxu1 %v4351_v37 }
  0xd0   : > { %3337 = vmatmul.mubr.msk.f32.vlgmr.msra.gmra.mrb[64].mxu0 %vm862_vm0, %v4926_v46 }
  0xd1   : > { %3339 = vmatprep.mubr.f32.mxu0 %v3942_v59  ;;  %3675 = vmatpush3.bf16.msra.mxu0 %v4588_v15  ;;  %v3684_v59 = vpack.c.bf16 %v3017_v17, %v3016_v36  ;;  %v3020_v15 = vld [vmem:[%s5557_s2 + $0x450] sm:$0xff]  ;;  %v3021_v17 = vld [vmem:[%s5557_s2 + $0x458] sm:$0xff]  ;;  %v3023_v36 = vld [vmem:[%s5557_s2 + $0x468] sm:$0xff] }
  0xd2   : > { %2955 = vmatmul.mubr.msk.f32.gmra.mrb[80].mxu1 %vm4319_vm2, %v4816_v21  ;;  %3677 = vmatprep.subr.bf16.mxu0 %v3676_v43 }
  0xd3   : > { %1707 = vmatprep.mubr.f32.mxu1 %v4353_v19 }
  0xd4   : > { %3340 = vmatmul.mubr.msk.f32.gmra.mrb[66].mxu0 %vm862_vm0, %v3925_v52  ;;  %v3688_v52 = vpack.c.bf16 %v3019_v57, %v3018_v51  ;;  %v5692_v51 = vld [vmem:[#allocation6_spill] sm:$0xff]  ;;  %v5693_v57 = vld [vmem:[#allocation12_spill] sm:$0xff] }
  0xd5   : > { %3342 = vmatprep.mubr.f32.mxu0 %v4014_v41  ;;  %3679 = vmatpush3.bf16.msra.mxu0 %v3676_v43  ;;  %v3692_v43 = vpack.c.bf16 %v3021_v17, %v3020_v15  ;;  %v3024_v15 = vld [vmem:[%s5557_s2 + $0x470] sm:$0xff]  ;;  %v3025_v17 = vld [vmem:[%s5557_s2 + $0x478] sm:$0xff] }
  0xd6   : > { %1708 = vmatmul.mubr.f32.gmra.mrb[82].mxu1 %v4842_v0  ;;  %3681 = vmatprep.subr.bf16.mxu0 %v3680_v27 }
  0xd7   : > { %1712 = vmatprep.mubr.f32.mxu1 %v4390_v6 }
  0xd8   : > { %3343 = vmatmul.mubr.msk.f32.gmra.mrb[68].mxu0 %vm862_vm0, %v3985_v24 }
  0xd9   : > { %3345 = vmatprep.mubr.f32.mxu0 %v4061_v4  ;;  %3683 = vmatpush3.bf16.msra.mxu0 %v3680_v27  ;;  %v3022_v27 = vld [vmem:[%s5557_s2 + $0x460] sm:$0xff] }
  0xda   : > { %2957 = vmatmul.mubr.msk.f32.gmra.mrb[84].mxu1 %vm4319_vm2, %v4850_v30  ;;  %3685 = vmatprep.subr.bf16.mxu0 %v3684_v59 }
  0xdb   : > { %1717 = vmatprep.mubr.f32.mxu1 %v4392_v58  ;;  %v5717_v58 = vld [vmem:[#allocation10_spill] sm:$0xff] }
  0xdc   : > { %3346 = vmatmul.mubr.msk.f32.gmra.mrb[70].mxu0 %vm862_vm0, %v4027_v49 }
  0xdd   : > { %3348 = vmatprep.mubr.f32.mxu0 %v4073_v14  ;;  %3687 = vmatpush3.bf16.msra.mxu0 %v3684_v59  ;;  %v3696_v59 = vpack.c.bf16 %v3023_v36, %v3022_v27  ;;  %v3700_v27 = vpack.c.bf16 %v3025_v17, %v3024_v15  ;;  %v5696_v36 = vld [vmem:[#allocation13_spill] sm:$0xff]  ;;  %v5702_v17 = vld [vmem:[#allocation18_spill] sm:$0xff] }
  0xde   : > { %1718 = vmatmul.mubr.f32.gmra.mrb[86].mxu1 %v4863_v33  ;;  %3689 = vmatprep.subr.bf16.mxu0 %v3688_v52  ;;  %v5700_v15 = vld [vmem:[#allocation17_spill] sm:$0xff]  ;;  %v5716_v33 = vld [vmem:[#allocation38_spill] sm:$0xff] }
  0xdf   : > { %1722 = vmatprep.mubr.f32.mxu1 %v4400_v44  ;;  %v5694_v44 = vld [vmem:[#allocation9_spill] sm:$0xff] }
  0xe0   : > { %3349 = vmatmul.mubr.msk.f32.gmra.mrb[72].mxu0 %vm862_vm0, %v5692_v51 }
  0xe1   : > { %3351 = vmatprep.mubr.f32.mxu0 %v5693_v57  ;;  %3691 = vmatpush3.bf16.msra.mxu0 %v3688_v52  ;;  %v5695_v52 = vld [vmem:[#allocation14_spill] sm:$0xff] }
  0xe2   : > { %2959 = vmatmul.mubr.msk.f32.gmra.mrb[88].mxu1 %vm4319_vm2, %v4871_v13  ;;  %3693 = vmatprep.subr.bf16.mxu0 %v3692_v43  ;;  %v5714_v13 = vld [vmem:[#allocation41_spill] sm:$0xff] }
  0xe3   : > { %1727 = vmatprep.mubr.f32.mxu1 %v4403_v2  ;;  %v5697_v2 = vld [vmem:[#allocation16_spill] sm:$0xff] }
  0xe4   : > { %3352 = vmatmul.mubr.msk.f32.gmra.mrb[74].mxu0 %vm862_vm0, %v5694_v44 }
  0xe5   : > { %3354 = vmatprep.mubr.f32.mxu0 %v5695_v52  ;;  %3695 = vmatpush3.bf16.msra.mxu0 %v3692_v43  ;;  %v5698_v43 = vld [vmem:[#allocation15_spill] sm:$0xff] }
  0xe6   : > { %1728 = vmatmul.mubr.f32.gmra.mrb[90].mxu1 %v4883_v55  ;;  %3697 = vmatprep.subr.bf16.mxu0 %v3696_v59  ;;  %v5699_v55 = vld [vmem:[#allocation21_spill] sm:$0xff] }
  0xe7   : > { %1732 = vmatprep.mubr.f32.mxu1 %v4463_v61 }
  0xe8   : > { %3355 = vmatmul.mubr.msk.f32.gmra.mrb[76].mxu0 %vm862_vm0, %v5696_v36 }
  0xe9   : > { %3357 = vmatprep.mubr.f32.mxu0 %v5697_v2  ;;  %3699 = vmatpush3.bf16.msra.mxu0 %v3696_v59  ;;  %v5701_v59 = vld [vmem:[#allocation22_spill] sm:$0xff] }
  0xea   : > { %2961 = vmatmul.mubr.msk.f32.gmra.mrb[92].mxu1 %vm4319_vm2, %v4891_v28  ;;  %3701 = vmatprep.subr.bf16.mxu0 %v3700_v27  ;;  %v5713_v28 = vld [vmem:[#allocation33_spill] sm:$0xff] }
  0xeb   : > { %1737 = vmatprep.mubr.f32.mxu1 %v4466_v23  ;;  %v5703_v23 = vld [vmem:[#allocation24_spill] sm:$0xff] }
  0xec   : > { %3358 = vmatmul.mubr.msk.f32.gmra.mrb[78].mxu0 %vm862_vm0, %v5698_v43 }
  0xed   : > { %3360 = vmatprep.mubr.f32.mxu0 %v5699_v55  ;;  %3703 = vmatpush3.bf16.msra.mxu0 %v3700_v27  ;;  %v5705_v27 = vld [vmem:[#allocation26_spill] sm:$0xff] }
  0xee   : > { %1738 = vmatmul.mubr.f32.gmra.mrb[94].mxu1 %v4903_v1  ;;  %v5711_v1 = vld [vmem:[#allocation37_spill] sm:$0xff] }
  0xef   : > { %2081 = vmatprep.mubr.f32.mxu1 %v3966_v11  ;;  %v5704_v11 = vld [vmem:[#allocation23_spill] sm:$0xff] }
  0xf0   : > { %3361 = vmatmul.mubr.msk.f32.gmra.mrb[80].mxu0 %vm862_vm0, %v5700_v15 }
  0xf1   : > { %3363 = vmatprep.mubr.f32.mxu0 %v5701_v59 }
  0xf2   : > { %3027 = vmatmul.mubr.msk.f32.vlgmr.msra.gmra.mrb[96].mxu1 %vm4319_vm2, %v4366_v62  ;;  %v5707_v62 = vld [vmem:[#allocation31_spill] sm:$0xff] }
  0xf3   : > { %2086 = vmatprep.mubr.f32.mxu1 %v3968_v12  ;;  %v5706_v12 = vld [vmem:[#allocation25_spill] sm:$0xff] }
  0xf4   : > { %3364 = vmatmul.mubr.msk.f32.gmra.mrb[82].mxu0 %vm862_vm0, %v5702_v17 }
  0xf5   : > { %3366 = vmatprep.mubr.f32.mxu0 %v5703_v23 }
  0xf6   : > { %2087 = vmatmul.mubr.f32.gmra.mrb[98].mxu1 %v4432_v40  ;;  %v5709_v40 = vld [vmem:[#allocation34_spill] sm:$0xff] }
  0xf7   : > { %2091 = vmatprep.mubr.f32.mxu1 %v3995_v31  ;;  %v5708_v31 = vld [vmem:[#allocation27_spill] sm:$0xff] }
  0xf8   : > { %3367 = vmatmul.mubr.msk.f32.gmra.mrb[84].mxu0 %vm862_vm0, %v5704_v11 }
  0xf9   : > { %3369 = vmatprep.mubr.f32.mxu0 %v5705_v27 }
  0xfa   : > { %3029 = vmatmul.mubr.msk.f32.gmra.mrb[100].mxu1 %vm4319_vm2, %v4450_v29 }
  0xfb   : > { %2096 = vmatprep.mubr.f32.mxu1 %v3997_v32  ;;  %v5710_v32 = vld [vmem:[#allocation32_spill] sm:$0xff] }
  0xfc   : > { %3370 = vmatmul.mubr.msk.f32.gmra.mrb[86].mxu0 %vm862_vm0, %v5706_v12 }
  0xfd   : > { %3372 = vmatprep.mubr.f32.mxu0 %v5707_v62 }
  0xfe   : > { %2097 = vmatmul.mubr.f32.gmra.mrb[102].mxu1 %v4506_v48 }
  0xff   : > { %2101 = vmatprep.mubr.f32.mxu1 %v4008_v38  ;;  %v5712_v38 = vld [vmem:[#allocation7_spill] sm:$0xff] }
 0x100   : > { %3373 = vmatmul.mubr.msk.f32.gmra.mrb[88].mxu0 %vm862_vm0, %v5708_v31 }
 0x101   : > { %3375 = vmatprep.mubr.f32.mxu0 %v5709_v40 }
 0x102   : > { %3031 = vmatmul.mubr.msk.f32.gmra.mrb[104].mxu1 %vm4319_vm2, %v4520_v56 }
 0x103   : > { %2106 = vmatprep.mubr.f32.mxu1 %v4010_v39  ;;  %v5715_v39 = vld [vmem:[#allocation8_spill] sm:$0xff] }
 0x104   : > { %3376 = vmatmul.mubr.msk.f32.gmra.mrb[90].mxu0 %vm862_vm0, %v5710_v32 }
 0x105   : > { %v3258_v29 = vpop.f32.mrb[0].mxu1  ;;  %3378 = vmatprep.mubr.f32.mxu0 %v5711_v1 }
 0x106   : > { %v1359_v48 = vpop.f32.mrb[1].mxu1  ;;  %2107 = vmatmul.mubr.f32.gmra.mrb[106].mxu1 %v4558_v22 }
 0x107   : > { %2111 = vmatprep.mubr.f32.mxu1 %v5712_v38 }
 0x108   : > { %3379 = vmatmul.mubr.msk.f32.gmra.mrb[92].mxu0 %vm862_vm0, %v5713_v28 }
 0x109   : > { %v5065_v61 = vpop.f32.mrb[2].mxu1  ;;  %3381 = vmatprep.mubr.f32.mxu0 %v5714_v13 }
 0x10a   : > { %v1369_v56 = vpop.f32.mrb[3].mxu1  ;;  %3033 = vmatmul.mubr.msk.f32.gmra.mrb[108].mxu1 %vm4319_vm2, %v4566_v5 }
 0x10b   : > { %2116 = vmatprep.mubr.f32.mxu1 %v5715_v39 }
 0x10c   : > { %3382 = vmatmul.mubr.msk.f32.gmra.mrb[94].mxu0 %vm862_vm0, %v5716_v33 }
 0x10d   : > { %v5074_v22 = vpop.f32.mrb[4].mxu1  ;;  %3416 = vmatprep.mubr.f32.mxu0 %v4014_v41  ;;  %v5718_v41 = vld [vmem:[#allocation11_spill] sm:$0xff] }
 0x10e   : > { %v5077_v38 = vpop.f32.mrb[5].mxu1  ;;  %2117 = vmatmul.mubr.f32.gmra.mrb[110].mxu1 %v4603_v47 }
 0x10f   : > { %2121 = vmatprep.mubr.f32.mxu1 %v5717_v58 }
 0x110   : > { %3417 = vmatmul.mubr.msk.f32.vlgmr.msra.gmra.mrb[96].mxu0 %vm862_vm0, %v3985_v24 }
 0x111   : > { %v5083_v30 = vpop.f32.mrb[6].mxu1  ;;  %3419 = vmatprep.mubr.f32.mxu0 %v4061_v4 }
 0x112   : > { %v5086_v5 = vpop.f32.mrb[7].mxu1  ;;  %3035 = vmatmul.mubr.msk.f32.gmra.mrb[112].mxu1 %vm4319_vm2, %v4612_v8 }
 0x113   : > { %2126 = vmatprep.mubr.f32.mxu1 %v5718_v41 }
 0x114   : > { %3420 = vmatmul.mubr.msk.f32.gmra.mrb[98].mxu0 %vm862_vm0, %v4027_v49 }
 0x115   : > { %v5094_v47 = vpop.f32.mrb[8].mxu1  ;;  %3422 = vmatprep.mubr.f32.mxu0 %v4073_v14 }
 0x116   : > { %v5097_v24 = vpop.f32.mrb[9].mxu1  ;;  %2127 = vmatmul.mubr.f32.gmra.mrb[114].mxu1 %v4638_v45 }
 0x117   : > { %2131 = vmatprep.mubr.f32.mxu1 %v4129_v53 }
 0x118   : > { %3423 = vmatmul.mubr.msk.f32.gmra.mrb[100].mxu0 %vm862_vm0, %v5692_v51 }
 0x119   : > { %v5103_v4 = vpop.f32.mrb[10].mxu1  ;;  %3425 = vmatprep.mubr.f32.mxu0 %v5693_v57 }
 0x11a   : > { %v5106_v58 = vpop.f32.mrb[11].mxu1  ;;  %3037 = vmatmul.mubr.msk.f32.gmra.mrb[116].mxu1 %vm4319_vm2, %v4646_v7 }
 0x11b   : > { %2136 = vmatprep.mubr.f32.mxu1 %v4145_v63 }
 0x11c   : > { %3426 = vmatmul.mubr.msk.f32.gmra.mrb[102].mxu0 %vm862_vm0, %v5694_v44 }
 0x11d   : > { %v5114_v49 = vpop.f32.mrb[12].mxu1  ;;  %3428 = vmatprep.mubr.f32.mxu0 %v5695_v52 }
 0x11e   : > { %v5117_v14 = vpop.f32.mrb[13].mxu1  ;;  %2137 = vmatmul.mubr.f32.gmra.mrb[118].mxu1 %v4672_v9 }
 0x11f   : > { %2141 = vmatprep.mubr.f32.mxu1 %v4167_v20 }
 0x120   : > { %3429 = vmatmul.mubr.msk.f32.gmra.mrb[104].mxu0 %vm862_vm0, %v5696_v36  ;;  %v5719_v36 = vld [vmem:[#allocation45_spill] sm:$0xff] }
 0x121   : > { %v5123_v53 = vpop.f32.mrb[14].mxu1  ;;  %3431 = vmatprep.mubr.f32.mxu0 %v5697_v2 }
 0x122   : > { %v5126_v63 = vpop.f32.mrb[15].mxu1  ;;  %3039 = vmatmul.mubr.msk.f32.gmra.mrb[120].mxu1 %vm4319_vm2, %v4680_v10 }
 0x123   : > { %v1134_v44 = vpop.f32.mrb[0].mxu0  ;;  %2146 = vmatprep.mubr.f32.mxu1 %v4182_v34 }
 0x124   : > { %v5132_v8 = vadd.f32 %v1359_v48, %v1134_v44  ;;  %3432 = vmatmul.mubr.msk.f32.gmra.mrb[106].mxu0 %vm862_vm0, %v5698_v43  ;;  %v1136_v20 = vpop.f32.mrb[1].mxu0  ;;  %v5722_v48 = vld [vmem:[#allocation20_spill] sm:$0xff] }
 0x125   : > { %v5136_v45 = vpop.f32.mrb[16].mxu1  ;;  %3434 = vmatprep.mubr.f32.mxu0 %v5699_v55 }
 0x126   : > { %v5139_v2 = vpop.f32.mrb[17].mxu1  ;;  %2147 = vmatmul.mubr.f32.gmra.mrb[122].mxu1 %v4706_v60 }
 0x127   : > { %v1139_v7 = vpop.f32.mrb[2].mxu0  ;;  %2151 = vmatprep.mubr.f32.mxu1 %v4189_v42 }
 0x128   : > { %v5143_v9 = vadd.f32 %v3258_v29, %v1139_v7  ;;  %3435 = vmatmul.mubr.msk.f32.gmra.mrb[108].mxu0 %vm862_vm0, %v5700_v15  ;;  %v1141_v34 = vpop.f32.mrb[3].mxu0  ;;  %v5720_v15 = vld [vmem:[#allocation19_spill] sm:$0xff]  ;;  %v5724_v7 = vld [vmem:[#allocation42_spill] sm:$0xff] }
 0x129   : > { %v5147_v10 = vpop.f32.mrb[18].mxu1  ;;  %3437 = vmatprep.mubr.f32.mxu0 %v5701_v59 }
 0x12a   : > { %v5150_v51 = vpop.f32.mrb[19].mxu1  ;;  %3041 = vmatmul.mubr.msk.f32.gmra.mrb[124].mxu1 %vm4319_vm2, %v4714_v16 }
 0x12b   : > { %v1144_v60 = vpop.f32.mrb[4].mxu0  ;;  %2156 = vmatprep.mubr.f32.mxu1 %v4203_v54 }
 0x12c   : > { %v5156_v42 = vadd.f32 %v1369_v56, %v1144_v60  ;;  %3438 = vmatmul.mubr.msk.f32.gmra.mrb[110].mxu0 %vm862_vm0, %v5702_v17  ;;  %v1146_v55 = vpop.f32.mrb[5].mxu0  ;;  %v5725_v60 = vld [vmem:[#allocation47_spill] sm:$0xff] }
 0x12d   : > { %v5160_v57 = vpop.f32.mrb[20].mxu1  ;;  %3440 = vmatprep.mubr.f32.mxu0 %v5703_v23  ;;  %v5721_v23 = vld [vmem:[#allocation46_spill] sm:$0xff] }
 0x12e   : > { %v5163_v52 = vpop.f32.mrb[21].mxu1  ;;  %2157 = vmatmul.mubr.f32.gmra.mrb[126].mxu1 %v5719_v36 }
 0x12f   : > { %v1149_v43 = vpop.f32.mrb[6].mxu0  ;;  %2161 = vmatprep.mubr.f32.mxu1 %v5720_v15  ;;  %v5727_v15 = vld [vmem:[#allocation48_spill] sm:$0xff] }
 0x130   : > { %v5168_v16 = vadd.f32 %v5065_v61, %v1149_v43  ;;  %3441 = vmatmul.mubr.msk.f32.gmra.mrb[112].mxu0 %vm862_vm0, %v5704_v11  ;;  %v1151_v54 = vpop.f32.mrb[7].mxu0 }
 0x131   : > { %v5172_v59 = vpop.f32.mrb[22].mxu1  ;;  %3443 = vmatprep.mubr.f32.mxu0 %v5705_v27 }
 0x132   : > { %v5175_v17 = vpop.f32.mrb[23].mxu1  ;;  %3043 = vmatmul.mubr.msk.f32.gmra.mrb[128].mxu1 %vm4319_vm2, %v5721_v23  ;;  %v5728_v23 = vld [vmem:[#allocation29_spill] sm:$0xff] }
 0x133   : > { %v1154_v29 = vpop.f32.mrb[8].mxu0  ;;  %2166 = vmatprep.mubr.f32.mxu1 %v5722_v48 }
 0x134   : > { %v5182_v61 = vadd.f32 %v5077_v38, %v1154_v29  ;;  %v1156_v56 = vpop.f32.mrb[9].mxu0  ;;  %3444 = vmatmul.mubr.msk.f32.gmra.mrb[114].mxu0 %vm862_vm0, %v5706_v12 }
 0x135   : > { %v5186_v11 = vpop.f32.mrb[24].mxu1  ;;  %3446 = vmatprep.mubr.f32.mxu0 %v5707_v62 }
 0x136   : > { %v5189_v27 = vpop.f32.mrb[25].mxu1  ;;  %2167 = vmatmul.mubr.f32.gmra.mrb[130].mxu1 %v4774_v35 }
 0x137   : > { %v1159_v39 = vpop.f32.mrb[10].mxu0  ;;  %2171 = vmatprep.mubr.f32.mxu1 %v4297_v25 }
 0x138   : > { %v5194_v41 = vadd.f32 %v5074_v22, %v1159_v39  ;;  %v1161_v38 = vpop.f32.mrb[11].mxu0  ;;  %3447 = vmatmul.mubr.msk.f32.gmra.mrb[116].mxu0 %vm862_vm0, %v5708_v31 }
 0x139   : > { %v5198_v44 = vpop.f32.mrb[26].mxu1  ;;  %3449 = vmatprep.mubr.f32.mxu0 %v5709_v40  ;;  %v5730_v38 = vld [vmem:[#allocation30_spill] sm:$0xff] }
 0x13a   : > { %v5201_v12 = vpop.f32.mrb[27].mxu1  ;;  %3045 = vmatmul.mubr.msk.f32.gmra.mrb[132].mxu1 %vm4319_vm2, %v4782_v26 }
 0x13b   : > { %v1164_v35 = vpop.f32.mrb[12].mxu0  ;;  %2176 = vmatprep.mubr.f32.mxu1 %v4299_v18 }
 0x13c   : > { %v5208_v25 = vadd.f32 %v5086_v5, %v1164_v35  ;;  %v1166_v62 = vpop.f32.mrb[13].mxu0  ;;  %3450 = vmatmul.mubr.msk.f32.gmra.mrb[118].mxu0 %vm862_vm0, %v5710_v32 }
 0x13d   : > { %v5212_v31 = vpop.f32.mrb[28].mxu1  ;;  %3452 = vmatprep.mubr.f32.mxu0 %v5711_v1  ;;  %v5723_v1 = vld [vmem:[#allocation43_spill] sm:$0xff] }
 0x13e   : > { %v5215_v40 = vpop.f32.mrb[29].mxu1  ;;  %2177 = vmatmul.mubr.f32.gmra.mrb[134].mxu1 %v4808_v50 }
 0x13f   : > { %v1169_v22 = vpop.f32.mrb[14].mxu0  ;;  %2181 = vmatprep.mubr.f32.mxu1 %v4351_v37 }
 0x140   : > { %v5220_v18 = vadd.f32 %v5083_v30, %v1169_v22  ;;  %v1171_v26 = vpop.f32.mrb[15].mxu0  ;;  %3453 = vmatmul.mubr.msk.f32.gmra.mrb[120].mxu0 %vm862_vm0, %v5713_v28 }
 0x141   : > { %v5224_v5 = vpop.f32.mrb[30].mxu1  ;;  %3455 = vmatprep.mubr.f32.mxu0 %v5714_v13 }
 0x142   : > { %v5227_v32 = vpop.f32.mrb[31].mxu1  ;;  %3047 = vmatmul.mubr.msk.f32.gmra.mrb[136].mxu1 %vm4319_vm2, %v4816_v21 }
 0x143   : > { %v1174_v50 = vpop.f32.mrb[16].mxu0  ;;  %2186 = vmatprep.mubr.f32.mxu1 %v4353_v19 }
 0x144   : > { %v5234_v37 = vadd.f32 %v5097_v24, %v1174_v50  ;;  %v1176_v30 = vpop.f32.mrb[17].mxu0  ;;  %3456 = vmatmul.mubr.msk.f32.gmra.mrb[122].mxu0 %vm862_vm0, %v5716_v33  ;;  %v5731_v50 = vld [vmem:[#allocation50_spill] sm:$0xff] }
 0x145   : > { %v1584_v28 = vpop.f32.mrb[32].mxu1  ;;  %3458 = vmatprep.mubr.f32.mxu0 %v5723_v1  ;;  %v5732_v30 = vld [vmem:[#allocation35_spill] sm:$0xff] }
 0x146   : > { %v5240_v13 = vadd.f32 %v1584_v28, %v5132_v8  ;;  %v1586_v20 = vpop.f32.mrb[33].mxu1  ;;  %2187 = vmatmul.mubr.f32.gmra.mrb[138].mxu1 %v4842_v0 }
 0x147   : > { %v1179_v21 = vpop.f32.mrb[18].mxu0  ;;  %2191 = vmatprep.mubr.f32.mxu1 %v4390_v6  ;;  %v5726_v6 = vld [vmem:[#allocation28_spill] sm:$0xff] }
 0x148   : > { %v5245_v19 = vadd.f32 %v5094_v47, %v1179_v21  ;;  %v1181_v24 = vpop.f32.mrb[19].mxu0  ;;  %3459 = vmatmul.mubr.msk.f32.gmra.mrb[124].mxu0 %vm862_vm0, %v5724_v7  ;;  %v5734_v7 = vld [vmem:[#allocation36_spill] sm:$0xff] }
 0x149   : > { %v1589_v33 = vpop.f32.mrb[34].mxu1  ;;  %3461 = vmatprep.mubr.f32.mxu0 %v4926_v46  ;;  %v5733_v24 = vld [vmem:[#allocation51_spill] sm:$0xff] }
 0x14a   : > { %v5251_v34 = vadd.f32 %v1589_v33, %v5143_v9  ;;  %v1591_v8 = vpop.f32.mrb[35].mxu1  ;;  %3049 = vmatmul.mubr.msk.f32.gmra.mrb[140].mxu1 %vm4319_vm2, %v5725_v60 }
 0x14b   : > { %v1184_v0 = vpop.f32.mrb[20].mxu0  ;;  %2196 = vmatprep.mubr.f32.mxu1 %v5726_v6  ;;  %v5735_v6 = vld [vmem:[#allocation52_spill] sm:$0xff] }
 0x14c   : > { %v5258_v47 = vadd.f32 %v5106_v58, %v1184_v0  ;;  %v1186_v55 = vpop.f32.mrb[21].mxu0  ;;  %3462 = vmatmul.mubr.msk.f32.gmra.mrb[126].mxu0 %vm862_vm0, %v4926_v46  ;;  %v5729_v46 = vld [vmem:[#allocation49_spill] sm:$0xff] }
 0x14d   : > { %v1594_v36 = vpop.f32.mrb[36].mxu1  ;;  %v5736_v55 = vld [vmem:[#allocation39_spill] sm:$0xff] }
 0x14e   : > { %v5263_v43 = vadd.f32 %v1594_v36, %v5156_v42  ;;  %v1596_v9 = vpop.f32.mrb[37].mxu1  ;;  %2197 = vmatmul.mubr.f32.gmra.mrb[142].mxu1 %v5727_v15 }
 0x14f   : > { %v1189_v54 = vpop.f32.mrb[22].mxu0  ;;  %2201 = vmatprep.mubr.f32.mxu1 %v5728_v23 }
 0x150   : > { %v5268_v29 = vadd.f32 %v5103_v4, %v1189_v54  ;;  %v1191_v48 = vpop.f32.mrb[23].mxu0 }
 0x151   : > { %v1599_v58 = vpop.f32.mrb[38].mxu1  ;;  %v5738_v48 = vld [vmem:[#allocation40_spill] sm:$0xff] }
 0x152   : > { %v5271_v56 = vadd.f32 %v1599_v58, %v5168_v16  ;;  %v1601_v39 = vpop.f32.mrb[39].mxu1  ;;  %3051 = vmatmul.mubr.msk.f32.gmra.mrb[144].mxu1 %vm4319_vm2, %v5729_v46 }
 0x153   : > { %v1194_v42 = vpop.f32.mrb[24].mxu0  ;;  %2206 = vmatprep.mubr.f32.mxu1 %v5730_v38  ;;  %v5739_v38 = vld [vmem:[#allocation54_spill] sm:$0xff] }
 0x154   : > { %v5278_v35 = vadd.f32 %v5117_v14, %v1194_v42  ;;  %v1196_v62 = vpop.f32.mrb[25].mxu0 }
 0x155   : > { %v1604_v22 = vpop.f32.mrb[40].mxu1  ;;  %v5740_v62 = vmov 0.0  }
 0x156   : > { %v5281_v4 = vadd.f32 %v1604_v22, %v5182_v61  ;;  %v1606_v26 = vpop.f32.mrb[41].mxu1  ;;  %2207 = vmatmul.mubr.f32.gmra.mrb[146].mxu1 %v5731_v50 }
 0x157   : > { %v1199_v16 = vpop.f32.mrb[26].mxu0  ;;  %2211 = vmatprep.mubr.f32.mxu1 %v5732_v30 }
 0x158   : > { %v1425_v28 = vadd.f32 %v5114_v49, %v1199_v16  ;;  %v1201_v1 = vpop.f32.mrb[27].mxu0 }
 0x159   : > { %v1609_v20 = vpop.f32.mrb[42].mxu1 }
 0x15a   : > { %v5287_v21 = vadd.f32 %v1609_v20, %v5194_v41  ;;  %v1611_v14 = vpop.f32.mrb[43].mxu1  ;;  %3053 = vmatmul.mubr.msk.f32.gmra.mrb[148].mxu1 %vm4319_vm2, %v5733_v24 }
 0x15b   : > { %v1204_v61 = vpop.f32.mrb[28].mxu0  ;;  %2216 = vmatprep.mubr.f32.mxu1 %v5734_v7 }
 0x15c   : > { %v1430_v33 = vadd.f32 %v5126_v63, %v1204_v61  ;;  %v1206_v8 = vpop.f32.mrb[29].mxu0  ;;  %v5737_v63 = vld [vmem:[#allocation53_spill] sm:$0xff] }
 0x15d   : > { %v1614_v60 = vpop.f32.mrb[44].mxu1 }
 0x15e   : > { %v5295_v0 = vadd.f32 %v1614_v60, %v5208_v25  ;;  %v1616_v49 = vpop.f32.mrb[45].mxu1  ;;  %2217 = vmatmul.mubr.f32.gmra.mrb[150].mxu1 %v5735_v6 }
 0x15f   : > { %v1209_v41 = vpop.f32.mrb[30].mxu0  ;;  %2221 = vmatprep.mubr.f32.mxu1 %v5736_v55 }
 0x160   : > { %v1435_v36 = vadd.f32 %v5123_v53, %v1209_v41  ;;  %v1211_v9 = vpop.f32.mrb[31].mxu0 }
 0x161   : > { %v1619_v15 = vpop.f32.mrb[46].mxu1 }
 0x162   : > { %v5301_v54 = vadd.f32 %v1619_v15, %v5220_v18  ;;  %v1621_v23 = vpop.f32.mrb[47].mxu1  ;;  %3055 = vmatmul.mubr.msk.f32.gmra.mrb[152].mxu1 %vm4319_vm2, %v5737_v63 }
 0x163   : > { %v1214_v25 = vpop.f32.mrb[32].mxu0  ;;  %2226 = vmatprep.mubr.f32.mxu1 %v5738_v48 }
 0x164   : > { %v1440_v58 = vadd.f32 %v5139_v2, %v1214_v25  ;;  %v1216_v39 = vpop.f32.mrb[33].mxu0  ;;  %v5741_v2 = vld [vmem:[#allocation44_spill] sm:$0xff] }
 0x165   : > { %v1624_v46 = vpop.f32.mrb[48].mxu1 }
 0x166   : > { %v5309_v42 = vadd.f32 %v1624_v46, %v5234_v37  ;;  %v1626_v53 = vpop.f32.mrb[49].mxu1  ;;  %2227 = vmatmul.mubr.f32.gmra.mrb[154].mxu1 %v5739_v38 }
 0x167   : > { %v1219_v18 = vpop.f32.mrb[34].mxu0  ;;  %2231 = vmatprep.mubr.f32.mxu1 %v5740_v62 }
 0x168   : > { %v1445_v22 = vadd.f32 %v5136_v45, %v1219_v18  ;;  %v1221_v26 = vpop.f32.mrb[35].mxu0 }
 0x169   : > { %v1629_v50 = vpop.f32.mrb[50].mxu1 }
 0x16a   : > { %v5315_v16 = vadd.f32 %v1629_v50, %v5245_v19  ;;  %v1631_v30 = vpop.f32.mrb[51].mxu1  ;;  %3057 = vmatmul.mubr.msk.f32.gmra.mrb[156].mxu1 %vm4319_vm2, %v5741_v2 }
 0x16b   : > { %v1224_v37 = vpop.f32.mrb[36].mxu0  ;;  %2236 = vmatprep.mubr.f32.mxu1 %v5740_v62 }
 0x16c   : > { %v1450_v1 = vadd.f32 %v5150_v51, %v1224_v37  ;;  %v1226_v20 = vpop.f32.mrb[37].mxu0 }
 0x16d   : > { %v1634_v14 = vpop.f32.mrb[52].mxu1 }
 0x16e   : > { %v5323_v24 = vadd.f32 %v1634_v14, %v5258_v47  ;;  %v1636_v45 = vpop.f32.mrb[53].mxu1  ;;  %2237 = vmatmul.mubr.f32.gmra.mrb[158].mxu1 %v5741_v2 }
 0x16f   : > { %v1229_v19 = vpop.f32.mrb[38].mxu0 }
 0x170   : > { %v1455_v61 = vadd.f32 %v5147_v10, %v1229_v19  ;;  %v1231_v7 = vpop.f32.mrb[39].mxu0 }
 0x171   : > { %v1639_v8 = vpop.f32.mrb[54].mxu1 }
 0x172   : > { %v5328_v3 = vadd.f32 %v1639_v8, %v5268_v29  ;;  %v1641_v60 = vpop.f32.mrb[55].mxu1 }
 0x173   : > { %v1234_v49 = vpop.f32.mrb[40].mxu0 }
 0x174   : > { %v1460_v51 = vadd.f32 %v5163_v52, %v1234_v49  ;;  %v1236_v6 = vpop.f32.mrb[41].mxu0 }
 0x175   : > { %v1644_v41 = vpop.f32.mrb[56].mxu1 }
 0x176   : > { %v5332_v47 = vadd.f32 %v1644_v41, %v5278_v35  ;;  %v1646_v55 = vpop.f32.mrb[57].mxu1 }
 0x177   : > { %v1239_v9 = vpop.f32.mrb[42].mxu0 }
 0x178   : > { %v1465_v15 = vadd.f32 %v5160_v57, %v1239_v9  ;;  %v1241_v23 = vpop.f32.mrb[43].mxu0 }
 0x179   : > { %v1649_v10 = vpop.f32.mrb[58].mxu1 }
 0x17a   : > { %v5335_v63 = vadd.f32 %v1649_v10, %v1425_v28  ;;  %v1651_v25 = vpop.f32.mrb[59].mxu1 }
 0x17b   : > { %v1244_v29 = vpop.f32.mrb[44].mxu0 }
 0x17c   : > { %v1470_v48 = vadd.f32 %v5175_v17, %v1244_v29  ;;  %v1246_v39 = vpop.f32.mrb[45].mxu0 }
 0x17d   : > { %v1654_v46 = vpop.f32.mrb[60].mxu1 }
 0x17e   : > { %v5338_v52 = vadd.f32 %v1654_v46, %v1430_v33  ;;  %v1656_v53 = vpop.f32.mrb[61].mxu1 }
 0x17f   : > { %v1249_v38 = vpop.f32.mrb[46].mxu0 }
 0x180   : > { %v1475_v35 = vadd.f32 %v5172_v59, %v1249_v38  ;;  %v1251_v18 = vpop.f32.mrb[47].mxu0 }
 0x181   : > { %v1659_v62 = vpop.f32.mrb[62].mxu1 }
 0x182   : > { %v5341_v26 = vadd.f32 %v1659_v62, %v1435_v36  ;;  %v1661_v57 = vpop.f32.mrb[63].mxu1 }
 0x183   : > { %v1254_v50 = vpop.f32.mrb[48].mxu0 }
 0x184   : > { %v1480_v28 = vadd.f32 %v5189_v27, %v1254_v50  ;;  %v1256_v30 = vpop.f32.mrb[49].mxu0 }
 0x185   : > { %v1664_v2 = vpop.f32.mrb[64].mxu1 }
 0x186   : > { %v5344_v37 = vadd.f32 %v1664_v2, %v1440_v58  ;;  %v1666_v17 = vpop.f32.mrb[65].mxu1 }
 0x187   : > { %v1259_v20 = vpop.f32.mrb[50].mxu0 }
 0x188   : > { %v1485_v33 = vadd.f32 %v5186_v11, %v1259_v20  ;;  %v1261_v14 = vpop.f32.mrb[51].mxu0 }
 0x189   : > { %v1669_v45 = vpop.f32.mrb[66].mxu1 }
 0x18a   : > { %v5347_v19 = vadd.f32 %v1669_v45, %v1445_v22  ;;  %v1671_v59 = vpop.f32.mrb[67].mxu1 }
 0x18b   : > { %v1264_v7 = vpop.f32.mrb[52].mxu0 }
 0x18c   : > { %v1490_v36 = vadd.f32 %v5201_v12, %v1264_v7  ;;  %v1266_v8 = vpop.f32.mrb[53].mxu0 }
 0x18d   : > { %v1674_v60 = vpop.f32.mrb[68].mxu1 }
 0x18e   : > { %v5350_v49 = vadd.f32 %v1674_v60, %v1450_v1  ;;  %v1676_v27 = vpop.f32.mrb[69].mxu1 }
 0x18f   : > { %v1269_v6 = vpop.f32.mrb[54].mxu0 }
 0x190   : > { %v1495_v58 = vadd.f32 %v5198_v44, %v1269_v6  ;;  %v1271_v41 = vpop.f32.mrb[55].mxu0 }
 0x191   : > { %v1679_v55 = vpop.f32.mrb[70].mxu1 }
 0x192   : > { %v5353_v9 = vadd.f32 %v1679_v55, %v1455_v61  ;;  %v1681_v11 = vpop.f32.mrb[71].mxu1 }
 0x193   : > { %v1274_v23 = vpop.f32.mrb[56].mxu0 }
 0x194   : > { %v1500_v22 = vadd.f32 %v5215_v40, %v1274_v23  ;;  %v1276_v10 = vpop.f32.mrb[57].mxu0 }
 0x195   : > { %v1684_v25 = vpop.f32.mrb[72].mxu1 }
 0x196   : > { %v5356_v29 = vadd.f32 %v1684_v25, %v1460_v51  ;;  %v1686_v12 = vpop.f32.mrb[73].mxu1 }
 0x197   : > { %v1279_v39 = vpop.f32.mrb[58].mxu0 }
 0x198   : > { %v1505_v1 = vadd.f32 %v5212_v31, %v1279_v39  ;;  %v1281_v46 = vpop.f32.mrb[59].mxu0 }
 0x199   : > { %v1689_v53 = vpop.f32.mrb[74].mxu1 }
 0x19a   : > { %v5359_v38 = vadd.f32 %v1689_v53, %v1465_v15  ;;  %v1691_v44 = vpop.f32.mrb[75].mxu1 }
 0x19b   : > { %v1284_v18 = vpop.f32.mrb[60].mxu0 }
 0x19c   : > { %v1510_v61 = vadd.f32 %v5227_v32, %v1284_v18  ;;  %v1286_v62 = vpop.f32.mrb[61].mxu0 }
 0x19d   : > { %v1694_v57 = vpop.f32.mrb[76].mxu1 }
 0x19e   : > { %v5362_v50 = vadd.f32 %v1694_v57, %v1470_v48  ;;  %v1696_v40 = vpop.f32.mrb[77].mxu1 }
 0x19f   : > { %v1289_v30 = vpop.f32.mrb[62].mxu0 }
 0x1a0   : > { %v1515_v51 = vadd.f32 %v5224_v5, %v1289_v30  ;;  %v1291_v2 = vpop.f32.mrb[63].mxu0 }
 0x1a1   : > { %v1699_v17 = vpop.f32.mrb[78].mxu1 }
 0x1a2   : > { %v5365_v20 = vadd.f32 %v1699_v17, %v1475_v35  ;;  %v1701_v31 = vpop.f32.mrb[79].mxu1 }
 0x1a3   : > { %v3338_v14 = vpop.f32.mrb[64].mxu0 }
 0x1a4   : > { %v5368_v15 = vadd.f32 %v3338_v14, %v5251_v34  ;;  %v1809_v45 = vpop.f32.mrb[65].mxu0 }
 0x1a5   : > { %v1704_v59 = vpop.f32.mrb[80].mxu1  ;;  %v5371_v32 = vadd.f32 %v1809_v45, %v5240_v13 }
 0x1a6   : > { %v5373_v48 = vadd.f32 %v1704_v59, %v1480_v28  ;;  %v1706_v7 = vpop.f32.mrb[81].mxu1 }
 0x1a7   : > { %v3341_v8 = vpop.f32.mrb[66].mxu0 }
 0x1a8   : > { %v5376_v5 = vadd.f32 %v3341_v8, %v5271_v56  ;;  %v1819_v60 = vpop.f32.mrb[67].mxu0 }
 0x1a9   : > { %v1709_v35 = vpop.f32.mrb[82].mxu1  ;;  %v5379_v27 = vadd.f32 %v1819_v60, %v5263_v43 }
 0x1aa   : > { %v5381_v6 = vadd.f32 %v1709_v35, %v1485_v33  ;;  %v1711_v34 = vpop.f32.mrb[83].mxu1 }
 0x1ab   : > { %v3344_v41 = vpop.f32.mrb[68].mxu0 }
 0x1ac   : > { %v5384_v55 = vadd.f32 %v3344_v41, %v5287_v21  ;;  %v1829_v13 = vpop.f32.mrb[69].mxu0 }
 0x1ad   : > { %v1714_v28 = vpop.f32.mrb[84].mxu1  ;;  %v5387_v11 = vadd.f32 %v1829_v13, %v5281_v4 }
 0x1ae   : > { %v5389_v23 = vadd.f32 %v1714_v28, %v1490_v36  ;;  %v1716_v56 = vpop.f32.mrb[85].mxu1 }
 0x1af   : > { %v3347_v10 = vpop.f32.mrb[70].mxu0 }
 0x1b0   : > { %v5392_v25 = vadd.f32 %v3347_v10, %v5301_v54  ;;  %v1839_v43 = vpop.f32.mrb[71].mxu0 }
 0x1b1   : > { %v1719_v33 = vpop.f32.mrb[86].mxu1  ;;  %v5395_v12 = vadd.f32 %v1839_v43, %v5295_v0 }
 0x1b2   : > { %v1720_v39 = vadd.f32 %v1719_v33, %v1495_v58  ;;  %v1721_v21 = vpop.f32.mrb[87].mxu1 }
 0x1b3   : > { %v3350_v46 = vpop.f32.mrb[72].mxu0 }
 0x1b4   : > { %v5398_v53 = vadd.f32 %v3350_v46, %v5315_v16  ;;  %v1849_v4 = vpop.f32.mrb[73].mxu0 }
 0x1b5   : > { %v1724_v44 = vpop.f32.mrb[88].mxu1  ;;  %v5401_v36 = vadd.f32 %v1849_v4, %v5309_v42 }
 0x1b6   : > { %v1725_v18 = vadd.f32 %v1724_v44, %v1500_v22  ;;  %v1726_v62 = vpop.f32.mrb[89].mxu1 }
 0x1b7   : > { %v3353_v54 = vpop.f32.mrb[74].mxu0 }
 0x1b8   : > { %v5404_v57 = vadd.f32 %v3353_v54, %v5328_v3  ;;  %v1859_v40 = vpop.f32.mrb[75].mxu0 }
 0x1b9   : > { %v1729_v0 = vpop.f32.mrb[90].mxu1  ;;  %v5407_v58 = vadd.f32 %v1859_v40, %v5323_v24 }
 0x1ba   : > { %v1730_v30 = vadd.f32 %v1729_v0, %v1505_v1  ;;  %v1731_v2 = vpop.f32.mrb[91].mxu1 }
 0x1bb   : > { %v3356_v16 = vpop.f32.mrb[76].mxu0 }
 0x1bc   : > { %v5410_v17 = vadd.f32 %v3356_v16, %v5335_v63  ;;  %v1869_v31 = vpop.f32.mrb[77].mxu0 }
 0x1bd   : > { %v1734_v42 = vpop.f32.mrb[92].mxu1  ;;  %v5413_v22 = vadd.f32 %v1869_v31, %v5332_v47 }
 0x1be   : > { %v1735_v14 = vadd.f32 %v1734_v42, %v1510_v61  ;;  %v1736_v45 = vpop.f32.mrb[93].mxu1 }
 0x1bf   : > { %v3359_v3 = vpop.f32.mrb[78].mxu0 }
 0x1c0   : > { %v5416_v59 = vadd.f32 %v3359_v3, %v5341_v26  ;;  %v1879_v7 = vpop.f32.mrb[79].mxu0 }
 0x1c1   : > { %v1739_v24 = vpop.f32.mrb[94].mxu1  ;;  %v5419_v1 = vadd.f32 %v1879_v7, %v5338_v52 }
 0x1c2   : > { %v1740_v8 = vadd.f32 %v1739_v24, %v1515_v51  ;;  %v1741_v60 = vpop.f32.mrb[95].mxu1 }
 0x1c3   : > { %v3362_v63 = vpop.f32.mrb[80].mxu0 }
 0x1c4   : > { %v5422_v35 = vadd.f32 %v3362_v63, %v5347_v19  ;;  %v1889_v34 = vpop.f32.mrb[81].mxu0 }
 0x1c5   : > { %v5425_v47 = vadd.f32 %v1889_v34, %v5344_v37  ;;  %v2083_v61 = vpop.f32.mrb[96].mxu1 }
 0x1c6   : > { %v2085_v41 = vpop.f32.mrb[97].mxu1 }
 0x1c7   : > { %v3365_v13 = vpop.f32.mrb[82].mxu0 }
 0x1c8   : > { %v5428_v26 = vadd.f32 %v3365_v13, %v5353_v9  ;;  %v1899_v28 = vpop.f32.mrb[83].mxu0 }
 0x1c9   : > { %v5431_v52 = vadd.f32 %v1899_v28, %v5350_v49  ;;  %v2088_v51 = vpop.f32.mrb[98].mxu1 }
 0x1ca   : > { %v2090_v56 = vpop.f32.mrb[99].mxu1 }
 0x1cb   : > { %v3368_v10 = vpop.f32.mrb[84].mxu0 }
 0x1cc   : > { %v5434_v19 = vadd.f32 %v3368_v10, %v5359_v38  ;;  %v1909_v43 = vpop.f32.mrb[85].mxu0 }
 0x1cd   : > { %v5437_v37 = vadd.f32 %v1909_v43, %v5356_v29  ;;  %v2093_v33 = vpop.f32.mrb[100].mxu1 }
 0x1ce   : > { %v2095_v21 = vpop.f32.mrb[101].mxu1 }
 0x1cf   : > { %v3371_v46 = vpop.f32.mrb[86].mxu0 }
 0x1d0   : > { %v5440_v9 = vadd.f32 %v3371_v46, %v5365_v20  ;;  %v1919_v4 = vpop.f32.mrb[87].mxu0 }
 0x1d1   : > { %v5443_v49 = vadd.f32 %v1919_v4, %v5362_v50  ;;  %v2098_v44 = vpop.f32.mrb[102].mxu1 }
 0x1d2   : > { %v2100_v62 = vpop.f32.mrb[103].mxu1 }
 0x1d3   : > { %v3374_v54 = vpop.f32.mrb[88].mxu0 }
 0x1d4   : > { %v5446_v38 = vadd.f32 %v3374_v54, %v5381_v6  ;;  %v1929_v40 = vpop.f32.mrb[89].mxu0 }
 0x1d5   : > { %v5449_v29 = vadd.f32 %v1929_v40, %v5373_v48  ;;  %v2103_v0 = vpop.f32.mrb[104].mxu1 }
 0x1d6   : > { %v2105_v2 = vpop.f32.mrb[105].mxu1 }
 0x1d7   : > { %v3377_v16 = vpop.f32.mrb[90].mxu0 }
 0x1d8   : > { %v5451_v31 = vadd.f32 %v3377_v16, %v1720_v39  ;;  %v1939_v20 = vpop.f32.mrb[91].mxu0 }
 0x1d9   : > { %v5454_v42 = vadd.f32 %v1939_v20, %v5389_v23  ;;  %v2108_v50 = vpop.f32.mrb[106].mxu1 }
 0x1da   : > { %v2110_v45 = vpop.f32.mrb[107].mxu1 }
 0x1db   : > { %v3380_v3 = vpop.f32.mrb[92].mxu0 }
 0x1dc   : > { %v5456_v7 = vadd.f32 %v3380_v3, %v1730_v30  ;;  %v1949_v6 = vpop.f32.mrb[93].mxu0 }
 0x1dd   : > { %v5458_v24 = vadd.f32 %v1949_v6, %v1725_v18  ;;  %v2113_v48 = vpop.f32.mrb[108].mxu1 }
 0x1de   : > { %v2115_v60 = vpop.f32.mrb[109].mxu1 }
 0x1df   : > { %v3383_v63 = vpop.f32.mrb[94].mxu0 }
 0x1e0   : > { %v5460_v34 = vadd.f32 %v3383_v63, %v1740_v8  ;;  %v1959_v39 = vpop.f32.mrb[95].mxu0 }
 0x1e1   : > { %v5462_v41 = vadd.f32 %v1959_v39, %v1735_v14  ;;  %v2118_v13 = vpop.f32.mrb[110].mxu1 }
 0x1e2   : > { %v2120_v23 = vpop.f32.mrb[111].mxu1 }
 0x1e3   : > { %v3418_v28 = vpop.f32.mrb[96].mxu0 }
 0x1e4   : > { %v2314_v56 = vadd.f32 %v3418_v28, %v2088_v51  ;;  %v2308_v10 = vpop.f32.mrb[97].mxu0 }
 0x1e5   : > { %v2123_v18 = vpop.f32.mrb[112].mxu1  ;;  %v2309_v30 = vadd.f32 %v2308_v10, %v2083_v61 }
 0x1e6   : > { %v2468_v8 = vadd.f32 %v2314_v56, %v5368_v15  ;;  %v2125_v43 = vpop.f32.mrb[113].mxu1 }
 0x1e7   : > { %v2467_v14 = vadd.f32 %v2309_v30, %v5371_v32  ;;  %v3421_v21 = vpop.f32.mrb[98].mxu0 }
 0x1e8   : > { %2500 = vst [vmem:[%s5469_s25 + $0x8] sm:$0xff] %v2468_v8  ;;  %v2569_v51 = vmul.f32 %v2468_v8, %v2468_v8  ;;  %v2324_v46 = vadd.f32 %v3421_v21, %v2098_v44  ;;  %v2318_v4 = vpop.f32.mrb[99].mxu0 }
 0x1e9   : > { %2499 = vst [vmem:[%s5469_s25] sm:$0xff] %v2467_v14  ;;  %v2531_v62 = vadd.f32 %v2468_v8, %v2467_v14  ;;  %v2568_v54 = vmul.f32 %v2467_v14, %v2467_v14  ;;  %v2128_v40 = vpop.f32.mrb[114].mxu1  ;;  %v2319_v2 = vadd.f32 %v2318_v4, %v2093_v33 }
 0x1ea   : > { %v2470_v16 = vadd.f32 %v2324_v46, %v5376_v5  ;;  %v2130_v61 = vpop.f32.mrb[115].mxu1 }
 0x1eb   : > { %v2600_v20 = vadd.f32 %v2569_v51, %v2568_v54  ;;  %v2469_v15 = vadd.f32 %v2319_v2, %v5379_v27  ;;  %v3424_v45 = vpop.f32.mrb[100].mxu0 }
 0x1ec   : > { %2502 = vst [vmem:[%s5469_s25 + $0x18] sm:$0xff] %v2470_v16  ;;  %v2334_v32 = vadd.f32 %v3424_v45, %v2108_v50  ;;  %v2328_v3 = vpop.f32.mrb[101].mxu0  ;;  %v2571_v23 = vmul.f32 %v2470_v16, %v2470_v16 }
 0x1ed   : > { %2501 = vst [vmem:[%s5469_s25 + $0x10] sm:$0xff] %v2469_v15  ;;  %v2532_v44 = vadd.f32 %v2531_v62, %v2469_v15  ;;  %v2570_v6 = vmul.f32 %v2469_v15, %v2469_v15  ;;  %v2133_v60 = vpop.f32.mrb[116].mxu1  ;;  %v2329_v63 = vadd.f32 %v2328_v3, %v2103_v0 }
 0x1ee   : > { %v2472_v39 = vadd.f32 %v2334_v32, %v5384_v55  ;;  %v2135_v33 = vpop.f32.mrb[117].mxu1 }
 0x1ef   : > { %v2601_v5 = vadd.f32 %v2600_v20, %v2570_v6  ;;  %v2471_v28 = vadd.f32 %v2329_v63, %v5387_v11  ;;  %v2533_v56 = vadd.f32 %v2532_v44, %v2470_v16  ;;  %v3427_v27 = vpop.f32.mrb[102].mxu0 }
 0x1f0   : > { %2504 = vst [vmem:[%s5469_s25 + $0x28] sm:$0xff] %v2472_v39  ;;  %v2344_v10 = vadd.f32 %v3427_v27, %v2118_v13  ;;  %v2338_v50 = vpop.f32.mrb[103].mxu0  ;;  %v2573_v51 = vmul.f32 %v2472_v39, %v2472_v39 }
 0x1f1   : > { %2503 = vst [vmem:[%s5469_s25 + $0x20] sm:$0xff] %v2471_v28  ;;  %v2534_v30 = vadd.f32 %v2533_v56, %v2471_v28  ;;  %v2572_v8 = vmul.f32 %v2471_v28, %v2471_v28  ;;  %v2602_v43 = vadd.f32 %v2601_v5, %v2571_v23  ;;  %v2138_v14 = vpop.f32.mrb[118].mxu1  ;;  %v2339_v0 = vadd.f32 %v2338_v50, %v2113_v48 }
 0x1f2   : > { %v2474_v55 = vadd.f32 %v2344_v10, %v5392_v25  ;;  %v2140_v21 = vpop.f32.mrb[119].mxu1 }
 0x1f3   : > { %v2603_v46 = vadd.f32 %v2602_v43, %v2572_v8  ;;  %v2473_v11 = vadd.f32 %v2339_v0, %v5395_v12  ;;  %v2535_v4 = vadd.f32 %v2534_v30, %v2472_v39  ;;  %v3430_v62 = vpop.f32.mrb[104].mxu0 }
 0x1f4   : > { %2506 = vst [vmem:[%s5469_s25 + $0x38] sm:$0xff] %v2474_v55  ;;  %v2354_v13 = vadd.f32 %v3430_v62, %v2128_v40  ;;  %v2348_v54 = vpop.f32.mrb[105].mxu0  ;;  %v2575_v45 = vmul.f32 %v2474_v55, %v2474_v55 }
 0x1f5   : > { %2505 = vst [vmem:[%s5469_s25 + $0x30] sm:$0xff] %v2473_v11  ;;  %v2536_v2 = vadd.f32 %v2535_v4, %v2473_v11  ;;  %v2574_v16 = vmul.f32 %v2473_v11, %v2473_v11  ;;  %v2604_v61 = vadd.f32 %v2603_v46, %v2573_v51  ;;  %v2143_v20 = vpop.f32.mrb[120].mxu1  ;;  %v2349_v48 = vadd.f32 %v2348_v54, %v2123_v18 }
 0x1f6   : > { %v2476_v25 = vadd.f32 %v2354_v13, %v5398_v53  ;;  %v2145_v15 = vpop.f32.mrb[121].mxu1 }
 0x1f7   : > { %v2605_v32 = vadd.f32 %v2604_v61, %v2574_v16  ;;  %v2475_v12 = vadd.f32 %v2349_v48, %v5401_v36  ;;  %v2537_v3 = vadd.f32 %v2536_v2, %v2474_v55  ;;  %v3433_v44 = vpop.f32.mrb[106].mxu0 }
 0x1f8   : > { %2508 = vst [vmem:[%s5469_s25 + $0x48] sm:$0xff] %v2476_v25  ;;  %v2364_v40 = vadd.f32 %v3433_v44, %v2138_v14  ;;  %v2358_v6 = vpop.f32.mrb[107].mxu0  ;;  %v2577_v28 = vmul.f32 %v2476_v25, %v2476_v25 }
 0x1f9   : > { %2507 = vst [vmem:[%s5469_s25 + $0x40] sm:$0xff] %v2475_v12  ;;  %v2538_v63 = vadd.f32 %v2537_v3, %v2475_v12  ;;  %v2576_v39 = vmul.f32 %v2475_v12, %v2475_v12  ;;  %v2606_v33 = vadd.f32 %v2605_v32, %v2575_v45  ;;  %v2148_v23 = vpop.f32.mrb[122].mxu1  ;;  %v2359_v18 = vadd.f32 %v2358_v6, %v2133_v60 }
 0x1fa   : > { %v2478_v53 = vadd.f32 %v2364_v40, %v5404_v57  ;;  %v2150_v5 = vpop.f32.mrb[123].mxu1 }
 0x1fb   : > { %v2607_v56 = vadd.f32 %v2606_v33, %v2576_v39  ;;  %v2477_v36 = vadd.f32 %v2359_v18, %v5407_v58  ;;  %v2539_v27 = vadd.f32 %v2538_v63, %v2476_v25  ;;  %v3436_v10 = vpop.f32.mrb[108].mxu0 }
 0x1fc   : > { %2510 = vst [vmem:[%s5469_s25 + $0x58] sm:$0xff] %v2478_v53  ;;  %v2374_v50 = vadd.f32 %v3436_v10, %v2148_v23  ;;  %v2368_v30 = vpop.f32.mrb[109].mxu0  ;;  %v2579_v21 = vmul.f32 %v2478_v53, %v2478_v53 }
 0x1fd   : > { %2509 = vst [vmem:[%s5469_s25 + $0x50] sm:$0xff] %v2477_v36  ;;  %v2540_v8 = vadd.f32 %v2539_v27, %v2477_v36  ;;  %v2578_v43 = vmul.f32 %v2477_v36, %v2477_v36  ;;  %v2608_v14 = vadd.f32 %v2607_v56, %v2577_v28  ;;  %v2153_v0 = vpop.f32.mrb[124].mxu1  ;;  %v2369_v60 = vadd.f32 %v2368_v30, %v2143_v20 }
 0x1fe   : > { %v2480_v57 = vadd.f32 %v2374_v50, %v5410_v17  ;;  %v2155_v55 = vpop.f32.mrb[125].mxu1 }
 0x1ff   : > { %v2609_v51 = vadd.f32 %v2608_v14, %v2578_v43  ;;  %v2479_v58 = vadd.f32 %v2369_v60, %v5413_v22  ;;  %v2541_v46 = vadd.f32 %v2540_v8, %v2478_v53  ;;  %v3439_v11 = vpop.f32.mrb[110].mxu0 }
 0x200   : > { %2512 = vst [vmem:[%s5469_s25 + $0x68] sm:$0xff] %v2480_v57  ;;  %v2378_v4 = vpop.f32.mrb[111].mxu0  ;;  %v2581_v17 = vmul.f32 %v2480_v57, %v2480_v57 }
 0x201   : > { %2511 = vst [vmem:[%s5469_s25 + $0x60] sm:$0xff] %v2479_v58  ;;  %v2542_v62 = vadd.f32 %v2541_v46, %v2479_v58  ;;  %v2580_v13 = vmul.f32 %v2479_v58, %v2479_v58  ;;  %v2610_v54 = vadd.f32 %v2609_v51, %v2579_v21  ;;  %v2158_v2 = vpop.f32.mrb[126].mxu1  ;;  %v2379_v16 = vadd.f32 %v2378_v4, %v2153_v0 }
 0x202   : > { %v2384_v61 = vadd.f32 %v3439_v11, %v2158_v2  ;;  %v2160_v20 = vpop.f32.mrb[127].mxu1 }
 0x203   : > { %v2611_v48 = vadd.f32 %v2610_v54, %v2580_v13  ;;  %v2481_v25 = vadd.f32 %v2379_v16, %v5419_v1  ;;  %v2543_v15 = vadd.f32 %v2542_v62, %v2480_v57  ;;  %v3442_v22 = vpop.f32.mrb[112].mxu0 }
 0x204   : > { %v2482_v45 = vadd.f32 %v2384_v61, %v5416_v59  ;;  %v2388_v32 = vpop.f32.mrb[113].mxu0 }
 0x205   : > { %2513 = vst [vmem:[%s5469_s25 + $0x70] sm:$0xff] %v2481_v25  ;;  %v2544_v12 = vadd.f32 %v2543_v15, %v2481_v25  ;;  %v2582_v3 = vmul.f32 %v2481_v25, %v2481_v25  ;;  %v2612_v44 = vadd.f32 %v2611_v48, %v2581_v17  ;;  %v2163_v40 = vpop.f32.mrb[128].mxu1 }
 0x206   : > { %2514 = vst [vmem:[%s5469_s25 + $0x78] sm:$0xff] %v2482_v45  ;;  %v2389_v6 = vadd.f32 %v2388_v32, %v2163_v40  ;;  %v2165_v63 = vpop.f32.mrb[129].mxu1  ;;  %v2583_v39 = vmul.f32 %v2482_v45, %v2482_v45 }
 0x207   : > { %v2613_v33 = vadd.f32 %v2612_v44, %v2582_v3  ;;  %v2545_v23 = vadd.f32 %v2544_v12, %v2482_v45  ;;  %v3445_v18 = vpop.f32.mrb[114].mxu0 }
 0x208   : > { %v2483_v1 = vadd.f32 %v2389_v6, %v5425_v47  ;;  %v2398_v53 = vpop.f32.mrb[115].mxu0 }
 0x209   : > { %v2614_v5 = vadd.f32 %v2613_v33, %v2583_v39  ;;  %v2168_v59 = vpop.f32.mrb[130].mxu1 }
 0x20a   : > { %2515 = vst [vmem:[%s5469_s25 + $0x80] sm:$0xff] %v2483_v1  ;;  %v2546_v28 = vadd.f32 %v2545_v23, %v2483_v1  ;;  %v2584_v56 = vmul.f32 %v2483_v1, %v2483_v1  ;;  %v2394_v36 = vadd.f32 %v3442_v22, %v2168_v59  ;;  %v2170_v27 = vpop.f32.mrb[131].mxu1 }
 0x20b   : > { %v3448_v10 = vpop.f32.mrb[116].mxu0 }
 0x20c   : > { %v2615_v50 = vadd.f32 %v2614_v5, %v2584_v56  ;;  %v2484_v30 = vadd.f32 %v2394_v36, %v5422_v35  ;;  %v2408_v8 = vpop.f32.mrb[117].mxu0 }
 0x20d   : > { %v2173_v43 = vpop.f32.mrb[132].mxu1 }
 0x20e   : > { %2516 = vst [vmem:[%s5469_s25 + $0x88] sm:$0xff] %v2484_v30  ;;  %v2547_v14 = vadd.f32 %v2546_v28, %v2484_v30  ;;  %v2585_v0 = vmul.f32 %v2484_v30, %v2484_v30  ;;  %v2399_v60 = vadd.f32 %v2398_v53, %v2173_v43  ;;  %v2175_v47 = vpop.f32.mrb[133].mxu1 }
 0x20f   : > { %v3451_v57 = vpop.f32.mrb[118].mxu0 }
 0x210   : > { %v2616_v55 = vadd.f32 %v2615_v50, %v2585_v0  ;;  %v2485_v21 = vadd.f32 %v2399_v60, %v5431_v52  ;;  %v2418_v51 = vpop.f32.mrb[119].mxu0 }
 0x211   : > { %v2178_v58 = vpop.f32.mrb[134].mxu1 }
 0x212   : > { %2517 = vst [vmem:[%s5469_s25 + $0x90] sm:$0xff] %v2485_v21  ;;  %v2548_v46 = vadd.f32 %v2547_v14, %v2485_v21  ;;  %v2586_v11 = vmul.f32 %v2485_v21, %v2485_v21  ;;  %v2404_v4 = vadd.f32 %v3445_v18, %v2178_v58  ;;  %v2180_v62 = vpop.f32.mrb[135].mxu1 }
 0x213   : > { %v3454_v35 = vpop.f32.mrb[120].mxu0 }
 0x214   : > { %v2617_v13 = vadd.f32 %v2616_v55, %v2586_v11  ;;  %v2486_v54 = vadd.f32 %v2404_v4, %v5428_v26  ;;  %v2428_v2 = vpop.f32.mrb[121].mxu0 }
 0x215   : > { %v2183_v16 = vpop.f32.mrb[136].mxu1 }
 0x216   : > { %2518 = vst [vmem:[%s5469_s25 + $0x98] sm:$0xff] %v2486_v54  ;;  %v2549_v61 = vadd.f32 %v2548_v46, %v2486_v54  ;;  %v2587_v20 = vmul.f32 %v2486_v54, %v2486_v54  ;;  %v2409_v17 = vadd.f32 %v2408_v8, %v2183_v16  ;;  %v2185_v48 = vpop.f32.mrb[137].mxu1 }
 0x217   : > { %v3457_v52 = vpop.f32.mrb[122].mxu0 }
 0x218   : > { %v2618_v25 = vadd.f32 %v2617_v13, %v2587_v20  ;;  %v2487_v15 = vadd.f32 %v2409_v17, %v5437_v37  ;;  %v2438_v22 = vpop.f32.mrb[123].mxu0 }
 0x219   : > { %v2188_v45 = vpop.f32.mrb[138].mxu1 }
 0x21a   : > { %2519 = vst [vmem:[%s5469_s25 + $0xa0] sm:$0xff] %v2487_v15  ;;  %v2550_v32 = vadd.f32 %v2549_v61, %v2487_v15  ;;  %v2588_v12 = vmul.f32 %v2487_v15, %v2487_v15  ;;  %v2414_v3 = vadd.f32 %v3448_v10, %v2188_v45  ;;  %v2190_v44 = vpop.f32.mrb[139].mxu1 }
 0x21b   : > { %v5513_v26 = vpop.f32.mrb[124].mxu0 }
 0x21c   : > { %v2619_v40 = vadd.f32 %v2618_v25, %v2588_v12  ;;  %v2488_v6 = vadd.f32 %v2414_v3, %v5434_v19  ;;  %v2448_v63 = vpop.f32.mrb[125].mxu0 }
 0x21d   : > { %v2193_v39 = vpop.f32.mrb[140].mxu1 }
 0x21e   : > { %2520 = vst [vmem:[%s5469_s25 + $0xa8] sm:$0xff] %v2488_v6  ;;  %v2551_v33 = vadd.f32 %v2550_v32, %v2488_v6  ;;  %v2589_v23 = vmul.f32 %v2488_v6, %v2488_v6  ;;  %v2419_v37 = vadd.f32 %v2418_v51, %v2193_v39  ;;  %v2195_v18 = vpop.f32.mrb[141].mxu1 }
 0x21f   : > { %v5517_v1 = vpop.f32.mrb[126].mxu0 }
 0x220   : > { %v2620_v53 = vadd.f32 %v2619_v40, %v2589_v23  ;;  %v2489_v5 = vadd.f32 %v2419_v37, %v5443_v49  ;;  %v2458_v59 = vpop.f32.mrb[127].mxu0 }
 0x221   : > { %v2198_v28 = vpop.f32.mrb[142].mxu1 }
 0x222   : > { %2521 = vst [vmem:[%s5469_s25 + $0xb0] sm:$0xff] %v2489_v5  ;;  %v2552_v56 = vadd.f32 %v2551_v33, %v2489_v5  ;;  %v2590_v36 = vmul.f32 %v2489_v5, %v2489_v5  ;;  %v2424_v19 = vadd.f32 %v3451_v57, %v2198_v28  ;;  %v2200_v27 = vpop.f32.mrb[143].mxu1 }
 0x224   : > { %v2621_v10 = vadd.f32 %v2620_v53, %v2590_v36  ;;  %v2490_v50 = vadd.f32 %v2424_v19, %v5440_v9 }
 0x225   : > { %v2203_v30 = vpop.f32.mrb[144].mxu1 }
 0x226   : > { %2522 = vst [vmem:[%s5469_s25 + $0xb8] sm:$0xff] %v2490_v50  ;;  %v2553_v8 = vadd.f32 %v2552_v56, %v2490_v50  ;;  %v2591_v43 = vmul.f32 %v2490_v50, %v2490_v50  ;;  %v2429_v14 = vadd.f32 %v2428_v2, %v2203_v30  ;;  %v2205_v0 = vpop.f32.mrb[145].mxu1 }
 0x228   : > { %v2622_v60 = vadd.f32 %v2621_v10, %v2591_v43  ;;  %v2491_v49 = vadd.f32 %v2429_v14, %v5449_v29 }
 0x229   : > { %v2208_v47 = vpop.f32.mrb[146].mxu1 }
 0x22a   : > { %2523 = vst [vmem:[%s5469_s25 + $0xc0] sm:$0xff] %v2491_v49  ;;  %v2554_v55 = vadd.f32 %v2553_v8, %v2491_v49  ;;  %v2592_v21 = vmul.f32 %v2491_v49, %v2491_v49  ;;  %v2434_v57 = vadd.f32 %v3454_v35, %v2208_v47  ;;  %v2210_v51 = vpop.f32.mrb[147].mxu1 }
 0x22c   : > { %v2623_v58 = vadd.f32 %v2622_v60, %v2592_v21  ;;  %v2492_v9 = vadd.f32 %v2434_v57, %v5446_v38 }
 0x22d   : > { %v2213_v46 = vpop.f32.mrb[148].mxu1 }
 0x22e   : > { %2524 = vst [vmem:[%s5469_s25 + $0xc8] sm:$0xff] %v2492_v9  ;;  %v2555_v11 = vadd.f32 %v2554_v55, %v2492_v9  ;;  %v2593_v4 = vmul.f32 %v2492_v9, %v2492_v9  ;;  %v2439_v62 = vadd.f32 %v2438_v22, %v2213_v46  ;;  %v2215_v13 = vpop.f32.mrb[149].mxu1 }
 0x230   : > { %v2624_v54 = vadd.f32 %v2623_v58, %v2593_v4  ;;  %v2493_v29 = vadd.f32 %v2439_v62, %v5454_v42 }
 0x231   : > { %v2218_v2 = vpop.f32.mrb[150].mxu1 }
 0x232   : > { %2525 = vst [vmem:[%s5469_s25 + $0xd0] sm:$0xff] %v2493_v29  ;;  %v2556_v16 = vadd.f32 %v2555_v11, %v2493_v29  ;;  %v2594_v61 = vmul.f32 %v2493_v29, %v2493_v29  ;;  %v2444_v35 = vadd.f32 %v3457_v52, %v2218_v2  ;;  %v2220_v20 = vpop.f32.mrb[151].mxu1 }
 0x234   : > { %v2625_v17 = vadd.f32 %v2624_v54, %v2594_v61  ;;  %v2494_v38 = vadd.f32 %v2444_v35, %v5451_v31 }
 0x235   : > { %v2223_v48 = vpop.f32.mrb[152].mxu1 }
 0x236   : > { %2526 = vst [vmem:[%s5469_s25 + $0xd8] sm:$0xff] %v2494_v38  ;;  %v2557_v25 = vadd.f32 %v2556_v16, %v2494_v38  ;;  %v2595_v15 = vmul.f32 %v2494_v38, %v2494_v38  ;;  %v2449_v22 = vadd.f32 %v2448_v63, %v2223_v48  ;;  %v2225_v45 = vpop.f32.mrb[153].mxu1 }
 0x238   : > { %v2626_v32 = vadd.f32 %v2625_v17, %v2595_v15  ;;  %v2495_v42 = vadd.f32 %v2449_v22, %v5458_v24 }
 0x239   : > { %v2228_v12 = vpop.f32.mrb[154].mxu1 }
 0x23a   : > { %2527 = vst [vmem:[%s5469_s25 + $0xe0] sm:$0xff] %v2495_v42  ;;  %v2558_v3 = vadd.f32 %v2557_v25, %v2495_v42  ;;  %v2596_v44 = vmul.f32 %v2495_v42, %v2495_v42  ;;  %v2454_v52 = vadd.f32 %v5513_v26, %v2228_v12  ;;  %v2230_v40 = vpop.f32.mrb[155].mxu1 }
 0x23c   : > { %v2627_v6 = vadd.f32 %v2626_v32, %v2596_v44  ;;  %v2496_v31 = vadd.f32 %v2454_v52, %v5456_v7 }
 0x23d   : > { %v2233_v39 = vpop.f32.mrb[156].mxu1 }
 0x23e   : > { %2528 = vst [vmem:[%s5469_s25 + $0xe8] sm:$0xff] %v2496_v31  ;;  %v2559_v33 = vadd.f32 %v2558_v3, %v2496_v31  ;;  %v2597_v63 = vmul.f32 %v2496_v31, %v2496_v31  ;;  %v2459_v23 = vadd.f32 %v2458_v59, %v2233_v39  ;;  %v2235_v37 = vpop.f32.mrb[157].mxu1 }
 0x240   : > { %v2628_v18 = vadd.f32 %v2627_v6, %v2597_v63  ;;  %v2497_v24 = vadd.f32 %v2459_v23, %v5462_v41 }
 0x241   : > { %v2238_v53 = vpop.f32.mrb[158].mxu1 }
 0x242   : > { %2529 = vst [vmem:[%s5469_s25 + $0xf0] sm:$0xff] %v2497_v24  ;;  %v2560_v5 = vadd.f32 %v2559_v33, %v2497_v24  ;;  %v2598_v28 = vmul.f32 %v2497_v24, %v2497_v24  ;;  %v2464_v26 = vadd.f32 %v5517_v1, %v2238_v53  ;;  %v2240_v56 = vpop.f32.mrb[159].mxu1 }
 0x244   : > { %v2629_v36 = vadd.f32 %v2628_v18, %v2598_v28  ;;  %v2498_v7 = vadd.f32 %v2464_v26, %v5460_v34 }
 0x246   : > { %2530 = vst [vmem:[%s5469_s25 + $0xf8] sm:$0xff] %v2498_v7  ;;  %v2561_v19 = vadd.f32 %v2560_v5, %v2498_v7  ;;  %v2599_v27 = vmul.f32 %v2498_v7, %v2498_v7 }
 0x248   : > { %v2562_v10 = vrot.slane %v2561_v19, 4  ;;  %v2630_v59 = vadd.f32 %v2629_v36, %v2599_v27 }
 0x24a   : > { %v2563_v50 = vadd.f32 %v2562_v10, %v2561_v19  ;;  %v2631_v30 = vrot.slane %v2630_v59, 4 }
 0x24c   : > { %v2564_v8 = vrot.slane %v2563_v50, 2  ;;  %v2632_v41 = vadd.f32 %v2631_v30, %v2630_v59 }
 0x24e   : > { %v2565_v43 = vadd.f32 %v2564_v8, %v2563_v50  ;;  %v2633_v14 = vrot.slane %v2632_v41, 2 }
 0x250   : > { %v2566_v0 = vrot.slane %v2565_v43, 1  ;;  %v2634_v60 = vadd.f32 %v2633_v14, %v2632_v41 }
 0x252   : > { %v2635_v1 = vrot.slane %v2634_v60, 1  ;;  %v2567_v49 = vadd.f32 %v2566_v0, %v2565_v43 }
 0x254   : > { %v2636_v47 = vadd.f32 %v2635_v1, %v2634_v60 }
 0x256   : > { %v2637_v34 = vsel %vm753_vm1, %v2567_v49, %v2636_v47 }
 0x257   : > { %v2639_v55 = vsel %vm2638_vm3, %v2637_v34, 0.0 }
 0x258   : > { %2640 = vst [vmem:[%s288_s28] sm:$0xff] %v2639_v55 }
 0x259 PF: > { %s17_s23 = sadd.s32 1, %s3752_s23   ;;  %s5742_s21 = smov %s3748_s22 }
 0x25a   : > { %p14_p5 = scmp.ge.s32.totalorder %s17_s23, 4   ;;  %s5743_s22 = smov %s5745_s4 }
 0x25c   :  { %16 = sbr.rel (!%p14_p5) target bundleno = 2 (0x2), region = 187 }
 0x263   :  { %2693 = vsyncmov [#allocation3] }
 0x266   :  { %s2694_s29 = vpop.sfrf %2693 }
 0x267   :  { %p3076_p6 = scmp.ne.s32.totalorder %s2694_s29, 0 }
 0x269   :  { %2698 = shalt.err (%p3076_p6)  }
 0x26a   :  { %2700 = vsyncmov [#allocation3 + $0x1] }
 0x26d   :  { %s2701_s30 = vpop.sfrf %2700 }
 0x26e   :  { %p3077_p7 = scmp.ne.s32.totalorder %s2701_s30, 0 }
 0x270   :  { %2705 = shalt.err (%p3077_p7)  }

</bundles_post_ra>
